<compile_context>
chip_gen: v5e
topology: v5e:2x2
jax: 0.10.0
libtpu: 0.0.40
codegen_flags: <defaults>
</compile_context>

<pallas_src>
import functools
import math

import jax
import jax.numpy as jnp
from jax.experimental import pallas as pl
from jax.experimental.pallas import tpu as pltpu

EPS = 1e-5  # torch nn.LayerNorm default


# ------------------------------ fused Pallas kernel ------------------------------

def _decoder_block_kernel(key_ref, query_ref, x_ref, mask_ref,
                          qkvo_self_ref, qkvo_cross_ref, w1_ref, w2_ref,
                          vec_ref, b1_ref, o_ref,
                          *, B, S, n_heads, compute_dtype):
    """Single invocation: the whole DecoderBlock on VMEM-resident (B*S, E) activations."""
    E = x_ref.shape[-1]
    Dh = E // n_heads
    cd = compute_dtype
    approx = jnp.dtype(cd) == jnp.dtype(jnp.bfloat16)

    # Packed f32 (1, E) vectors (biases / LayerNorm gamma & beta), unpacked by row.
    bo_s, g0, be0 = vec_ref[0:1, :], vec_ref[1:2, :], vec_ref[2:3, :]
    bo_c, g1, be1 = vec_ref[3:4, :], vec_ref[4:5, :], vec_ref[5:6, :]
    b2,   g2, be2 = vec_ref[6:7, :], vec_ref[7:8, :], vec_ref[8:9, :]
    b1 = b1_ref[...]                                  # (1, Hff) f32

    def mm(a_cd, w_cd):
        # MXU matmul: operands in compute_dtype (bf16 on the fast path), f32 accumulation.
        return jnp.dot(a_cd, w_cd, preferred_element_type=jnp.float32)

    def mha(k_cd, q_cd, v_cd, qkvo_ref, bo, mask):
        # Fused full-width projections: one (B*S,E)@(E,E) matmul each.
        q = mm(q_cd, qkvo_ref[0]).astype(cd)          # (B*S, E); 1/sqrt(Dh) folded into wq
        k = mm(k_cd, qkvo_ref[1]).astype(cd)
        v = mm(v_cd, qkvo_ref[2]).astype(cd)
        batch_outs = []
        for b in range(B):                            # batch folded into one grid step
            r = slice(b * S, (b + 1) * S)
            qb, kb, vb = q[r], k[r], v[r]
            heads = []
            for h in range(n_heads):                  # per-head softmax (inherent to MHA)
                c = slice(h * Dh, (h + 1) * Dh)
                s = jax.lax.dot_general(qb[:, c], kb[:, c],
                                        (((1,), (1,)), ((), ())),
                                        preferred_element_type=jnp.float32)  # (S, S) f32
                if mask is not None:
                    # masked_fill(mask == 0, -1e20); scale is already folded into wq, and
                    # exp(-1e20) == 0 regardless, so semantics match the PyTorch module.
                    s = jnp.where(mask[b] == 0.0, jnp.float32(-1e20), s)
                s = s - jnp.max(s, axis=-1, keepdims=True)
                e = jnp.exp(s)
                p = e * pl.reciprocal(jnp.sum(e, axis=-1, keepdims=True), approx=approx)
                heads.append(mm(p.astype(cd), vb[:, c]))       # (S, Dh) f32
            batch_outs.append(jnp.concatenate(heads, axis=-1))  # (S, E)
        cat = jnp.concatenate(batch_outs, axis=0).astype(cd)    # (B*S, E)
        return mm(cat, qkvo_ref[3]) + bo                         # single Wo matmul + bias

    def add_ln(a, b, g, beta):
        h = a + b
        mu = jnp.mean(h, axis=-1, keepdims=True)
        cent = h - mu
        var = jnp.mean(cent * cent, axis=-1, keepdims=True)      # biased var (torch default)
        return cent * jax.lax.rsqrt(var + EPS) * g + beta

    x = x_ref[...]          # (B*S, E) f32
    k_in = key_ref[...]
    q_in = query_ref[...]
    mask = mask_ref[...]    # (B, S, S) f32 of {0, 1}

    # Hoisted activation casts (once per attention input, not per head).
    x_cd = x.astype(cd)

    # --- DecoderBlock: masked self-attention + residual LayerNorm (dropout == identity) ---
    attn = mha(x_cd, x_cd, x_cd, qkvo_self_ref, bo_s, mask)
    value = add_ln(attn, x, g0, be0)

    # --- TransformerBlock: cross attention (mask=None) + LN + FFN + LN ---
    value_cd = value.astype(cd)
    attn2 = mha(k_in.astype(cd), q_in.astype(cd), value_cd, qkvo_cross_ref, bo_c, None)
    n1 = add_ln(attn2, value, g1, be1)

    h1 = jnp.maximum(mm(n1.astype(cd), w1_ref[...]) + b1, 0.0)   # Linear -> ReLU
    ff = mm(h1.astype(cd), w2_ref[...]) + b2                     # -> Linear
    out = add_ln(ff, n1, g2, be2)

    o_ref[...] = out.astype(o_ref.dtype)


# ------------------------------ wrapper ------------------------------

def _full_spec(arr):
    nd = arr.ndim
    return pl.BlockSpec(arr.shape, lambda i, _nd=nd: (0,) * _nd)


def decoder_block(key, query, x, mask, params, n_heads, compute_dtype=jnp.bfloat16):
    """Matches DecoderBlock.forward(key, query, x, mask). One fused, single-step pallas_call."""
    B, S, E = x.shape
    Dh = E // n_heads
    if mask is None:
        mask = jnp.ones((B, 1, S, S), jnp.float32)
    # mask is broadcast over heads ((B,1,S,S) in the PyTorch tutorial) -> squeeze the head dim.
    mask2 = mask.reshape(B, S, S).astype(jnp.float32)

    att, tb = params["attn"], params["tb"]
    att2 = tb["attn"]
    Hff = tb["w1"].shape[1]
    inv = 1.0 / math.sqrt(Dh)

    # Lane-dense (E,E) weights, bf16 on the fast path; score scale folded into wq.
    qkvo_s = jnp.stack([att["wq_big"] * inv, att["wk_big"],
                        att["wv_big"], att["wo"]]).astype(compute_dtype)      # (4, E, E)
    qkvo_c = jnp.stack([att2["wq_big"] * inv, att2["wk_big"],
                        att2["wv_big"], att2["wo"]]).astype(compute_dtype)    # (4, E, E)
    w1c = tb["w1"].astype(compute_dtype)                                      # (E, Hff)
    w2c = tb["w2"].astype(compute_dtype)                                      # (Hff, E)

    # All E-sized bias / gamma / beta vectors packed into one f32 slab.
    vec = jnp.stack([att["bo"], params["norm_g"], params["norm_b"],
                     att2["bo"], tb["norm1_g"], tb["norm1_b"],
                     tb["b2"], tb["norm2_g"], tb["norm2_b"]]).astype(jnp.float32)  # (9, E)
    b1 = tb["b1"].reshape(1, Hff).astype(jnp.float32)

    # Fold the batch dim into the row dim (wrapper-side reshape; E stays the lane dim).
    kfl = key.reshape(B * S, E)
    qfl = query.reshape(B * S, E)
    xfl = x.reshape(B * S, E)

    kern = functools.partial(_decoder_block_kernel, B=B, S=S,
                             n_heads=n_heads, compute_dtype=compute_dtype)

    inputs = (kfl, qfl, xfl, mask2, qkvo_s, qkvo_c, w1c, w2c, vec, b1)

    out = pl.pallas_call(
        kern,
        out_shape=jax.ShapeDtypeStruct((B * S, E), jnp.float32),
        grid=(1,),                                            # whole batch in one step
        in_specs=[_full_spec(a) for a in inputs],
        out_specs=pl.BlockSpec((B * S, E), lambda i: (0, 0)),
        compiler_params=pltpu.CompilerParams(
            dimension_semantics=("arbitrary",),
            vmem_limit_bytes=32 * 1024 * 1024,                # tiny problem; fits any generation
        ),
    )(*inputs)
    return out.reshape(B, S, E)


# ------------------------------ parameter setup ------------------------------

def _mha_params(key, E, H):
    Dh = E // H
    k1, k2, k3, k4, k5 = jax.random.split(key, 5)
    scale = 0.1
    wq = scale * jax.random.normal(k1, (Dh, Dh), jnp.float32)
    wk = scale * jax.random.normal(k2, (Dh, Dh), jnp.float32)
    wv = scale * jax.random.normal(k3, (Dh, Dh), jnp.float32)
    eye = jnp.eye(H, dtype=jnp.float32)
    # The per-head (Dh,Dh) projection is shared across heads:
    #   x.view(B,S,H,Dh) @ W  ==  x @ kron(I_H, W)   (block-diagonal expansion)
    return {
        "wq_big": jnp.kron(eye, wq),
        "wk_big": jnp.kron(eye, wk),
        "wv_big": jnp.kron(eye, wv),
        "wo": scale * jax.random.normal(k4, (E, E), jnp.float32),
        "bo": scale * jax.random.normal(k5, (E,), jnp.float32),
    }


def init_params(key, E, H, expansion):
    ks = jax.random.split(key, 6)
    Hff = expansion * E
    scale = 0.1
    return {
        "attn": _mha_params(ks[0], E, H),
        "norm_g": jnp.ones((E,), jnp.float32),
        "norm_b": jnp.zeros((E,), jnp.float32),
        "tb": {
            "attn": _mha_params(ks[1], E, H),
            "norm1_g": jnp.ones((E,), jnp.float32),
            "norm1_b": jnp.zeros((E,), jnp.float32),
            "norm2_g": jnp.ones((E,), jnp.float32),
            "norm2_b": jnp.zeros((E,), jnp.float32),
            "w1": scale * jax.random.normal(ks[2], (E, Hff), jnp.float32),
            "b1": scale * jax.random.normal(ks[3], (Hff,), jnp.float32),
            "w2": scale * jax.random.normal(ks[4], (Hff, E), jnp.float32),
            "b2": scale * jax.random.normal(ks[5], (E,), jnp.float32),
        },
    }


# ------------------------------ pure-JAX reference ------------------------------

def _ref_mha(key, query, value, p, n_heads, mask=None):
    B, Sk, E = key.shape
    Sq = query.shape[1]
    Dh = E // n_heads
    k = (key.reshape(B * Sk, E) @ p["wk_big"]).reshape(B, Sk, n_heads, Dh).transpose(0, 2, 1, 3)
    q = (query.reshape(B * Sq, E) @ p["wq_big"]).reshape(B, Sq, n_heads, Dh).transpose(0, 2, 1, 3)
    v = (value.reshape(B * Sk, E) @ p["wv_big"]).reshape(B, Sk, n_heads, Dh).transpose(0, 2, 1, 3)
    s = jnp.einsum("bhqd,bhkd->bhqk", q, k)
    if mask is not None:
        s = jnp.where(mask == 0.0, -1e20, s)
    s = s / math.sqrt(Dh)
    pm = jax.nn.softmax(s, axis=-1)
    o = jnp.einsum("bhqk,bhkd->bhqd", pm, v)
    o = o.transpose(0, 2, 1, 3).reshape(B * Sq, E)
    return (o @ p["wo"] + p["bo"]).reshape(B, Sq, E)


def _ref_ln(x, g, b):
    mu = jnp.mean(x, axis=-1, keepdims=True)
    var = jnp.mean((x - mu) ** 2, axis=-1, keepdims=True)
    return (x - mu) / jnp.sqrt(var + EPS) * g + b


def _ref_decoder_block(key, query, x, mask, p, n_heads):
    attention = _ref_mha(x, x, x, p["attn"], n_heads, mask=mask)
    value = _ref_ln(attention + x, p["norm_g"], p["norm_b"])
    tb = p["tb"]
    attn_out = _ref_mha(key, query, value, tb["attn"], n_heads)
    n1 = _ref_ln(attn_out + value, tb["norm1_g"], tb["norm1_b"])
    ff = jnp.maximum(n1 @ tb["w1"] + tb["b1"], 0.0) @ tb["w2"] + tb["b2"]
    return _ref_ln(ff + n1, tb["norm2_g"], tb["norm2_b"])


# ------------------------------ main ------------------------------

if __name__ == "__main__":
    B, S, E, H, EXP = 2, 8, 32, 8, 4  # embed_dim=32, n_heads=8 -> head_dim=4, ffn=128
    root = jax.random.PRNGKey(0)
    kk, kq, kx, kp = jax.random.split(root, 4)
    key_in = jax.random.normal(kk, (B, S, E), jnp.float32)
    query_in = jax.random.normal(kq, (B, S, E), jnp.float32)
    x_in = jax.random.normal(kx, (B, S, E), jnp.float32)
    # causal target mask, broadcastable over heads like the PyTorch tutorial
    mask = jnp.broadcast_to(jnp.tril(jnp.ones((S, S), jnp.float32)), (B, 1, S, S))

    params = init_params(kp, E, H, EXP)
    ref = _ref_decoder_block(key_in, query_in, x_in, mask, params, H)

    # f32 compute path: tight semantics check against the pure-JAX reference.
    out_f32 = decoder_block(key_in, query_in, x_in, mask, params, H,
                            compute_dtype=jnp.float32)
    out_f32 = jax.block_until_ready(out_f32)
    assert out_f32.shape == (B, S, E)
    err_f32 = float(jnp.max(jnp.abs(out_f32 - ref)))
    assert jnp.allclose(out_f32, ref, atol=1e-2, rtol=1e-2), err_f32

    # bf16 MXU path (production config): looser tolerance for bf16 rounding.
    out_bf16 = decoder_block(key_in, query_in, x_in, mask, params, H,
                             compute_dtype=jnp.bfloat16)
    out_bf16 = jax.block_until_ready(out_bf16)
    assert out_bf16.shape == (B, S, E)
    err_bf16 = float(jnp.max(jnp.abs(out_bf16 - ref)))
    assert jnp.allclose(out_bf16, ref, atol=5e-2, rtol=5e-2), err_bf16

    print("KERNEL_OK")
</pallas_src>

<mosaic_0001>
module attributes {stable_mosaic.version = 11 : i64} {
  func.func @_decoder_block_kernel(%arg0: i32, %arg1: memref<16x32xf32, #tpu.memory_space<vmem>>, %arg2: memref<16x32xf32, #tpu.memory_space<vmem>>, %arg3: memref<16x32xf32, #tpu.memory_space<vmem>>, %arg4: memref<2x8x8xf32, #tpu.memory_space<vmem>>, %arg5: memref<4x32x32xf32, #tpu.memory_space<vmem>>, %arg6: memref<4x32x32xf32, #tpu.memory_space<vmem>>, %arg7: memref<32x128xf32, #tpu.memory_space<vmem>>, %arg8: memref<128x32xf32, #tpu.memory_space<vmem>>, %arg9: memref<9x32xf32, #tpu.memory_space<vmem>>, %arg10: memref<1x128xf32, #tpu.memory_space<vmem>>, %arg11: memref<16x32xf32, #tpu.memory_space<vmem>>) attributes {dimension_semantics = [#tpu.dimension_semantics<arbitrary>], iteration_bounds = array<i64: 1>, scalar_prefetch = 0 : i64, scratch_operands = 0 : i64, tpu.core_type = #tpu.core_type<tc>, window_params = [{pipeline_mode = #tpu.pipeline_mode<synchronous>, transform_indices = @transform_0, window_bounds = array<i64: 16, 32>}, {pipeline_mode = #tpu.pipeline_mode<synchronous>, transform_indices = @transform_1, window_bounds = array<i64: 16, 32>}, {pipeline_mode = #tpu.pipeline_mode<synchronous>, transform_indices = @transform_2, window_bounds = array<i64: 16, 32>}, {pipeline_mode = #tpu.pipeline_mode<synchronous>, transform_indices = @transform_3, window_bounds = array<i64: 2, 8, 8>}, {pipeline_mode = #tpu.pipeline_mode<synchronous>, transform_indices = @transform_4, window_bounds = array<i64: 4, 32, 32>}, {pipeline_mode = #tpu.pipeline_mode<synchronous>, transform_indices = @transform_5, window_bounds = array<i64: 4, 32, 32>}, {pipeline_mode = #tpu.pipeline_mode<synchronous>, transform_indices = @transform_6, window_bounds = array<i64: 32, 128>}, {pipeline_mode = #tpu.pipeline_mode<synchronous>, transform_indices = @transform_7, window_bounds = array<i64: 128, 32>}, {pipeline_mode = #tpu.pipeline_mode<synchronous>, transform_indices = @transform_8, window_bounds = array<i64: 9, 32>}, {pipeline_mode = #tpu.pipeline_mode<synchronous>, transform_indices = @transform_9, window_bounds = array<i64: 1, 128>}, {pipeline_mode = #tpu.pipeline_mode<synchronous>, transform_indices = @transform_10, window_bounds = array<i64: 16, 32>}]} {
    %c0 = arith.constant 0 : index
    %c0_0 = arith.constant 0 : index
    %0 = vector.load %arg9[%c0, %c0_0] : memref<9x32xf32, #tpu.memory_space<vmem>>, vector<1x32xf32>
    %c1 = arith.constant 1 : index
    %c0_1 = arith.constant 0 : index
    %1 = vector.load %arg9[%c1, %c0_1] : memref<9x32xf32, #tpu.memory_space<vmem>>, vector<1x32xf32>
    %c2 = arith.constant 2 : index
    %c0_2 = arith.constant 0 : index
    %2 = vector.load %arg9[%c2, %c0_2] : memref<9x32xf32, #tpu.memory_space<vmem>>, vector<1x32xf32>
    %c3 = arith.constant 3 : index
    %c0_3 = arith.constant 0 : index
    %3 = vector.load %arg9[%c3, %c0_3] : memref<9x32xf32, #tpu.memory_space<vmem>>, vector<1x32xf32>
    %c4 = arith.constant 4 : index
    %c0_4 = arith.constant 0 : index
    %4 = vector.load %arg9[%c4, %c0_4] : memref<9x32xf32, #tpu.memory_space<vmem>>, vector<1x32xf32>
    %c5 = arith.constant 5 : index
    %c0_5 = arith.constant 0 : index
    %5 = vector.load %arg9[%c5, %c0_5] : memref<9x32xf32, #tpu.memory_space<vmem>>, vector<1x32xf32>
    %c6 = arith.constant 6 : index
    %c0_6 = arith.constant 0 : index
    %6 = vector.load %arg9[%c6, %c0_6] : memref<9x32xf32, #tpu.memory_space<vmem>>, vector<1x32xf32>
    %c7 = arith.constant 7 : index
    %c0_7 = arith.constant 0 : index
    %7 = vector.load %arg9[%c7, %c0_7] : memref<9x32xf32, #tpu.memory_space<vmem>>, vector<1x32xf32>
    %c8 = arith.constant 8 : index
    %c0_8 = arith.constant 0 : index
    %8 = vector.load %arg9[%c8, %c0_8] : memref<9x32xf32, #tpu.memory_space<vmem>>, vector<1x32xf32>
    %c0_9 = arith.constant 0 : index
    %c0_10 = arith.constant 0 : index
    %9 = vector.load %arg10[%c0_9, %c0_10] : memref<1x128xf32, #tpu.memory_space<vmem>>, vector<1x128xf32>
    %c0_11 = arith.constant 0 : index
    %c0_12 = arith.constant 0 : index
    %10 = vector.load %arg3[%c0_11, %c0_12] : memref<16x32xf32, #tpu.memory_space<vmem>>, vector<16x32xf32>
    %c0_13 = arith.constant 0 : index
    %c0_14 = arith.constant 0 : index
    %11 = vector.load %arg1[%c0_13, %c0_14] : memref<16x32xf32, #tpu.memory_space<vmem>>, vector<16x32xf32>
    %c0_15 = arith.constant 0 : index
    %c0_16 = arith.constant 0 : index
    %12 = vector.load %arg2[%c0_15, %c0_16] : memref<16x32xf32, #tpu.memory_space<vmem>>, vector<16x32xf32>
    %c0_17 = arith.constant 0 : index
    %c0_18 = arith.constant 0 : index
    %c0_19 = arith.constant 0 : index
    %13 = vector.load %arg4[%c0_17, %c0_18, %c0_19] : memref<2x8x8xf32, #tpu.memory_space<vmem>>, vector<2x8x8xf32>
    %c0_20 = arith.constant 0 : index
    %c0_21 = arith.constant 0 : index
    %c0_22 = arith.constant 0 : index
    %14 = vector.load %arg5[%c0_20, %c0_21, %c0_22] : memref<4x32x32xf32, #tpu.memory_space<vmem>>, vector<1x32x32xf32>
    %15 = vector.shape_cast %14 : vector<1x32x32xf32> to vector<32x32xf32>
    %cst = arith.constant dense<0.000000e+00> : vector<16x32xf32>
    %16 = tpu.matmul %10, %15, %cst {dimension_numbers = #tpu.dot_dimension_numbers<[1], [0], [0], [1], [0, 0, 1, 1], [], []>} : vector<16x32xf32>, vector<32x32xf32>, vector<16x32xf32> -> vector<16x32xf32>
    %c1_23 = arith.constant 1 : index
    %c0_24 = arith.constant 0 : index
    %c0_25 = arith.constant 0 : index
    %17 = vector.load %arg5[%c1_23, %c0_24, %c0_25] : memref<4x32x32xf32, #tpu.memory_space<vmem>>, vector<1x32x32xf32>
    %18 = vector.shape_cast %17 : vector<1x32x32xf32> to vector<32x32xf32>
    %cst_26 = arith.constant dense<0.000000e+00> : vector<16x32xf32>
    %19 = tpu.matmul %10, %18, %cst_26 {dimension_numbers = #tpu.dot_dimension_numbers<[1], [0], [0], [1], [0, 0, 1, 1], [], []>} : vector<16x32xf32>, vector<32x32xf32>, vector<16x32xf32> -> vector<16x32xf32>
    %c2_27 = arith.constant 2 : index
    %c0_28 = arith.constant 0 : index
    %c0_29 = arith.constant 0 : index
    %20 = vector.load %arg5[%c2_27, %c0_28, %c0_29] : memref<4x32x32xf32, #tpu.memory_space<vmem>>, vector<1x32x32xf32>
    %21 = vector.shape_cast %20 : vector<1x32x32xf32> to vector<32x32xf32>
    %cst_30 = arith.constant dense<0.000000e+00> : vector<16x32xf32>
    %22 = tpu.matmul %10, %21, %cst_30 {dimension_numbers = #tpu.dot_dimension_numbers<[1], [0], [0], [1], [0, 0, 1, 1], [], []>} : vector<16x32xf32>, vector<32x32xf32>, vector<16x32xf32> -> vector<16x32xf32>
    %23 = vector.extract_strided_slice %16 {offsets = [0, 0], sizes = [8, 32], strides = [1, 1]} : vector<16x32xf32> to vector<8x32xf32>
    %24 = vector.extract_strided_slice %19 {offsets = [0, 0], sizes = [8, 32], strides = [1, 1]} : vector<16x32xf32> to vector<8x32xf32>
    %25 = vector.extract_strided_slice %22 {offsets = [0, 0], sizes = [8, 32], strides = [1, 1]} : vector<16x32xf32> to vector<8x32xf32>
    %26 = vector.extract_strided_slice %23 {offsets = [0, 0], sizes = [8, 4], strides = [1, 1]} : vector<8x32xf32> to vector<8x4xf32>
    %27 = vector.extract_strided_slice %24 {offsets = [0, 0], sizes = [8, 4], strides = [1, 1]} : vector<8x32xf32> to vector<8x4xf32>
    %cst_31 = arith.constant dense<0.000000e+00> : vector<8x8xf32>
    %28 = tpu.matmul %26, %27, %cst_31 {dimension_numbers = #tpu.dot_dimension_numbers<[1], [1], [0], [0], [0, 0, 1, 0], [], []>} : vector<8x4xf32>, vector<8x4xf32>, vector<8x8xf32> -> vector<8x8xf32>
    %29 = vector.extract_strided_slice %13 {offsets = [0, 0, 0], sizes = [1, 8, 8], strides = [1, 1, 1]} : vector<2x8x8xf32> to vector<1x8x8xf32>
    %30 = vector.shape_cast %29 : vector<1x8x8xf32> to vector<8x8xf32>
    %cst_32 = arith.constant 0.000000e+00 : f32
    %31 = vector.broadcast %cst_32 : f32 to vector<8x8xf32>
    %32 = arith.cmpf oeq, %30, %31 : vector<8x8xf32>
    %cst_33 = arith.constant -1.000000e+20 : f32
    %33 = vector.broadcast %cst_33 : f32 to vector<8x8xf32>
    %34 = arith.select %32, %33, %28 : vector<8x8xi1>, vector<8x8xf32>
    %cst_34 = arith.constant dense<0xFF800000> : vector<8xf32>
    %35 = vector.multi_reduction <maximumf>, %34, %cst_34 [1] : vector<8x8xf32> to vector<8xf32>
    %36 = vector.shape_cast %35 : vector<8xf32> to vector<8x1xf32>
    %37 = vector.broadcast %36 : vector<8x1xf32> to vector<8x8xf32>
    %38 = arith.subf %34, %37 : vector<8x8xf32>
    %39 = math.exp %38 : vector<8x8xf32>
    %cst_35 = arith.constant dense<0.000000e+00> : vector<8xf32>
    %40 = vector.multi_reduction <add>, %39, %cst_35 [1] : vector<8x8xf32> to vector<8xf32>
    %41 = vector.shape_cast %40 : vector<8xf32> to vector<8x1xf32>
    %42 = tpu.reciprocal %41 : vector<8x1xf32> -> vector<8x1xf32>
    %43 = vector.broadcast %42 : vector<8x1xf32> to vector<8x8xf32>
    %44 = arith.mulf %39, %43 : vector<8x8xf32>
    %45 = vector.extract_strided_slice %25 {offsets = [0, 0], sizes = [8, 4], strides = [1, 1]} : vector<8x32xf32> to vector<8x4xf32>
    %cst_36 = arith.constant dense<0.000000e+00> : vector<8x4xf32>
    %46 = tpu.matmul %44, %45, %cst_36 {dimension_numbers = #tpu.dot_dimension_numbers<[1], [0], [0], [1], [0, 0, 1, 1], [], []>} : vector<8x8xf32>, vector<8x4xf32>, vector<8x4xf32> -> vector<8x4xf32>
    %47 = vector.extract_strided_slice %23 {offsets = [0, 4], sizes = [8, 4], strides = [1, 1]} : vector<8x32xf32> to vector<8x4xf32>
    %48 = vector.extract_strided_slice %24 {offsets = [0, 4], sizes = [8, 4], strides = [1, 1]} : vector<8x32xf32> to vector<8x4xf32>
    %cst_37 = arith.constant dense<0.000000e+00> : vector<8x8xf32>
    %49 = tpu.matmul %47, %48, %cst_37 {dimension_numbers = #tpu.dot_dimension_numbers<[1], [1], [0], [0], [0, 0, 1, 0], [], []>} : vector<8x4xf32>, vector<8x4xf32>, vector<8x8xf32> -> vector<8x8xf32>
    %50 = vector.extract_strided_slice %13 {offsets = [0, 0, 0], sizes = [1, 8, 8], strides = [1, 1, 1]} : vector<2x8x8xf32> to vector<1x8x8xf32>
    %51 = vector.shape_cast %50 : vector<1x8x8xf32> to vector<8x8xf32>
    %cst_38 = arith.constant 0.000000e+00 : f32
    %52 = vector.broadcast %cst_38 : f32 to vector<8x8xf32>
    %53 = arith.cmpf oeq, %51, %52 : vector<8x8xf32>
    %cst_39 = arith.constant -1.000000e+20 : f32
    %54 = vector.broadcast %cst_39 : f32 to vector<8x8xf32>
    %55 = arith.select %53, %54, %49 : vector<8x8xi1>, vector<8x8xf32>
    %cst_40 = arith.constant dense<0xFF800000> : vector<8xf32>
    %56 = vector.multi_reduction <maximumf>, %55, %cst_40 [1] : vector<8x8xf32> to vector<8xf32>
    %57 = vector.shape_cast %56 : vector<8xf32> to vector<8x1xf32>
    %58 = vector.broadcast %57 : vector<8x1xf32> to vector<8x8xf32>
    %59 = arith.subf %55, %58 : vector<8x8xf32>
    %60 = math.exp %59 : vector<8x8xf32>
    %cst_41 = arith.constant dense<0.000000e+00> : vector<8xf32>
    %61 = vector.multi_reduction <add>, %60, %cst_41 [1] : vector<8x8xf32> to vector<8xf32>
    %62 = vector.shape_cast %61 : vector<8xf32> to vector<8x1xf32>
    %63 = tpu.reciprocal %62 : vector<8x1xf32> -> vector<8x1xf32>
    %64 = vector.broadcast %63 : vector<8x1xf32> to vector<8x8xf32>
    %65 = arith.mulf %60, %64 : vector<8x8xf32>
    %66 = vector.extract_strided_slice %25 {offsets = [0, 4], sizes = [8, 4], strides = [1, 1]} : vector<8x32xf32> to vector<8x4xf32>
    %cst_42 = arith.constant dense<0.000000e+00> : vector<8x4xf32>
    %67 = tpu.matmul %65, %66, %cst_42 {dimension_numbers = #tpu.dot_dimension_numbers<[1], [0], [0], [1], [0, 0, 1, 1], [], []>} : vector<8x8xf32>, vector<8x4xf32>, vector<8x4xf32> -> vector<8x4xf32>
    %68 = vector.extract_strided_slice %23 {offsets = [0, 8], sizes = [8, 4], strides = [1, 1]} : vector<8x32xf32> to vector<8x4xf32>
    %69 = vector.extract_strided_slice %24 {offsets = [0, 8], sizes = [8, 4], strides = [1, 1]} : vector<8x32xf32> to vector<8x4xf32>
    %cst_43 = arith.constant dense<0.000000e+00> : vector<8x8xf32>
    %70 = tpu.matmul %68, %69, %cst_43 {dimension_numbers = #tpu.dot_dimension_numbers<[1], [1], [0], [0], [0, 0, 1, 0], [], []>} : vector<8x4xf32>, vector<8x4xf32>, vector<8x8xf32> -> vector<8x8xf32>
    %71 = vector.extract_strided_slice %13 {offsets = [0, 0, 0], sizes = [1, 8, 8], strides = [1, 1, 1]} : vector<2x8x8xf32> to vector<1x8x8xf32>
    %72 = vector.shape_cast %71 : vector<1x8x8xf32> to vector<8x8xf32>
    %cst_44 = arith.constant 0.000000e+00 : f32
    %73 = vector.broadcast %cst_44 : f32 to vector<8x8xf32>
    %74 = arith.cmpf oeq, %72, %73 : vector<8x8xf32>
    %cst_45 = arith.constant -1.000000e+20 : f32
    %75 = vector.broadcast %cst_45 : f32 to vector<8x8xf32>
    %76 = arith.select %74, %75, %70 : vector<8x8xi1>, vector<8x8xf32>
    %cst_46 = arith.constant dense<0xFF800000> : vector<8xf32>
    %77 = vector.multi_reduction <maximumf>, %76, %cst_46 [1] : vector<8x8xf32> to vector<8xf32>
    %78 = vector.shape_cast %77 : vector<8xf32> to vector<8x1xf32>
    %79 = vector.broadcast %78 : vector<8x1xf32> to vector<8x8xf32>
    %80 = arith.subf %76, %79 : vector<8x8xf32>
    %81 = math.exp %80 : vector<8x8xf32>
    %cst_47 = arith.constant dense<0.000000e+00> : vector<8xf32>
    %82 = vector.multi_reduction <add>, %81, %cst_47 [1] : vector<8x8xf32> to vector<8xf32>
    %83 = vector.shape_cast %82 : vector<8xf32> to vector<8x1xf32>
    %84 = tpu.reciprocal %83 : vector<8x1xf32> -> vector<8x1xf32>
    %85 = vector.broadcast %84 : vector<8x1xf32> to vector<8x8xf32>
    %86 = arith.mulf %81, %85 : vector<8x8xf32>
    %87 = vector.extract_strided_slice %25 {offsets = [0, 8], sizes = [8, 4], strides = [1, 1]} : vector<8x32xf32> to vector<8x4xf32>
    %cst_48 = arith.constant dense<0.000000e+00> : vector<8x4xf32>
    %88 = tpu.matmul %86, %87, %cst_48 {dimension_numbers = #tpu.dot_dimension_numbers<[1], [0], [0], [1], [0, 0, 1, 1], [], []>} : vector<8x8xf32>, vector<8x4xf32>, vector<8x4xf32> -> vector<8x4xf32>
    %89 = vector.extract_strided_slice %23 {offsets = [0, 12], sizes = [8, 4], strides = [1, 1]} : vector<8x32xf32> to vector<8x4xf32>
    %90 = vector.extract_strided_slice %24 {offsets = [0, 12], sizes = [8, 4], strides = [1, 1]} : vector<8x32xf32> to vector<8x4xf32>
    %cst_49 = arith.constant dense<0.000000e+00> : vector<8x8xf32>
    %91 = tpu.matmul %89, %90, %cst_49 {dimension_numbers = #tpu.dot_dimension_numbers<[1], [1], [0], [0], [0, 0, 1, 0], [], []>} : vector<8x4xf32>, vector<8x4xf32>, vector<8x8xf32> -> vector<8x8xf32>
    %92 = vector.extract_strided_slice %13 {offsets = [0, 0, 0], sizes = [1, 8, 8], strides = [1, 1, 1]} : vector<2x8x8xf32> to vector<1x8x8xf32>
    %93 = vector.shape_cast %92 : vector<1x8x8xf32> to vector<8x8xf32>
    %cst_50 = arith.constant 0.000000e+00 : f32
    %94 = vector.broadcast %cst_50 : f32 to vector<8x8xf32>
    %95 = arith.cmpf oeq, %93, %94 : vector<8x8xf32>
    %cst_51 = arith.constant -1.000000e+20 : f32
    %96 = vector.broadcast %cst_51 : f32 to vector<8x8xf32>
    %97 = arith.select %95, %96, %91 : vector<8x8xi1>, vector<8x8xf32>
    %cst_52 = arith.constant dense<0xFF800000> : vector<8xf32>
    %98 = vector.multi_reduction <maximumf>, %97, %cst_52 [1] : vector<8x8xf32> to vector<8xf32>
    %99 = vector.shape_cast %98 : vector<8xf32> to vector<8x1xf32>
    %100 = vector.broadcast %99 : vector<8x1xf32> to vector<8x8xf32>
    %101 = arith.subf %97, %100 : vector<8x8xf32>
    %102 = math.exp %101 : vector<8x8xf32>
    %cst_53 = arith.constant dense<0.000000e+00> : vector<8xf32>
    %103 = vector.multi_reduction <add>, %102, %cst_53 [1] : vector<8x8xf32> to vector<8xf32>
    %104 = vector.shape_cast %103 : vector<8xf32> to vector<8x1xf32>
    %105 = tpu.reciprocal %104 : vector<8x1xf32> -> vector<8x1xf32>
    %106 = vector.broadcast %105 : vector<8x1xf32> to vector<8x8xf32>
    %107 = arith.mulf %102, %106 : vector<8x8xf32>
    %108 = vector.extract_strided_slice %25 {offsets = [0, 12], sizes = [8, 4], strides = [1, 1]} : vector<8x32xf32> to vector<8x4xf32>
    %cst_54 = arith.constant dense<0.000000e+00> : vector<8x4xf32>
    %109 = tpu.matmul %107, %108, %cst_54 {dimension_numbers = #tpu.dot_dimension_numbers<[1], [0], [0], [1], [0, 0, 1, 1], [], []>} : vector<8x8xf32>, vector<8x4xf32>, vector<8x4xf32> -> vector<8x4xf32>
    %110 = vector.extract_strided_slice %23 {offsets = [0, 16], sizes = [8, 4], strides = [1, 1]} : vector<8x32xf32> to vector<8x4xf32>
    %111 = vector.extract_strided_slice %24 {offsets = [0, 16], sizes = [8, 4], strides = [1, 1]} : vector<8x32xf32> to vector<8x4xf32>
    %cst_55 = arith.constant dense<0.000000e+00> : vector<8x8xf32>
    %112 = tpu.matmul %110, %111, %cst_55 {dimension_numbers = #tpu.dot_dimension_numbers<[1], [1], [0], [0], [0, 0, 1, 0], [], []>} : vector<8x4xf32>, vector<8x4xf32>, vector<8x8xf32> -> vector<8x8xf32>
    %113 = vector.extract_strided_slice %13 {offsets = [0, 0, 0], sizes = [1, 8, 8], strides = [1, 1, 1]} : vector<2x8x8xf32> to vector<1x8x8xf32>
    %114 = vector.shape_cast %113 : vector<1x8x8xf32> to vector<8x8xf32>
    %cst_56 = arith.constant 0.000000e+00 : f32
    %115 = vector.broadcast %cst_56 : f32 to vector<8x8xf32>
    %116 = arith.cmpf oeq, %114, %115 : vector<8x8xf32>
    %cst_57 = arith.constant -1.000000e+20 : f32
    %117 = vector.broadcast %cst_57 : f32 to vector<8x8xf32>
    %118 = arith.select %116, %117, %112 : vector<8x8xi1>, vector<8x8xf32>
    %cst_58 = arith.constant dense<0xFF800000> : vector<8xf32>
    %119 = vector.multi_reduction <maximumf>, %118, %cst_58 [1] : vector<8x8xf32> to vector<8xf32>
    %120 = vector.shape_cast %119 : vector<8xf32> to vector<8x1xf32>
    %121 = vector.broadcast %120 : vector<8x1xf32> to vector<8x8xf32>
    %122 = arith.subf %118, %121 : vector<8x8xf32>
    %123 = math.exp %122 : vector<8x8xf32>
    %cst_59 = arith.constant dense<0.000000e+00> : vector<8xf32>
    %124 = vector.multi_reduction <add>, %123, %cst_59 [1] : vector<8x8xf32> to vector<8xf32>
    %125 = vector.shape_cast %124 : vector<8xf32> to vector<8x1xf32>
    %126 = tpu.reciprocal %125 : vector<8x1xf32> -> vector<8x1xf32>
    %127 = vector.broadcast %126 : vector<8x1xf32> to vector<8x8xf32>
    %128 = arith.mulf %123, %127 : vector<8x8xf32>
    %129 = vector.extract_strided_slice %25 {offsets = [0, 16], sizes = [8, 4], strides = [1, 1]} : vector<8x32xf32> to vector<8x4xf32>
    %cst_60 = arith.constant dense<0.000000e+00> : vector<8x4xf32>
    %130 = tpu.matmul %128, %129, %cst_60 {dimension_numbers = #tpu.dot_dimension_numbers<[1], [0], [0], [1], [0, 0, 1, 1], [], []>} : vector<8x8xf32>, vector<8x4xf32>, vector<8x4xf32> -> vector<8x4xf32>
    %131 = vector.extract_strided_slice %23 {offsets = [0, 20], sizes = [8, 4], strides = [1, 1]} : vector<8x32xf32> to vector<8x4xf32>
    %132 = vector.extract_strided_slice %24 {offsets = [0, 20], sizes = [8, 4], strides = [1, 1]} : vector<8x32xf32> to vector<8x4xf32>
    %cst_61 = arith.constant dense<0.000000e+00> : vector<8x8xf32>
    %133 = tpu.matmul %131, %132, %cst_61 {dimension_numbers = #tpu.dot_dimension_numbers<[1], [1], [0], [0], [0, 0, 1, 0], [], []>} : vector<8x4xf32>, vector<8x4xf32>, vector<8x8xf32> -> vector<8x8xf32>
    %134 = vector.extract_strided_slice %13 {offsets = [0, 0, 0], sizes = [1, 8, 8], strides = [1, 1, 1]} : vector<2x8x8xf32> to vector<1x8x8xf32>
    %135 = vector.shape_cast %134 : vector<1x8x8xf32> to vector<8x8xf32>
    %cst_62 = arith.constant 0.000000e+00 : f32
    %136 = vector.broadcast %cst_62 : f32 to vector<8x8xf32>
    %137 = arith.cmpf oeq, %135, %136 : vector<8x8xf32>
    %cst_63 = arith.constant -1.000000e+20 : f32
    %138 = vector.broadcast %cst_63 : f32 to vector<8x8xf32>
    %139 = arith.select %137, %138, %133 : vector<8x8xi1>, vector<8x8xf32>
    %cst_64 = arith.constant dense<0xFF800000> : vector<8xf32>
    %140 = vector.multi_reduction <maximumf>, %139, %cst_64 [1] : vector<8x8xf32> to vector<8xf32>
    %141 = vector.shape_cast %140 : vector<8xf32> to vector<8x1xf32>
    %142 = vector.broadcast %141 : vector<8x1xf32> to vector<8x8xf32>
    %143 = arith.subf %139, %142 : vector<8x8xf32>
    %144 = math.exp %143 : vector<8x8xf32>
    %cst_65 = arith.constant dense<0.000000e+00> : vector<8xf32>
    %145 = vector.multi_reduction <add>, %144, %cst_65 [1] : vector<8x8xf32> to vector<8xf32>
    %146 = vector.shape_cast %145 : vector<8xf32> to vector<8x1xf32>
    %147 = tpu.reciprocal %146 : vector<8x1xf32> -> vector<8x1xf32>
    %148 = vector.broadcast %147 : vector<8x1xf32> to vector<8x8xf32>
    %149 = arith.mulf %144, %148 : vector<8x8xf32>
    %150 = vector.extract_strided_slice %25 {offsets = [0, 20], sizes = [8, 4], strides = [1, 1]} : vector<8x32xf32> to vector<8x4xf32>
    %cst_66 = arith.constant dense<0.000000e+00> : vector<8x4xf32>
    %151 = tpu.matmul %149, %150, %cst_66 {dimension_numbers = #tpu.dot_dimension_numbers<[1], [0], [0], [1], [0, 0, 1, 1], [], []>} : vector<8x8xf32>, vector<8x4xf32>, vector<8x4xf32> -> vector<8x4xf32>
    %152 = vector.extract_strided_slice %23 {offsets = [0, 24], sizes = [8, 4], strides = [1, 1]} : vector<8x32xf32> to vector<8x4xf32>
    %153 = vector.extract_strided_slice %24 {offsets = [0, 24], sizes = [8, 4], strides = [1, 1]} : vector<8x32xf32> to vector<8x4xf32>
    %cst_67 = arith.constant dense<0.000000e+00> : vector<8x8xf32>
    %154 = tpu.matmul %152, %153, %cst_67 {dimension_numbers = #tpu.dot_dimension_numbers<[1], [1], [0], [0], [0, 0, 1, 0], [], []>} : vector<8x4xf32>, vector<8x4xf32>, vector<8x8xf32> -> vector<8x8xf32>
    %155 = vector.extract_strided_slice %13 {offsets = [0, 0, 0], sizes = [1, 8, 8], strides = [1, 1, 1]} : vector<2x8x8xf32> to vector<1x8x8xf32>
    %156 = vector.shape_cast %155 : vector<1x8x8xf32> to vector<8x8xf32>
    %cst_68 = arith.constant 0.000000e+00 : f32
    %157 = vector.broadcast %cst_68 : f32 to vector<8x8xf32>
    %158 = arith.cmpf oeq, %156, %157 : vector<8x8xf32>
    %cst_69 = arith.constant -1.000000e+20 : f32
    %159 = vector.broadcast %cst_69 : f32 to vector<8x8xf32>
    %160 = arith.select %158, %159, %154 : vector<8x8xi1>, vector<8x8xf32>
    %cst_70 = arith.constant dense<0xFF800000> : vector<8xf32>
    %161 = vector.multi_reduction <maximumf>, %160, %cst_70 [1] : vector<8x8xf32> to vector<8xf32>
    %162 = vector.shape_cast %161 : vector<8xf32> to vector<8x1xf32>
    %163 = vector.broadcast %162 : vector<8x1xf32> to vector<8x8xf32>
    %164 = arith.subf %160, %163 : vector<8x8xf32>
    %165 = math.exp %164 : vector<8x8xf32>
    %cst_71 = arith.constant dense<0.000000e+00> : vector<8xf32>
    %166 = vector.multi_reduction <add>, %165, %cst_71 [1] : vector<8x8xf32> to vector<8xf32>
    %167 = vector.shape_cast %166 : vector<8xf32> to vector<8x1xf32>
    %168 = tpu.reciprocal %167 : vector<8x1xf32> -> vector<8x1xf32>
    %169 = vector.broadcast %168 : vector<8x1xf32> to vector<8x8xf32>
    %170 = arith.mulf %165, %169 : vector<8x8xf32>
    %171 = vector.extract_strided_slice %25 {offsets = [0, 24], sizes = [8, 4], strides = [1, 1]} : vector<8x32xf32> to vector<8x4xf32>
    %cst_72 = arith.constant dense<0.000000e+00> : vector<8x4xf32>
    %172 = tpu.matmul %170, %171, %cst_72 {dimension_numbers = #tpu.dot_dimension_numbers<[1], [0], [0], [1], [0, 0, 1, 1], [], []>} : vector<8x8xf32>, vector<8x4xf32>, vector<8x4xf32> -> vector<8x4xf32>
    %173 = vector.extract_strided_slice %23 {offsets = [0, 28], sizes = [8, 4], strides = [1, 1]} : vector<8x32xf32> to vector<8x4xf32>
    %174 = vector.extract_strided_slice %24 {offsets = [0, 28], sizes = [8, 4], strides = [1, 1]} : vector<8x32xf32> to vector<8x4xf32>
    %cst_73 = arith.constant dense<0.000000e+00> : vector<8x8xf32>
    %175 = tpu.matmul %173, %174, %cst_73 {dimension_numbers = #tpu.dot_dimension_numbers<[1], [1], [0], [0], [0, 0, 1, 0], [], []>} : vector<8x4xf32>, vector<8x4xf32>, vector<8x8xf32> -> vector<8x8xf32>
    %176 = vector.extract_strided_slice %13 {offsets = [0, 0, 0], sizes = [1, 8, 8], strides = [1, 1, 1]} : vector<2x8x8xf32> to vector<1x8x8xf32>
    %177 = vector.shape_cast %176 : vector<1x8x8xf32> to vector<8x8xf32>
    %cst_74 = arith.constant 0.000000e+00 : f32
    %178 = vector.broadcast %cst_74 : f32 to vector<8x8xf32>
    %179 = arith.cmpf oeq, %177, %178 : vector<8x8xf32>
    %cst_75 = arith.constant -1.000000e+20 : f32
    %180 = vector.broadcast %cst_75 : f32 to vector<8x8xf32>
    %181 = arith.select %179, %180, %175 : vector<8x8xi1>, vector<8x8xf32>
    %cst_76 = arith.constant dense<0xFF800000> : vector<8xf32>
    %182 = vector.multi_reduction <maximumf>, %181, %cst_76 [1] : vector<8x8xf32> to vector<8xf32>
    %183 = vector.shape_cast %182 : vector<8xf32> to vector<8x1xf32>
    %184 = vector.broadcast %183 : vector<8x1xf32> to vector<8x8xf32>
    %185 = arith.subf %181, %184 : vector<8x8xf32>
    %186 = math.exp %185 : vector<8x8xf32>
    %cst_77 = arith.constant dense<0.000000e+00> : vector<8xf32>
    %187 = vector.multi_reduction <add>, %186, %cst_77 [1] : vector<8x8xf32> to vector<8xf32>
    %188 = vector.shape_cast %187 : vector<8xf32> to vector<8x1xf32>
    %189 = tpu.reciprocal %188 : vector<8x1xf32> -> vector<8x1xf32>
    %190 = vector.broadcast %189 : vector<8x1xf32> to vector<8x8xf32>
    %191 = arith.mulf %186, %190 : vector<8x8xf32>
    %192 = vector.extract_strided_slice %25 {offsets = [0, 28], sizes = [8, 4], strides = [1, 1]} : vector<8x32xf32> to vector<8x4xf32>
    %cst_78 = arith.constant dense<0.000000e+00> : vector<8x4xf32>
    %193 = tpu.matmul %191, %192, %cst_78 {dimension_numbers = #tpu.dot_dimension_numbers<[1], [0], [0], [1], [0, 0, 1, 1], [], []>} : vector<8x8xf32>, vector<8x4xf32>, vector<8x4xf32> -> vector<8x4xf32>
    %194 = tpu.concatenate %46, %67, %88, %109, %130, %151, %172, %193 in 1 : vector<8x4xf32>, vector<8x4xf32>, vector<8x4xf32>, vector<8x4xf32>, vector<8x4xf32>, vector<8x4xf32>, vector<8x4xf32>, vector<8x4xf32> -> vector<8x32xf32>
    %195 = vector.extract_strided_slice %16 {offsets = [8, 0], sizes = [8, 32], strides = [1, 1]} : vector<16x32xf32> to vector<8x32xf32>
    %196 = vector.extract_strided_slice %19 {offsets = [8, 0], sizes = [8, 32], strides = [1, 1]} : vector<16x32xf32> to vector<8x32xf32>
    %197 = vector.extract_strided_slice %22 {offsets = [8, 0], sizes = [8, 32], strides = [1, 1]} : vector<16x32xf32> to vector<8x32xf32>
    %198 = vector.extract_strided_slice %195 {offsets = [0, 0], sizes = [8, 4], strides = [1, 1]} : vector<8x32xf32> to vector<8x4xf32>
    %199 = vector.extract_strided_slice %196 {offsets = [0, 0], sizes = [8, 4], strides = [1, 1]} : vector<8x32xf32> to vector<8x4xf32>
    %cst_79 = arith.constant dense<0.000000e+00> : vector<8x8xf32>
    %200 = tpu.matmul %198, %199, %cst_79 {dimension_numbers = #tpu.dot_dimension_numbers<[1], [1], [0], [0], [0, 0, 1, 0], [], []>} : vector<8x4xf32>, vector<8x4xf32>, vector<8x8xf32> -> vector<8x8xf32>
    %201 = vector.extract_strided_slice %13 {offsets = [1, 0, 0], sizes = [1, 8, 8], strides = [1, 1, 1]} : vector<2x8x8xf32> to vector<1x8x8xf32>
    %202 = vector.shape_cast %201 : vector<1x8x8xf32> to vector<8x8xf32>
    %cst_80 = arith.constant 0.000000e+00 : f32
    %203 = vector.broadcast %cst_80 : f32 to vector<8x8xf32>
    %204 = arith.cmpf oeq, %202, %203 : vector<8x8xf32>
    %cst_81 = arith.constant -1.000000e+20 : f32
    %205 = vector.broadcast %cst_81 : f32 to vector<8x8xf32>
    %206 = arith.select %204, %205, %200 : vector<8x8xi1>, vector<8x8xf32>
    %cst_82 = arith.constant dense<0xFF800000> : vector<8xf32>
    %207 = vector.multi_reduction <maximumf>, %206, %cst_82 [1] : vector<8x8xf32> to vector<8xf32>
    %208 = vector.shape_cast %207 : vector<8xf32> to vector<8x1xf32>
    %209 = vector.broadcast %208 : vector<8x1xf32> to vector<8x8xf32>
    %210 = arith.subf %206, %209 : vector<8x8xf32>
    %211 = math.exp %210 : vector<8x8xf32>
    %cst_83 = arith.constant dense<0.000000e+00> : vector<8xf32>
    %212 = vector.multi_reduction <add>, %211, %cst_83 [1] : vector<8x8xf32> to vector<8xf32>
    %213 = vector.shape_cast %212 : vector<8xf32> to vector<8x1xf32>
    %214 = tpu.reciprocal %213 : vector<8x1xf32> -> vector<8x1xf32>
    %215 = vector.broadcast %214 : vector<8x1xf32> to vector<8x8xf32>
    %216 = arith.mulf %211, %215 : vector<8x8xf32>
    %217 = vector.extract_strided_slice %197 {offsets = [0, 0], sizes = [8, 4], strides = [1, 1]} : vector<8x32xf32> to vector<8x4xf32>
    %cst_84 = arith.constant dense<0.000000e+00> : vector<8x4xf32>
    %218 = tpu.matmul %216, %217, %cst_84 {dimension_numbers = #tpu.dot_dimension_numbers<[1], [0], [0], [1], [0, 0, 1, 1], [], []>} : vector<8x8xf32>, vector<8x4xf32>, vector<8x4xf32> -> vector<8x4xf32>
    %219 = vector.extract_strided_slice %195 {offsets = [0, 4], sizes = [8, 4], strides = [1, 1]} : vector<8x32xf32> to vector<8x4xf32>
    %220 = vector.extract_strided_slice %196 {offsets = [0, 4], sizes = [8, 4], strides = [1, 1]} : vector<8x32xf32> to vector<8x4xf32>
    %cst_85 = arith.constant dense<0.000000e+00> : vector<8x8xf32>
    %221 = tpu.matmul %219, %220, %cst_85 {dimension_numbers = #tpu.dot_dimension_numbers<[1], [1], [0], [0], [0, 0, 1, 0], [], []>} : vector<8x4xf32>, vector<8x4xf32>, vector<8x8xf32> -> vector<8x8xf32>
    %222 = vector.extract_strided_slice %13 {offsets = [1, 0, 0], sizes = [1, 8, 8], strides = [1, 1, 1]} : vector<2x8x8xf32> to vector<1x8x8xf32>
    %223 = vector.shape_cast %222 : vector<1x8x8xf32> to vector<8x8xf32>
    %cst_86 = arith.constant 0.000000e+00 : f32
    %224 = vector.broadcast %cst_86 : f32 to vector<8x8xf32>
    %225 = arith.cmpf oeq, %223, %224 : vector<8x8xf32>
    %cst_87 = arith.constant -1.000000e+20 : f32
    %226 = vector.broadcast %cst_87 : f32 to vector<8x8xf32>
    %227 = arith.select %225, %226, %221 : vector<8x8xi1>, vector<8x8xf32>
    %cst_88 = arith.constant dense<0xFF800000> : vector<8xf32>
    %228 = vector.multi_reduction <maximumf>, %227, %cst_88 [1] : vector<8x8xf32> to vector<8xf32>
    %229 = vector.shape_cast %228 : vector<8xf32> to vector<8x1xf32>
    %230 = vector.broadcast %229 : vector<8x1xf32> to vector<8x8xf32>
    %231 = arith.subf %227, %230 : vector<8x8xf32>
    %232 = math.exp %231 : vector<8x8xf32>
    %cst_89 = arith.constant dense<0.000000e+00> : vector<8xf32>
    %233 = vector.multi_reduction <add>, %232, %cst_89 [1] : vector<8x8xf32> to vector<8xf32>
    %234 = vector.shape_cast %233 : vector<8xf32> to vector<8x1xf32>
    %235 = tpu.reciprocal %234 : vector<8x1xf32> -> vector<8x1xf32>
    %236 = vector.broadcast %235 : vector<8x1xf32> to vector<8x8xf32>
    %237 = arith.mulf %232, %236 : vector<8x8xf32>
    %238 = vector.extract_strided_slice %197 {offsets = [0, 4], sizes = [8, 4], strides = [1, 1]} : vector<8x32xf32> to vector<8x4xf32>
    %cst_90 = arith.constant dense<0.000000e+00> : vector<8x4xf32>
    %239 = tpu.matmul %237, %238, %cst_90 {dimension_numbers = #tpu.dot_dimension_numbers<[1], [0], [0], [1], [0, 0, 1, 1], [], []>} : vector<8x8xf32>, vector<8x4xf32>, vector<8x4xf32> -> vector<8x4xf32>
    %240 = vector.extract_strided_slice %195 {offsets = [0, 8], sizes = [8, 4], strides = [1, 1]} : vector<8x32xf32> to vector<8x4xf32>
    %241 = vector.extract_strided_slice %196 {offsets = [0, 8], sizes = [8, 4], strides = [1, 1]} : vector<8x32xf32> to vector<8x4xf32>
    %cst_91 = arith.constant dense<0.000000e+00> : vector<8x8xf32>
    %242 = tpu.matmul %240, %241, %cst_91 {dimension_numbers = #tpu.dot_dimension_numbers<[1], [1], [0], [0], [0, 0, 1, 0], [], []>} : vector<8x4xf32>, vector<8x4xf32>, vector<8x8xf32> -> vector<8x8xf32>
    %243 = vector.extract_strided_slice %13 {offsets = [1, 0, 0], sizes = [1, 8, 8], strides = [1, 1, 1]} : vector<2x8x8xf32> to vector<1x8x8xf32>
    %244 = vector.shape_cast %243 : vector<1x8x8xf32> to vector<8x8xf32>
    %cst_92 = arith.constant 0.000000e+00 : f32
    %245 = vector.broadcast %cst_92 : f32 to vector<8x8xf32>
    %246 = arith.cmpf oeq, %244, %245 : vector<8x8xf32>
    %cst_93 = arith.constant -1.000000e+20 : f32
    %247 = vector.broadcast %cst_93 : f32 to vector<8x8xf32>
    %248 = arith.select %246, %247, %242 : vector<8x8xi1>, vector<8x8xf32>
    %cst_94 = arith.constant dense<0xFF800000> : vector<8xf32>
    %249 = vector.multi_reduction <maximumf>, %248, %cst_94 [1] : vector<8x8xf32> to vector<8xf32>
    %250 = vector.shape_cast %249 : vector<8xf32> to vector<8x1xf32>
    %251 = vector.broadcast %250 : vector<8x1xf32> to vector<8x8xf32>
    %252 = arith.subf %248, %251 : vector<8x8xf32>
    %253 = math.exp %252 : vector<8x8xf32>
    %cst_95 = arith.constant dense<0.000000e+00> : vector<8xf32>
    %254 = vector.multi_reduction <add>, %253, %cst_95 [1] : vector<8x8xf32> to vector<8xf32>
    %255 = vector.shape_cast %254 : vector<8xf32> to vector<8x1xf32>
    %256 = tpu.reciprocal %255 : vector<8x1xf32> -> vector<8x1xf32>
    %257 = vector.broadcast %256 : vector<8x1xf32> to vector<8x8xf32>
    %258 = arith.mulf %253, %257 : vector<8x8xf32>
    %259 = vector.extract_strided_slice %197 {offsets = [0, 8], sizes = [8, 4], strides = [1, 1]} : vector<8x32xf32> to vector<8x4xf32>
    %cst_96 = arith.constant dense<0.000000e+00> : vector<8x4xf32>
    %260 = tpu.matmul %258, %259, %cst_96 {dimension_numbers = #tpu.dot_dimension_numbers<[1], [0], [0], [1], [0, 0, 1, 1], [], []>} : vector<8x8xf32>, vector<8x4xf32>, vector<8x4xf32> -> vector<8x4xf32>
    %261 = vector.extract_strided_slice %195 {offsets = [0, 12], sizes = [8, 4], strides = [1, 1]} : vector<8x32xf32> to vector<8x4xf32>
    %262 = vector.extract_strided_slice %196 {offsets = [0, 12], sizes = [8, 4], strides = [1, 1]} : vector<8x32xf32> to vector<8x4xf32>
    %cst_97 = arith.constant dense<0.000000e+00> : vector<8x8xf32>
    %263 = tpu.matmul %261, %262, %cst_97 {dimension_numbers = #tpu.dot_dimension_numbers<[1], [1], [0], [0], [0, 0, 1, 0], [], []>} : vector<8x4xf32>, vector<8x4xf32>, vector<8x8xf32> -> vector<8x8xf32>
    %264 = vector.extract_strided_slice %13 {offsets = [1, 0, 0], sizes = [1, 8, 8], strides = [1, 1, 1]} : vector<2x8x8xf32> to vector<1x8x8xf32>
    %265 = vector.shape_cast %264 : vector<1x8x8xf32> to vector<8x8xf32>
    %cst_98 = arith.constant 0.000000e+00 : f32
    %266 = vector.broadcast %cst_98 : f32 to vector<8x8xf32>
    %267 = arith.cmpf oeq, %265, %266 : vector<8x8xf32>
    %cst_99 = arith.constant -1.000000e+20 : f32
    %268 = vector.broadcast %cst_99 : f32 to vector<8x8xf32>
    %269 = arith.select %267, %268, %263 : vector<8x8xi1>, vector<8x8xf32>
    %cst_100 = arith.constant dense<0xFF800000> : vector<8xf32>
    %270 = vector.multi_reduction <maximumf>, %269, %cst_100 [1] : vector<8x8xf32> to vector<8xf32>
    %271 = vector.shape_cast %270 : vector<8xf32> to vector<8x1xf32>
    %272 = vector.broadcast %271 : vector<8x1xf32> to vector<8x8xf32>
    %273 = arith.subf %269, %272 : vector<8x8xf32>
    %274 = math.exp %273 : vector<8x8xf32>
    %cst_101 = arith.constant dense<0.000000e+00> : vector<8xf32>
    %275 = vector.multi_reduction <add>, %274, %cst_101 [1] : vector<8x8xf32> to vector<8xf32>
    %276 = vector.shape_cast %275 : vector<8xf32> to vector<8x1xf32>
    %277 = tpu.reciprocal %276 : vector<8x1xf32> -> vector<8x1xf32>
    %278 = vector.broadcast %277 : vector<8x1xf32> to vector<8x8xf32>
    %279 = arith.mulf %274, %278 : vector<8x8xf32>
    %280 = vector.extract_strided_slice %197 {offsets = [0, 12], sizes = [8, 4], strides = [1, 1]} : vector<8x32xf32> to vector<8x4xf32>
    %cst_102 = arith.constant dense<0.000000e+00> : vector<8x4xf32>
    %281 = tpu.matmul %279, %280, %cst_102 {dimension_numbers = #tpu.dot_dimension_numbers<[1], [0], [0], [1], [0, 0, 1, 1], [], []>} : vector<8x8xf32>, vector<8x4xf32>, vector<8x4xf32> -> vector<8x4xf32>
    %282 = vector.extract_strided_slice %195 {offsets = [0, 16], sizes = [8, 4], strides = [1, 1]} : vector<8x32xf32> to vector<8x4xf32>
    %283 = vector.extract_strided_slice %196 {offsets = [0, 16], sizes = [8, 4], strides = [1, 1]} : vector<8x32xf32> to vector<8x4xf32>
    %cst_103 = arith.constant dense<0.000000e+00> : vector<8x8xf32>
    %284 = tpu.matmul %282, %283, %cst_103 {dimension_numbers = #tpu.dot_dimension_numbers<[1], [1], [0], [0], [0, 0, 1, 0], [], []>} : vector<8x4xf32>, vector<8x4xf32>, vector<8x8xf32> -> vector<8x8xf32>
    %285 = vector.extract_strided_slice %13 {offsets = [1, 0, 0], sizes = [1, 8, 8], strides = [1, 1, 1]} : vector<2x8x8xf32> to vector<1x8x8xf32>
    %286 = vector.shape_cast %285 : vector<1x8x8xf32> to vector<8x8xf32>
    %cst_104 = arith.constant 0.000000e+00 : f32
    %287 = vector.broadcast %cst_104 : f32 to vector<8x8xf32>
    %288 = arith.cmpf oeq, %286, %287 : vector<8x8xf32>
    %cst_105 = arith.constant -1.000000e+20 : f32
    %289 = vector.broadcast %cst_105 : f32 to vector<8x8xf32>
    %290 = arith.select %288, %289, %284 : vector<8x8xi1>, vector<8x8xf32>
    %cst_106 = arith.constant dense<0xFF800000> : vector<8xf32>
    %291 = vector.multi_reduction <maximumf>, %290, %cst_106 [1] : vector<8x8xf32> to vector<8xf32>
    %292 = vector.shape_cast %291 : vector<8xf32> to vector<8x1xf32>
    %293 = vector.broadcast %292 : vector<8x1xf32> to vector<8x8xf32>
    %294 = arith.subf %290, %293 : vector<8x8xf32>
    %295 = math.exp %294 : vector<8x8xf32>
    %cst_107 = arith.constant dense<0.000000e+00> : vector<8xf32>
    %296 = vector.multi_reduction <add>, %295, %cst_107 [1] : vector<8x8xf32> to vector<8xf32>
    %297 = vector.shape_cast %296 : vector<8xf32> to vector<8x1xf32>
    %298 = tpu.reciprocal %297 : vector<8x1xf32> -> vector<8x1xf32>
    %299 = vector.broadcast %298 : vector<8x1xf32> to vector<8x8xf32>
    %300 = arith.mulf %295, %299 : vector<8x8xf32>
    %301 = vector.extract_strided_slice %197 {offsets = [0, 16], sizes = [8, 4], strides = [1, 1]} : vector<8x32xf32> to vector<8x4xf32>
    %cst_108 = arith.constant dense<0.000000e+00> : vector<8x4xf32>
    %302 = tpu.matmul %300, %301, %cst_108 {dimension_numbers = #tpu.dot_dimension_numbers<[1], [0], [0], [1], [0, 0, 1, 1], [], []>} : vector<8x8xf32>, vector<8x4xf32>, vector<8x4xf32> -> vector<8x4xf32>
    %303 = vector.extract_strided_slice %195 {offsets = [0, 20], sizes = [8, 4], strides = [1, 1]} : vector<8x32xf32> to vector<8x4xf32>
    %304 = vector.extract_strided_slice %196 {offsets = [0, 20], sizes = [8, 4], strides = [1, 1]} : vector<8x32xf32> to vector<8x4xf32>
    %cst_109 = arith.constant dense<0.000000e+00> : vector<8x8xf32>
    %305 = tpu.matmul %303, %304, %cst_109 {dimension_numbers = #tpu.dot_dimension_numbers<[1], [1], [0], [0], [0, 0, 1, 0], [], []>} : vector<8x4xf32>, vector<8x4xf32>, vector<8x8xf32> -> vector<8x8xf32>
    %306 = vector.extract_strided_slice %13 {offsets = [1, 0, 0], sizes = [1, 8, 8], strides = [1, 1, 1]} : vector<2x8x8xf32> to vector<1x8x8xf32>
    %307 = vector.shape_cast %306 : vector<1x8x8xf32> to vector<8x8xf32>
    %cst_110 = arith.constant 0.000000e+00 : f32
    %308 = vector.broadcast %cst_110 : f32 to vector<8x8xf32>
    %309 = arith.cmpf oeq, %307, %308 : vector<8x8xf32>
    %cst_111 = arith.constant -1.000000e+20 : f32
    %310 = vector.broadcast %cst_111 : f32 to vector<8x8xf32>
    %311 = arith.select %309, %310, %305 : vector<8x8xi1>, vector<8x8xf32>
    %cst_112 = arith.constant dense<0xFF800000> : vector<8xf32>
    %312 = vector.multi_reduction <maximumf>, %311, %cst_112 [1] : vector<8x8xf32> to vector<8xf32>
    %313 = vector.shape_cast %312 : vector<8xf32> to vector<8x1xf32>
    %314 = vector.broadcast %313 : vector<8x1xf32> to vector<8x8xf32>
    %315 = arith.subf %311, %314 : vector<8x8xf32>
    %316 = math.exp %315 : vector<8x8xf32>
    %cst_113 = arith.constant dense<0.000000e+00> : vector<8xf32>
    %317 = vector.multi_reduction <add>, %316, %cst_113 [1] : vector<8x8xf32> to vector<8xf32>
    %318 = vector.shape_cast %317 : vector<8xf32> to vector<8x1xf32>
    %319 = tpu.reciprocal %318 : vector<8x1xf32> -> vector<8x1xf32>
    %320 = vector.broadcast %319 : vector<8x1xf32> to vector<8x8xf32>
    %321 = arith.mulf %316, %320 : vector<8x8xf32>
    %322 = vector.extract_strided_slice %197 {offsets = [0, 20], sizes = [8, 4], strides = [1, 1]} : vector<8x32xf32> to vector<8x4xf32>
    %cst_114 = arith.constant dense<0.000000e+00> : vector<8x4xf32>
    %323 = tpu.matmul %321, %322, %cst_114 {dimension_numbers = #tpu.dot_dimension_numbers<[1], [0], [0], [1], [0, 0, 1, 1], [], []>} : vector<8x8xf32>, vector<8x4xf32>, vector<8x4xf32> -> vector<8x4xf32>
    %324 = vector.extract_strided_slice %195 {offsets = [0, 24], sizes = [8, 4], strides = [1, 1]} : vector<8x32xf32> to vector<8x4xf32>
    %325 = vector.extract_strided_slice %196 {offsets = [0, 24], sizes = [8, 4], strides = [1, 1]} : vector<8x32xf32> to vector<8x4xf32>
    %cst_115 = arith.constant dense<0.000000e+00> : vector<8x8xf32>
    %326 = tpu.matmul %324, %325, %cst_115 {dimension_numbers = #tpu.dot_dimension_numbers<[1], [1], [0], [0], [0, 0, 1, 0], [], []>} : vector<8x4xf32>, vector<8x4xf32>, vector<8x8xf32> -> vector<8x8xf32>
    %327 = vector.extract_strided_slice %13 {offsets = [1, 0, 0], sizes = [1, 8, 8], strides = [1, 1, 1]} : vector<2x8x8xf32> to vector<1x8x8xf32>
    %328 = vector.shape_cast %327 : vector<1x8x8xf32> to vector<8x8xf32>
    %cst_116 = arith.constant 0.000000e+00 : f32
    %329 = vector.broadcast %cst_116 : f32 to vector<8x8xf32>
    %330 = arith.cmpf oeq, %328, %329 : vector<8x8xf32>
    %cst_117 = arith.constant -1.000000e+20 : f32
    %331 = vector.broadcast %cst_117 : f32 to vector<8x8xf32>
    %332 = arith.select %330, %331, %326 : vector<8x8xi1>, vector<8x8xf32>
    %cst_118 = arith.constant dense<0xFF800000> : vector<8xf32>
    %333 = vector.multi_reduction <maximumf>, %332, %cst_118 [1] : vector<8x8xf32> to vector<8xf32>
    %334 = vector.shape_cast %333 : vector<8xf32> to vector<8x1xf32>
    %335 = vector.broadcast %334 : vector<8x1xf32> to vector<8x8xf32>
    %336 = arith.subf %332, %335 : vector<8x8xf32>
    %337 = math.exp %336 : vector<8x8xf32>
    %cst_119 = arith.constant dense<0.000000e+00> : vector<8xf32>
    %338 = vector.multi_reduction <add>, %337, %cst_119 [1] : vector<8x8xf32> to vector<8xf32>
    %339 = vector.shape_cast %338 : vector<8xf32> to vector<8x1xf32>
    %340 = tpu.reciprocal %339 : vector<8x1xf32> -> vector<8x1xf32>
    %341 = vector.broadcast %340 : vector<8x1xf32> to vector<8x8xf32>
    %342 = arith.mulf %337, %341 : vector<8x8xf32>
    %343 = vector.extract_strided_slice %197 {offsets = [0, 24], sizes = [8, 4], strides = [1, 1]} : vector<8x32xf32> to vector<8x4xf32>
    %cst_120 = arith.constant dense<0.000000e+00> : vector<8x4xf32>
    %344 = tpu.matmul %342, %343, %cst_120 {dimension_numbers = #tpu.dot_dimension_numbers<[1], [0], [0], [1], [0, 0, 1, 1], [], []>} : vector<8x8xf32>, vector<8x4xf32>, vector<8x4xf32> -> vector<8x4xf32>
    %345 = vector.extract_strided_slice %195 {offsets = [0, 28], sizes = [8, 4], strides = [1, 1]} : vector<8x32xf32> to vector<8x4xf32>
    %346 = vector.extract_strided_slice %196 {offsets = [0, 28], sizes = [8, 4], strides = [1, 1]} : vector<8x32xf32> to vector<8x4xf32>
    %cst_121 = arith.constant dense<0.000000e+00> : vector<8x8xf32>
    %347 = tpu.matmul %345, %346, %cst_121 {dimension_numbers = #tpu.dot_dimension_numbers<[1], [1], [0], [0], [0, 0, 1, 0], [], []>} : vector<8x4xf32>, vector<8x4xf32>, vector<8x8xf32> -> vector<8x8xf32>
    %348 = vector.extract_strided_slice %13 {offsets = [1, 0, 0], sizes = [1, 8, 8], strides = [1, 1, 1]} : vector<2x8x8xf32> to vector<1x8x8xf32>
    %349 = vector.shape_cast %348 : vector<1x8x8xf32> to vector<8x8xf32>
    %cst_122 = arith.constant 0.000000e+00 : f32
    %350 = vector.broadcast %cst_122 : f32 to vector<8x8xf32>
    %351 = arith.cmpf oeq, %349, %350 : vector<8x8xf32>
    %cst_123 = arith.constant -1.000000e+20 : f32
    %352 = vector.broadcast %cst_123 : f32 to vector<8x8xf32>
    %353 = arith.select %351, %352, %347 : vector<8x8xi1>, vector<8x8xf32>
    %cst_124 = arith.constant dense<0xFF800000> : vector<8xf32>
    %354 = vector.multi_reduction <maximumf>, %353, %cst_124 [1] : vector<8x8xf32> to vector<8xf32>
    %355 = vector.shape_cast %354 : vector<8xf32> to vector<8x1xf32>
    %356 = vector.broadcast %355 : vector<8x1xf32> to vector<8x8xf32>
    %357 = arith.subf %353, %356 : vector<8x8xf32>
    %358 = math.exp %357 : vector<8x8xf32>
    %cst_125 = arith.constant dense<0.000000e+00> : vector<8xf32>
    %359 = vector.multi_reduction <add>, %358, %cst_125 [1] : vector<8x8xf32> to vector<8xf32>
    %360 = vector.shape_cast %359 : vector<8xf32> to vector<8x1xf32>
    %361 = tpu.reciprocal %360 : vector<8x1xf32> -> vector<8x1xf32>
    %362 = vector.broadcast %361 : vector<8x1xf32> to vector<8x8xf32>
    %363 = arith.mulf %358, %362 : vector<8x8xf32>
    %364 = vector.extract_strided_slice %197 {offsets = [0, 28], sizes = [8, 4], strides = [1, 1]} : vector<8x32xf32> to vector<8x4xf32>
    %cst_126 = arith.constant dense<0.000000e+00> : vector<8x4xf32>
    %365 = tpu.matmul %363, %364, %cst_126 {dimension_numbers = #tpu.dot_dimension_numbers<[1], [0], [0], [1], [0, 0, 1, 1], [], []>} : vector<8x8xf32>, vector<8x4xf32>, vector<8x4xf32> -> vector<8x4xf32>
    %366 = tpu.concatenate %218, %239, %260, %281, %302, %323, %344, %365 in 1 : vector<8x4xf32>, vector<8x4xf32>, vector<8x4xf32>, vector<8x4xf32>, vector<8x4xf32>, vector<8x4xf32>, vector<8x4xf32>, vector<8x4xf32> -> vector<8x32xf32>
    %367 = tpu.concatenate %194, %366 in 0 : vector<8x32xf32>, vector<8x32xf32> -> vector<16x32xf32>
    %c3_127 = arith.constant 3 : index
    %c0_128 = arith.constant 0 : index
    %c0_129 = arith.constant 0 : index
    %368 = vector.load %arg5[%c3_127, %c0_128, %c0_129] : memref<4x32x32xf32, #tpu.memory_space<vmem>>, vector<1x32x32xf32>
    %369 = vector.shape_cast %368 : vector<1x32x32xf32> to vector<32x32xf32>
    %cst_130 = arith.constant dense<0.000000e+00> : vector<16x32xf32>
    %370 = tpu.matmul %367, %369, %cst_130 {dimension_numbers = #tpu.dot_dimension_numbers<[1], [0], [0], [1], [0, 0, 1, 1], [], []>} : vector<16x32xf32>, vector<32x32xf32>, vector<16x32xf32> -> vector<16x32xf32>
    %371 = vector.broadcast %0 : vector<1x32xf32> to vector<16x32xf32>
    %372 = arith.addf %370, %371 : vector<16x32xf32>
    %373 = arith.addf %372, %10 : vector<16x32xf32>
    %cst_131 = arith.constant dense<0.000000e+00> : vector<16xf32>
    %374 = vector.multi_reduction <add>, %373, %cst_131 [1] : vector<16x32xf32> to vector<16xf32>
    %375 = vector.shape_cast %374 : vector<16xf32> to vector<16x1xf32>
    %cst_132 = arith.constant 3.200000e+01 : f32
    %376 = vector.broadcast %cst_132 : f32 to vector<16x1xf32>
    %377 = arith.divf %375, %376 : vector<16x1xf32>
    %378 = vector.broadcast %377 : vector<16x1xf32> to vector<16x32xf32>
    %379 = arith.subf %373, %378 : vector<16x32xf32>
    %380 = arith.mulf %379, %379 : vector<16x32xf32>
    %cst_133 = arith.constant dense<0.000000e+00> : vector<16xf32>
    %381 = vector.multi_reduction <add>, %380, %cst_133 [1] : vector<16x32xf32> to vector<16xf32>
    %382 = vector.shape_cast %381 : vector<16xf32> to vector<16x1xf32>
    %cst_134 = arith.constant 3.200000e+01 : f32
    %383 = vector.broadcast %cst_134 : f32 to vector<16x1xf32>
    %384 = arith.divf %382, %383 : vector<16x1xf32>
    %cst_135 = arith.constant 9.99999974E-6 : f32
    %385 = vector.broadcast %cst_135 : f32 to vector<16x1xf32>
    %386 = arith.addf %384, %385 : vector<16x1xf32>
    %387 = math.rsqrt %386 : vector<16x1xf32>
    %388 = vector.broadcast %387 : vector<16x1xf32> to vector<16x32xf32>
    %389 = arith.mulf %379, %388 : vector<16x32xf32>
    %390 = vector.broadcast %1 : vector<1x32xf32> to vector<16x32xf32>
    %391 = arith.mulf %389, %390 : vector<16x32xf32>
    %392 = vector.broadcast %2 : vector<1x32xf32> to vector<16x32xf32>
    %393 = arith.addf %391, %392 : vector<16x32xf32>
    %c0_136 = arith.constant 0 : index
    %c0_137 = arith.constant 0 : index
    %c0_138 = arith.constant 0 : index
    %394 = vector.load %arg6[%c0_136, %c0_137, %c0_138] : memref<4x32x32xf32, #tpu.memory_space<vmem>>, vector<1x32x32xf32>
    %395 = vector.shape_cast %394 : vector<1x32x32xf32> to vector<32x32xf32>
    %cst_139 = arith.constant dense<0.000000e+00> : vector<16x32xf32>
    %396 = tpu.matmul %12, %395, %cst_139 {dimension_numbers = #tpu.dot_dimension_numbers<[1], [0], [0], [1], [0, 0, 1, 1], [], []>} : vector<16x32xf32>, vector<32x32xf32>, vector<16x32xf32> -> vector<16x32xf32>
    %c1_140 = arith.constant 1 : index
    %c0_141 = arith.constant 0 : index
    %c0_142 = arith.constant 0 : index
    %397 = vector.load %arg6[%c1_140, %c0_141, %c0_142] : memref<4x32x32xf32, #tpu.memory_space<vmem>>, vector<1x32x32xf32>
    %398 = vector.shape_cast %397 : vector<1x32x32xf32> to vector<32x32xf32>
    %cst_143 = arith.constant dense<0.000000e+00> : vector<16x32xf32>
    %399 = tpu.matmul %11, %398, %cst_143 {dimension_numbers = #tpu.dot_dimension_numbers<[1], [0], [0], [1], [0, 0, 1, 1], [], []>} : vector<16x32xf32>, vector<32x32xf32>, vector<16x32xf32> -> vector<16x32xf32>
    %c2_144 = arith.constant 2 : index
    %c0_145 = arith.constant 0 : index
    %c0_146 = arith.constant 0 : index
    %400 = vector.load %arg6[%c2_144, %c0_145, %c0_146] : memref<4x32x32xf32, #tpu.memory_space<vmem>>, vector<1x32x32xf32>
    %401 = vector.shape_cast %400 : vector<1x32x32xf32> to vector<32x32xf32>
    %cst_147 = arith.constant dense<0.000000e+00> : vector<16x32xf32>
    %402 = tpu.matmul %393, %401, %cst_147 {dimension_numbers = #tpu.dot_dimension_numbers<[1], [0], [0], [1], [0, 0, 1, 1], [], []>} : vector<16x32xf32>, vector<32x32xf32>, vector<16x32xf32> -> vector<16x32xf32>
    %403 = vector.extract_strided_slice %396 {offsets = [0, 0], sizes = [8, 32], strides = [1, 1]} : vector<16x32xf32> to vector<8x32xf32>
    %404 = vector.extract_strided_slice %399 {offsets = [0, 0], sizes = [8, 32], strides = [1, 1]} : vector<16x32xf32> to vector<8x32xf32>
    %405 = vector.extract_strided_slice %402 {offsets = [0, 0], sizes = [8, 32], strides = [1, 1]} : vector<16x32xf32> to vector<8x32xf32>
    %406 = vector.extract_strided_slice %403 {offsets = [0, 0], sizes = [8, 4], strides = [1, 1]} : vector<8x32xf32> to vector<8x4xf32>
    %407 = vector.extract_strided_slice %404 {offsets = [0, 0], sizes = [8, 4], strides = [1, 1]} : vector<8x32xf32> to vector<8x4xf32>
    %cst_148 = arith.constant dense<0.000000e+00> : vector<8x8xf32>
    %408 = tpu.matmul %406, %407, %cst_148 {dimension_numbers = #tpu.dot_dimension_numbers<[1], [1], [0], [0], [0, 0, 1, 0], [], []>} : vector<8x4xf32>, vector<8x4xf32>, vector<8x8xf32> -> vector<8x8xf32>
    %cst_149 = arith.constant dense<0xFF800000> : vector<8xf32>
    %409 = vector.multi_reduction <maximumf>, %408, %cst_149 [1] : vector<8x8xf32> to vector<8xf32>
    %410 = vector.shape_cast %409 : vector<8xf32> to vector<8x1xf32>
    %411 = vector.broadcast %410 : vector<8x1xf32> to vector<8x8xf32>
    %412 = arith.subf %408, %411 : vector<8x8xf32>
    %413 = math.exp %412 : vector<8x8xf32>
    %cst_150 = arith.constant dense<0.000000e+00> : vector<8xf32>
    %414 = vector.multi_reduction <add>, %413, %cst_150 [1] : vector<8x8xf32> to vector<8xf32>
    %415 = vector.shape_cast %414 : vector<8xf32> to vector<8x1xf32>
    %416 = tpu.reciprocal %415 : vector<8x1xf32> -> vector<8x1xf32>
    %417 = vector.broadcast %416 : vector<8x1xf32> to vector<8x8xf32>
    %418 = arith.mulf %413, %417 : vector<8x8xf32>
    %419 = vector.extract_strided_slice %405 {offsets = [0, 0], sizes = [8, 4], strides = [1, 1]} : vector<8x32xf32> to vector<8x4xf32>
    %cst_151 = arith.constant dense<0.000000e+00> : vector<8x4xf32>
    %420 = tpu.matmul %418, %419, %cst_151 {dimension_numbers = #tpu.dot_dimension_numbers<[1], [0], [0], [1], [0, 0, 1, 1], [], []>} : vector<8x8xf32>, vector<8x4xf32>, vector<8x4xf32> -> vector<8x4xf32>
    %421 = vector.extract_strided_slice %403 {offsets = [0, 4], sizes = [8, 4], strides = [1, 1]} : vector<8x32xf32> to vector<8x4xf32>
    %422 = vector.extract_strided_slice %404 {offsets = [0, 4], sizes = [8, 4], strides = [1, 1]} : vector<8x32xf32> to vector<8x4xf32>
    %cst_152 = arith.constant dense<0.000000e+00> : vector<8x8xf32>
    %423 = tpu.matmul %421, %422, %cst_152 {dimension_numbers = #tpu.dot_dimension_numbers<[1], [1], [0], [0], [0, 0, 1, 0], [], []>} : vector<8x4xf32>, vector<8x4xf32>, vector<8x8xf32> -> vector<8x8xf32>
    %cst_153 = arith.constant dense<0xFF800000> : vector<8xf32>
    %424 = vector.multi_reduction <maximumf>, %423, %cst_153 [1] : vector<8x8xf32> to vector<8xf32>
    %425 = vector.shape_cast %424 : vector<8xf32> to vector<8x1xf32>
    %426 = vector.broadcast %425 : vector<8x1xf32> to vector<8x8xf32>
    %427 = arith.subf %423, %426 : vector<8x8xf32>
    %428 = math.exp %427 : vector<8x8xf32>
    %cst_154 = arith.constant dense<0.000000e+00> : vector<8xf32>
    %429 = vector.multi_reduction <add>, %428, %cst_154 [1] : vector<8x8xf32> to vector<8xf32>
    %430 = vector.shape_cast %429 : vector<8xf32> to vector<8x1xf32>
    %431 = tpu.reciprocal %430 : vector<8x1xf32> -> vector<8x1xf32>
    %432 = vector.broadcast %431 : vector<8x1xf32> to vector<8x8xf32>
    %433 = arith.mulf %428, %432 : vector<8x8xf32>
    %434 = vector.extract_strided_slice %405 {offsets = [0, 4], sizes = [8, 4], strides = [1, 1]} : vector<8x32xf32> to vector<8x4xf32>
    %cst_155 = arith.constant dense<0.000000e+00> : vector<8x4xf32>
    %435 = tpu.matmul %433, %434, %cst_155 {dimension_numbers = #tpu.dot_dimension_numbers<[1], [0], [0], [1], [0, 0, 1, 1], [], []>} : vector<8x8xf32>, vector<8x4xf32>, vector<8x4xf32> -> vector<8x4xf32>
    %436 = vector.extract_strided_slice %403 {offsets = [0, 8], sizes = [8, 4], strides = [1, 1]} : vector<8x32xf32> to vector<8x4xf32>
    %437 = vector.extract_strided_slice %404 {offsets = [0, 8], sizes = [8, 4], strides = [1, 1]} : vector<8x32xf32> to vector<8x4xf32>
    %cst_156 = arith.constant dense<0.000000e+00> : vector<8x8xf32>
    %438 = tpu.matmul %436, %437, %cst_156 {dimension_numbers = #tpu.dot_dimension_numbers<[1], [1], [0], [0], [0, 0, 1, 0], [], []>} : vector<8x4xf32>, vector<8x4xf32>, vector<8x8xf32> -> vector<8x8xf32>
    %cst_157 = arith.constant dense<0xFF800000> : vector<8xf32>
    %439 = vector.multi_reduction <maximumf>, %438, %cst_157 [1] : vector<8x8xf32> to vector<8xf32>
    %440 = vector.shape_cast %439 : vector<8xf32> to vector<8x1xf32>
    %441 = vector.broadcast %440 : vector<8x1xf32> to vector<8x8xf32>
    %442 = arith.subf %438, %441 : vector<8x8xf32>
    %443 = math.exp %442 : vector<8x8xf32>
    %cst_158 = arith.constant dense<0.000000e+00> : vector<8xf32>
    %444 = vector.multi_reduction <add>, %443, %cst_158 [1] : vector<8x8xf32> to vector<8xf32>
    %445 = vector.shape_cast %444 : vector<8xf32> to vector<8x1xf32>
    %446 = tpu.reciprocal %445 : vector<8x1xf32> -> vector<8x1xf32>
    %447 = vector.broadcast %446 : vector<8x1xf32> to vector<8x8xf32>
    %448 = arith.mulf %443, %447 : vector<8x8xf32>
    %449 = vector.extract_strided_slice %405 {offsets = [0, 8], sizes = [8, 4], strides = [1, 1]} : vector<8x32xf32> to vector<8x4xf32>
    %cst_159 = arith.constant dense<0.000000e+00> : vector<8x4xf32>
    %450 = tpu.matmul %448, %449, %cst_159 {dimension_numbers = #tpu.dot_dimension_numbers<[1], [0], [0], [1], [0, 0, 1, 1], [], []>} : vector<8x8xf32>, vector<8x4xf32>, vector<8x4xf32> -> vector<8x4xf32>
    %451 = vector.extract_strided_slice %403 {offsets = [0, 12], sizes = [8, 4], strides = [1, 1]} : vector<8x32xf32> to vector<8x4xf32>
    %452 = vector.extract_strided_slice %404 {offsets = [0, 12], sizes = [8, 4], strides = [1, 1]} : vector<8x32xf32> to vector<8x4xf32>
    %cst_160 = arith.constant dense<0.000000e+00> : vector<8x8xf32>
    %453 = tpu.matmul %451, %452, %cst_160 {dimension_numbers = #tpu.dot_dimension_numbers<[1], [1], [0], [0], [0, 0, 1, 0], [], []>} : vector<8x4xf32>, vector<8x4xf32>, vector<8x8xf32> -> vector<8x8xf32>
    %cst_161 = arith.constant dense<0xFF800000> : vector<8xf32>
    %454 = vector.multi_reduction <maximumf>, %453, %cst_161 [1] : vector<8x8xf32> to vector<8xf32>
    %455 = vector.shape_cast %454 : vector<8xf32> to vector<8x1xf32>
    %456 = vector.broadcast %455 : vector<8x1xf32> to vector<8x8xf32>
    %457 = arith.subf %453, %456 : vector<8x8xf32>
    %458 = math.exp %457 : vector<8x8xf32>
    %cst_162 = arith.constant dense<0.000000e+00> : vector<8xf32>
    %459 = vector.multi_reduction <add>, %458, %cst_162 [1] : vector<8x8xf32> to vector<8xf32>
    %460 = vector.shape_cast %459 : vector<8xf32> to vector<8x1xf32>
    %461 = tpu.reciprocal %460 : vector<8x1xf32> -> vector<8x1xf32>
    %462 = vector.broadcast %461 : vector<8x1xf32> to vector<8x8xf32>
    %463 = arith.mulf %458, %462 : vector<8x8xf32>
    %464 = vector.extract_strided_slice %405 {offsets = [0, 12], sizes = [8, 4], strides = [1, 1]} : vector<8x32xf32> to vector<8x4xf32>
    %cst_163 = arith.constant dense<0.000000e+00> : vector<8x4xf32>
    %465 = tpu.matmul %463, %464, %cst_163 {dimension_numbers = #tpu.dot_dimension_numbers<[1], [0], [0], [1], [0, 0, 1, 1], [], []>} : vector<8x8xf32>, vector<8x4xf32>, vector<8x4xf32> -> vector<8x4xf32>
    %466 = vector.extract_strided_slice %403 {offsets = [0, 16], sizes = [8, 4], strides = [1, 1]} : vector<8x32xf32> to vector<8x4xf32>
    %467 = vector.extract_strided_slice %404 {offsets = [0, 16], sizes = [8, 4], strides = [1, 1]} : vector<8x32xf32> to vector<8x4xf32>
    %cst_164 = arith.constant dense<0.000000e+00> : vector<8x8xf32>
    %468 = tpu.matmul %466, %467, %cst_164 {dimension_numbers = #tpu.dot_dimension_numbers<[1], [1], [0], [0], [0, 0, 1, 0], [], []>} : vector<8x4xf32>, vector<8x4xf32>, vector<8x8xf32> -> vector<8x8xf32>
    %cst_165 = arith.constant dense<0xFF800000> : vector<8xf32>
    %469 = vector.multi_reduction <maximumf>, %468, %cst_165 [1] : vector<8x8xf32> to vector<8xf32>
    %470 = vector.shape_cast %469 : vector<8xf32> to vector<8x1xf32>
    %471 = vector.broadcast %470 : vector<8x1xf32> to vector<8x8xf32>
    %472 = arith.subf %468, %471 : vector<8x8xf32>
    %473 = math.exp %472 : vector<8x8xf32>
    %cst_166 = arith.constant dense<0.000000e+00> : vector<8xf32>
    %474 = vector.multi_reduction <add>, %473, %cst_166 [1] : vector<8x8xf32> to vector<8xf32>
    %475 = vector.shape_cast %474 : vector<8xf32> to vector<8x1xf32>
    %476 = tpu.reciprocal %475 : vector<8x1xf32> -> vector<8x1xf32>
    %477 = vector.broadcast %476 : vector<8x1xf32> to vector<8x8xf32>
    %478 = arith.mulf %473, %477 : vector<8x8xf32>
    %479 = vector.extract_strided_slice %405 {offsets = [0, 16], sizes = [8, 4], strides = [1, 1]} : vector<8x32xf32> to vector<8x4xf32>
    %cst_167 = arith.constant dense<0.000000e+00> : vector<8x4xf32>
    %480 = tpu.matmul %478, %479, %cst_167 {dimension_numbers = #tpu.dot_dimension_numbers<[1], [0], [0], [1], [0, 0, 1, 1], [], []>} : vector<8x8xf32>, vector<8x4xf32>, vector<8x4xf32> -> vector<8x4xf32>
    %481 = vector.extract_strided_slice %403 {offsets = [0, 20], sizes = [8, 4], strides = [1, 1]} : vector<8x32xf32> to vector<8x4xf32>
    %482 = vector.extract_strided_slice %404 {offsets = [0, 20], sizes = [8, 4], strides = [1, 1]} : vector<8x32xf32> to vector<8x4xf32>
    %cst_168 = arith.constant dense<0.000000e+00> : vector<8x8xf32>
    %483 = tpu.matmul %481, %482, %cst_168 {dimension_numbers = #tpu.dot_dimension_numbers<[1], [1], [0], [0], [0, 0, 1, 0], [], []>} : vector<8x4xf32>, vector<8x4xf32>, vector<8x8xf32> -> vector<8x8xf32>
    %cst_169 = arith.constant dense<0xFF800000> : vector<8xf32>
    %484 = vector.multi_reduction <maximumf>, %483, %cst_169 [1] : vector<8x8xf32> to vector<8xf32>
    %485 = vector.shape_cast %484 : vector<8xf32> to vector<8x1xf32>
    %486 = vector.broadcast %485 : vector<8x1xf32> to vector<8x8xf32>
    %487 = arith.subf %483, %486 : vector<8x8xf32>
    %488 = math.exp %487 : vector<8x8xf32>
    %cst_170 = arith.constant dense<0.000000e+00> : vector<8xf32>
    %489 = vector.multi_reduction <add>, %488, %cst_170 [1] : vector<8x8xf32> to vector<8xf32>
    %490 = vector.shape_cast %489 : vector<8xf32> to vector<8x1xf32>
    %491 = tpu.reciprocal %490 : vector<8x1xf32> -> vector<8x1xf32>
    %492 = vector.broadcast %491 : vector<8x1xf32> to vector<8x8xf32>
    %493 = arith.mulf %488, %492 : vector<8x8xf32>
    %494 = vector.extract_strided_slice %405 {offsets = [0, 20], sizes = [8, 4], strides = [1, 1]} : vector<8x32xf32> to vector<8x4xf32>
    %cst_171 = arith.constant dense<0.000000e+00> : vector<8x4xf32>
    %495 = tpu.matmul %493, %494, %cst_171 {dimension_numbers = #tpu.dot_dimension_numbers<[1], [0], [0], [1], [0, 0, 1, 1], [], []>} : vector<8x8xf32>, vector<8x4xf32>, vector<8x4xf32> -> vector<8x4xf32>
    %496 = vector.extract_strided_slice %403 {offsets = [0, 24], sizes = [8, 4], strides = [1, 1]} : vector<8x32xf32> to vector<8x4xf32>
    %497 = vector.extract_strided_slice %404 {offsets = [0, 24], sizes = [8, 4], strides = [1, 1]} : vector<8x32xf32> to vector<8x4xf32>
    %cst_172 = arith.constant dense<0.000000e+00> : vector<8x8xf32>
    %498 = tpu.matmul %496, %497, %cst_172 {dimension_numbers = #tpu.dot_dimension_numbers<[1], [1], [0], [0], [0, 0, 1, 0], [], []>} : vector<8x4xf32>, vector<8x4xf32>, vector<8x8xf32> -> vector<8x8xf32>
    %cst_173 = arith.constant dense<0xFF800000> : vector<8xf32>
    %499 = vector.multi_reduction <maximumf>, %498, %cst_173 [1] : vector<8x8xf32> to vector<8xf32>
    %500 = vector.shape_cast %499 : vector<8xf32> to vector<8x1xf32>
    %501 = vector.broadcast %500 : vector<8x1xf32> to vector<8x8xf32>
    %502 = arith.subf %498, %501 : vector<8x8xf32>
    %503 = math.exp %502 : vector<8x8xf32>
    %cst_174 = arith.constant dense<0.000000e+00> : vector<8xf32>
    %504 = vector.multi_reduction <add>, %503, %cst_174 [1] : vector<8x8xf32> to vector<8xf32>
    %505 = vector.shape_cast %504 : vector<8xf32> to vector<8x1xf32>
    %506 = tpu.reciprocal %505 : vector<8x1xf32> -> vector<8x1xf32>
    %507 = vector.broadcast %506 : vector<8x1xf32> to vector<8x8xf32>
    %508 = arith.mulf %503, %507 : vector<8x8xf32>
    %509 = vector.extract_strided_slice %405 {offsets = [0, 24], sizes = [8, 4], strides = [1, 1]} : vector<8x32xf32> to vector<8x4xf32>
    %cst_175 = arith.constant dense<0.000000e+00> : vector<8x4xf32>
    %510 = tpu.matmul %508, %509, %cst_175 {dimension_numbers = #tpu.dot_dimension_numbers<[1], [0], [0], [1], [0, 0, 1, 1], [], []>} : vector<8x8xf32>, vector<8x4xf32>, vector<8x4xf32> -> vector<8x4xf32>
    %511 = vector.extract_strided_slice %403 {offsets = [0, 28], sizes = [8, 4], strides = [1, 1]} : vector<8x32xf32> to vector<8x4xf32>
    %512 = vector.extract_strided_slice %404 {offsets = [0, 28], sizes = [8, 4], strides = [1, 1]} : vector<8x32xf32> to vector<8x4xf32>
    %cst_176 = arith.constant dense<0.000000e+00> : vector<8x8xf32>
    %513 = tpu.matmul %511, %512, %cst_176 {dimension_numbers = #tpu.dot_dimension_numbers<[1], [1], [0], [0], [0, 0, 1, 0], [], []>} : vector<8x4xf32>, vector<8x4xf32>, vector<8x8xf32> -> vector<8x8xf32>
    %cst_177 = arith.constant dense<0xFF800000> : vector<8xf32>
    %514 = vector.multi_reduction <maximumf>, %513, %cst_177 [1] : vector<8x8xf32> to vector<8xf32>
    %515 = vector.shape_cast %514 : vector<8xf32> to vector<8x1xf32>
    %516 = vector.broadcast %515 : vector<8x1xf32> to vector<8x8xf32>
    %517 = arith.subf %513, %516 : vector<8x8xf32>
    %518 = math.exp %517 : vector<8x8xf32>
    %cst_178 = arith.constant dense<0.000000e+00> : vector<8xf32>
    %519 = vector.multi_reduction <add>, %518, %cst_178 [1] : vector<8x8xf32> to vector<8xf32>
    %520 = vector.shape_cast %519 : vector<8xf32> to vector<8x1xf32>
    %521 = tpu.reciprocal %520 : vector<8x1xf32> -> vector<8x1xf32>
    %522 = vector.broadcast %521 : vector<8x1xf32> to vector<8x8xf32>
    %523 = arith.mulf %518, %522 : vector<8x8xf32>
    %524 = vector.extract_strided_slice %405 {offsets = [0, 28], sizes = [8, 4], strides = [1, 1]} : vector<8x32xf32> to vector<8x4xf32>
    %cst_179 = arith.constant dense<0.000000e+00> : vector<8x4xf32>
    %525 = tpu.matmul %523, %524, %cst_179 {dimension_numbers = #tpu.dot_dimension_numbers<[1], [0], [0], [1], [0, 0, 1, 1], [], []>} : vector<8x8xf32>, vector<8x4xf32>, vector<8x4xf32> -> vector<8x4xf32>
    %526 = tpu.concatenate %420, %435, %450, %465, %480, %495, %510, %525 in 1 : vector<8x4xf32>, vector<8x4xf32>, vector<8x4xf32>, vector<8x4xf32>, vector<8x4xf32>, vector<8x4xf32>, vector<8x4xf32>, vector<8x4xf32> -> vector<8x32xf32>
    %527 = vector.extract_strided_slice %396 {offsets = [8, 0], sizes = [8, 32], strides = [1, 1]} : vector<16x32xf32> to vector<8x32xf32>
    %528 = vector.extract_strided_slice %399 {offsets = [8, 0], sizes = [8, 32], strides = [1, 1]} : vector<16x32xf32> to vector<8x32xf32>
    %529 = vector.extract_strided_slice %402 {offsets = [8, 0], sizes = [8, 32], strides = [1, 1]} : vector<16x32xf32> to vector<8x32xf32>
    %530 = vector.extract_strided_slice %527 {offsets = [0, 0], sizes = [8, 4], strides = [1, 1]} : vector<8x32xf32> to vector<8x4xf32>
    %531 = vector.extract_strided_slice %528 {offsets = [0, 0], sizes = [8, 4], strides = [1, 1]} : vector<8x32xf32> to vector<8x4xf32>
    %cst_180 = arith.constant dense<0.000000e+00> : vector<8x8xf32>
    %532 = tpu.matmul %530, %531, %cst_180 {dimension_numbers = #tpu.dot_dimension_numbers<[1], [1], [0], [0], [0, 0, 1, 0], [], []>} : vector<8x4xf32>, vector<8x4xf32>, vector<8x8xf32> -> vector<8x8xf32>
    %cst_181 = arith.constant dense<0xFF800000> : vector<8xf32>
    %533 = vector.multi_reduction <maximumf>, %532, %cst_181 [1] : vector<8x8xf32> to vector<8xf32>
    %534 = vector.shape_cast %533 : vector<8xf32> to vector<8x1xf32>
    %535 = vector.broadcast %534 : vector<8x1xf32> to vector<8x8xf32>
    %536 = arith.subf %532, %535 : vector<8x8xf32>
    %537 = math.exp %536 : vector<8x8xf32>
    %cst_182 = arith.constant dense<0.000000e+00> : vector<8xf32>
    %538 = vector.multi_reduction <add>, %537, %cst_182 [1] : vector<8x8xf32> to vector<8xf32>
    %539 = vector.shape_cast %538 : vector<8xf32> to vector<8x1xf32>
    %540 = tpu.reciprocal %539 : vector<8x1xf32> -> vector<8x1xf32>
    %541 = vector.broadcast %540 : vector<8x1xf32> to vector<8x8xf32>
    %542 = arith.mulf %537, %541 : vector<8x8xf32>
    %543 = vector.extract_strided_slice %529 {offsets = [0, 0], sizes = [8, 4], strides = [1, 1]} : vector<8x32xf32> to vector<8x4xf32>
    %cst_183 = arith.constant dense<0.000000e+00> : vector<8x4xf32>
    %544 = tpu.matmul %542, %543, %cst_183 {dimension_numbers = #tpu.dot_dimension_numbers<[1], [0], [0], [1], [0, 0, 1, 1], [], []>} : vector<8x8xf32>, vector<8x4xf32>, vector<8x4xf32> -> vector<8x4xf32>
    %545 = vector.extract_strided_slice %527 {offsets = [0, 4], sizes = [8, 4], strides = [1, 1]} : vector<8x32xf32> to vector<8x4xf32>
    %546 = vector.extract_strided_slice %528 {offsets = [0, 4], sizes = [8, 4], strides = [1, 1]} : vector<8x32xf32> to vector<8x4xf32>
    %cst_184 = arith.constant dense<0.000000e+00> : vector<8x8xf32>
    %547 = tpu.matmul %545, %546, %cst_184 {dimension_numbers = #tpu.dot_dimension_numbers<[1], [1], [0], [0], [0, 0, 1, 0], [], []>} : vector<8x4xf32>, vector<8x4xf32>, vector<8x8xf32> -> vector<8x8xf32>
    %cst_185 = arith.constant dense<0xFF800000> : vector<8xf32>
    %548 = vector.multi_reduction <maximumf>, %547, %cst_185 [1] : vector<8x8xf32> to vector<8xf32>
    %549 = vector.shape_cast %548 : vector<8xf32> to vector<8x1xf32>
    %550 = vector.broadcast %549 : vector<8x1xf32> to vector<8x8xf32>
    %551 = arith.subf %547, %550 : vector<8x8xf32>
    %552 = math.exp %551 : vector<8x8xf32>
    %cst_186 = arith.constant dense<0.000000e+00> : vector<8xf32>
    %553 = vector.multi_reduction <add>, %552, %cst_186 [1] : vector<8x8xf32> to vector<8xf32>
    %554 = vector.shape_cast %553 : vector<8xf32> to vector<8x1xf32>
    %555 = tpu.reciprocal %554 : vector<8x1xf32> -> vector<8x1xf32>
    %556 = vector.broadcast %555 : vector<8x1xf32> to vector<8x8xf32>
    %557 = arith.mulf %552, %556 : vector<8x8xf32>
    %558 = vector.extract_strided_slice %529 {offsets = [0, 4], sizes = [8, 4], strides = [1, 1]} : vector<8x32xf32> to vector<8x4xf32>
    %cst_187 = arith.constant dense<0.000000e+00> : vector<8x4xf32>
    %559 = tpu.matmul %557, %558, %cst_187 {dimension_numbers = #tpu.dot_dimension_numbers<[1], [0], [0], [1], [0, 0, 1, 1], [], []>} : vector<8x8xf32>, vector<8x4xf32>, vector<8x4xf32> -> vector<8x4xf32>
    %560 = vector.extract_strided_slice %527 {offsets = [0, 8], sizes = [8, 4], strides = [1, 1]} : vector<8x32xf32> to vector<8x4xf32>
    %561 = vector.extract_strided_slice %528 {offsets = [0, 8], sizes = [8, 4], strides = [1, 1]} : vector<8x32xf32> to vector<8x4xf32>
    %cst_188 = arith.constant dense<0.000000e+00> : vector<8x8xf32>
    %562 = tpu.matmul %560, %561, %cst_188 {dimension_numbers = #tpu.dot_dimension_numbers<[1], [1], [0], [0], [0, 0, 1, 0], [], []>} : vector<8x4xf32>, vector<8x4xf32>, vector<8x8xf32> -> vector<8x8xf32>
    %cst_189 = arith.constant dense<0xFF800000> : vector<8xf32>
    %563 = vector.multi_reduction <maximumf>, %562, %cst_189 [1] : vector<8x8xf32> to vector<8xf32>
    %564 = vector.shape_cast %563 : vector<8xf32> to vector<8x1xf32>
    %565 = vector.broadcast %564 : vector<8x1xf32> to vector<8x8xf32>
    %566 = arith.subf %562, %565 : vector<8x8xf32>
    %567 = math.exp %566 : vector<8x8xf32>
    %cst_190 = arith.constant dense<0.000000e+00> : vector<8xf32>
    %568 = vector.multi_reduction <add>, %567, %cst_190 [1] : vector<8x8xf32> to vector<8xf32>
    %569 = vector.shape_cast %568 : vector<8xf32> to vector<8x1xf32>
    %570 = tpu.reciprocal %569 : vector<8x1xf32> -> vector<8x1xf32>
    %571 = vector.broadcast %570 : vector<8x1xf32> to vector<8x8xf32>
    %572 = arith.mulf %567, %571 : vector<8x8xf32>
    %573 = vector.extract_strided_slice %529 {offsets = [0, 8], sizes = [8, 4], strides = [1, 1]} : vector<8x32xf32> to vector<8x4xf32>
    %cst_191 = arith.constant dense<0.000000e+00> : vector<8x4xf32>
    %574 = tpu.matmul %572, %573, %cst_191 {dimension_numbers = #tpu.dot_dimension_numbers<[1], [0], [0], [1], [0, 0, 1, 1], [], []>} : vector<8x8xf32>, vector<8x4xf32>, vector<8x4xf32> -> vector<8x4xf32>
    %575 = vector.extract_strided_slice %527 {offsets = [0, 12], sizes = [8, 4], strides = [1, 1]} : vector<8x32xf32> to vector<8x4xf32>
    %576 = vector.extract_strided_slice %528 {offsets = [0, 12], sizes = [8, 4], strides = [1, 1]} : vector<8x32xf32> to vector<8x4xf32>
    %cst_192 = arith.constant dense<0.000000e+00> : vector<8x8xf32>
    %577 = tpu.matmul %575, %576, %cst_192 {dimension_numbers = #tpu.dot_dimension_numbers<[1], [1], [0], [0], [0, 0, 1, 0], [], []>} : vector<8x4xf32>, vector<8x4xf32>, vector<8x8xf32> -> vector<8x8xf32>
    %cst_193 = arith.constant dense<0xFF800000> : vector<8xf32>
    %578 = vector.multi_reduction <maximumf>, %577, %cst_193 [1] : vector<8x8xf32> to vector<8xf32>
    %579 = vector.shape_cast %578 : vector<8xf32> to vector<8x1xf32>
    %580 = vector.broadcast %579 : vector<8x1xf32> to vector<8x8xf32>
    %581 = arith.subf %577, %580 : vector<8x8xf32>
    %582 = math.exp %581 : vector<8x8xf32>
    %cst_194 = arith.constant dense<0.000000e+00> : vector<8xf32>
    %583 = vector.multi_reduction <add>, %582, %cst_194 [1] : vector<8x8xf32> to vector<8xf32>
    %584 = vector.shape_cast %583 : vector<8xf32> to vector<8x1xf32>
    %585 = tpu.reciprocal %584 : vector<8x1xf32> -> vector<8x1xf32>
    %586 = vector.broadcast %585 : vector<8x1xf32> to vector<8x8xf32>
    %587 = arith.mulf %582, %586 : vector<8x8xf32>
    %588 = vector.extract_strided_slice %529 {offsets = [0, 12], sizes = [8, 4], strides = [1, 1]} : vector<8x32xf32> to vector<8x4xf32>
    %cst_195 = arith.constant dense<0.000000e+00> : vector<8x4xf32>
    %589 = tpu.matmul %587, %588, %cst_195 {dimension_numbers = #tpu.dot_dimension_numbers<[1], [0], [0], [1], [0, 0, 1, 1], [], []>} : vector<8x8xf32>, vector<8x4xf32>, vector<8x4xf32> -> vector<8x4xf32>
    %590 = vector.extract_strided_slice %527 {offsets = [0, 16], sizes = [8, 4], strides = [1, 1]} : vector<8x32xf32> to vector<8x4xf32>
    %591 = vector.extract_strided_slice %528 {offsets = [0, 16], sizes = [8, 4], strides = [1, 1]} : vector<8x32xf32> to vector<8x4xf32>
    %cst_196 = arith.constant dense<0.000000e+00> : vector<8x8xf32>
    %592 = tpu.matmul %590, %591, %cst_196 {dimension_numbers = #tpu.dot_dimension_numbers<[1], [1], [0], [0], [0, 0, 1, 0], [], []>} : vector<8x4xf32>, vector<8x4xf32>, vector<8x8xf32> -> vector<8x8xf32>
    %cst_197 = arith.constant dense<0xFF800000> : vector<8xf32>
    %593 = vector.multi_reduction <maximumf>, %592, %cst_197 [1] : vector<8x8xf32> to vector<8xf32>
    %594 = vector.shape_cast %593 : vector<8xf32> to vector<8x1xf32>
    %595 = vector.broadcast %594 : vector<8x1xf32> to vector<8x8xf32>
    %596 = arith.subf %592, %595 : vector<8x8xf32>
    %597 = math.exp %596 : vector<8x8xf32>
    %cst_198 = arith.constant dense<0.000000e+00> : vector<8xf32>
    %598 = vector.multi_reduction <add>, %597, %cst_198 [1] : vector<8x8xf32> to vector<8xf32>
    %599 = vector.shape_cast %598 : vector<8xf32> to vector<8x1xf32>
    %600 = tpu.reciprocal %599 : vector<8x1xf32> -> vector<8x1xf32>
    %601 = vector.broadcast %600 : vector<8x1xf32> to vector<8x8xf32>
    %602 = arith.mulf %597, %601 : vector<8x8xf32>
    %603 = vector.extract_strided_slice %529 {offsets = [0, 16], sizes = [8, 4], strides = [1, 1]} : vector<8x32xf32> to vector<8x4xf32>
    %cst_199 = arith.constant dense<0.000000e+00> : vector<8x4xf32>
    %604 = tpu.matmul %602, %603, %cst_199 {dimension_numbers = #tpu.dot_dimension_numbers<[1], [0], [0], [1], [0, 0, 1, 1], [], []>} : vector<8x8xf32>, vector<8x4xf32>, vector<8x4xf32> -> vector<8x4xf32>
    %605 = vector.extract_strided_slice %527 {offsets = [0, 20], sizes = [8, 4], strides = [1, 1]} : vector<8x32xf32> to vector<8x4xf32>
    %606 = vector.extract_strided_slice %528 {offsets = [0, 20], sizes = [8, 4], strides = [1, 1]} : vector<8x32xf32> to vector<8x4xf32>
    %cst_200 = arith.constant dense<0.000000e+00> : vector<8x8xf32>
    %607 = tpu.matmul %605, %606, %cst_200 {dimension_numbers = #tpu.dot_dimension_numbers<[1], [1], [0], [0], [0, 0, 1, 0], [], []>} : vector<8x4xf32>, vector<8x4xf32>, vector<8x8xf32> -> vector<8x8xf32>
    %cst_201 = arith.constant dense<0xFF800000> : vector<8xf32>
    %608 = vector.multi_reduction <maximumf>, %607, %cst_201 [1] : vector<8x8xf32> to vector<8xf32>
    %609 = vector.shape_cast %608 : vector<8xf32> to vector<8x1xf32>
    %610 = vector.broadcast %609 : vector<8x1xf32> to vector<8x8xf32>
    %611 = arith.subf %607, %610 : vector<8x8xf32>
    %612 = math.exp %611 : vector<8x8xf32>
    %cst_202 = arith.constant dense<0.000000e+00> : vector<8xf32>
    %613 = vector.multi_reduction <add>, %612, %cst_202 [1] : vector<8x8xf32> to vector<8xf32>
    %614 = vector.shape_cast %613 : vector<8xf32> to vector<8x1xf32>
    %615 = tpu.reciprocal %614 : vector<8x1xf32> -> vector<8x1xf32>
    %616 = vector.broadcast %615 : vector<8x1xf32> to vector<8x8xf32>
    %617 = arith.mulf %612, %616 : vector<8x8xf32>
    %618 = vector.extract_strided_slice %529 {offsets = [0, 20], sizes = [8, 4], strides = [1, 1]} : vector<8x32xf32> to vector<8x4xf32>
    %cst_203 = arith.constant dense<0.000000e+00> : vector<8x4xf32>
    %619 = tpu.matmul %617, %618, %cst_203 {dimension_numbers = #tpu.dot_dimension_numbers<[1], [0], [0], [1], [0, 0, 1, 1], [], []>} : vector<8x8xf32>, vector<8x4xf32>, vector<8x4xf32> -> vector<8x4xf32>
    %620 = vector.extract_strided_slice %527 {offsets = [0, 24], sizes = [8, 4], strides = [1, 1]} : vector<8x32xf32> to vector<8x4xf32>
    %621 = vector.extract_strided_slice %528 {offsets = [0, 24], sizes = [8, 4], strides = [1, 1]} : vector<8x32xf32> to vector<8x4xf32>
    %cst_204 = arith.constant dense<0.000000e+00> : vector<8x8xf32>
    %622 = tpu.matmul %620, %621, %cst_204 {dimension_numbers = #tpu.dot_dimension_numbers<[1], [1], [0], [0], [0, 0, 1, 0], [], []>} : vector<8x4xf32>, vector<8x4xf32>, vector<8x8xf32> -> vector<8x8xf32>
    %cst_205 = arith.constant dense<0xFF800000> : vector<8xf32>
    %623 = vector.multi_reduction <maximumf>, %622, %cst_205 [1] : vector<8x8xf32> to vector<8xf32>
    %624 = vector.shape_cast %623 : vector<8xf32> to vector<8x1xf32>
    %625 = vector.broadcast %624 : vector<8x1xf32> to vector<8x8xf32>
    %626 = arith.subf %622, %625 : vector<8x8xf32>
    %627 = math.exp %626 : vector<8x8xf32>
    %cst_206 = arith.constant dense<0.000000e+00> : vector<8xf32>
    %628 = vector.multi_reduction <add>, %627, %cst_206 [1] : vector<8x8xf32> to vector<8xf32>
    %629 = vector.shape_cast %628 : vector<8xf32> to vector<8x1xf32>
    %630 = tpu.reciprocal %629 : vector<8x1xf32> -> vector<8x1xf32>
    %631 = vector.broadcast %630 : vector<8x1xf32> to vector<8x8xf32>
    %632 = arith.mulf %627, %631 : vector<8x8xf32>
    %633 = vector.extract_strided_slice %529 {offsets = [0, 24], sizes = [8, 4], strides = [1, 1]} : vector<8x32xf32> to vector<8x4xf32>
    %cst_207 = arith.constant dense<0.000000e+00> : vector<8x4xf32>
    %634 = tpu.matmul %632, %633, %cst_207 {dimension_numbers = #tpu.dot_dimension_numbers<[1], [0], [0], [1], [0, 0, 1, 1], [], []>} : vector<8x8xf32>, vector<8x4xf32>, vector<8x4xf32> -> vector<8x4xf32>
    %635 = vector.extract_strided_slice %527 {offsets = [0, 28], sizes = [8, 4], strides = [1, 1]} : vector<8x32xf32> to vector<8x4xf32>
    %636 = vector.extract_strided_slice %528 {offsets = [0, 28], sizes = [8, 4], strides = [1, 1]} : vector<8x32xf32> to vector<8x4xf32>
    %cst_208 = arith.constant dense<0.000000e+00> : vector<8x8xf32>
    %637 = tpu.matmul %635, %636, %cst_208 {dimension_numbers = #tpu.dot_dimension_numbers<[1], [1], [0], [0], [0, 0, 1, 0], [], []>} : vector<8x4xf32>, vector<8x4xf32>, vector<8x8xf32> -> vector<8x8xf32>
    %cst_209 = arith.constant dense<0xFF800000> : vector<8xf32>
    %638 = vector.multi_reduction <maximumf>, %637, %cst_209 [1] : vector<8x8xf32> to vector<8xf32>
    %639 = vector.shape_cast %638 : vector<8xf32> to vector<8x1xf32>
    %640 = vector.broadcast %639 : vector<8x1xf32> to vector<8x8xf32>
    %641 = arith.subf %637, %640 : vector<8x8xf32>
    %642 = math.exp %641 : vector<8x8xf32>
    %cst_210 = arith.constant dense<0.000000e+00> : vector<8xf32>
    %643 = vector.multi_reduction <add>, %642, %cst_210 [1] : vector<8x8xf32> to vector<8xf32>
    %644 = vector.shape_cast %643 : vector<8xf32> to vector<8x1xf32>
    %645 = tpu.reciprocal %644 : vector<8x1xf32> -> vector<8x1xf32>
    %646 = vector.broadcast %645 : vector<8x1xf32> to vector<8x8xf32>
    %647 = arith.mulf %642, %646 : vector<8x8xf32>
    %648 = vector.extract_strided_slice %529 {offsets = [0, 28], sizes = [8, 4], strides = [1, 1]} : vector<8x32xf32> to vector<8x4xf32>
    %cst_211 = arith.constant dense<0.000000e+00> : vector<8x4xf32>
    %649 = tpu.matmul %647, %648, %cst_211 {dimension_numbers = #tpu.dot_dimension_numbers<[1], [0], [0], [1], [0, 0, 1, 1], [], []>} : vector<8x8xf32>, vector<8x4xf32>, vector<8x4xf32> -> vector<8x4xf32>
    %650 = tpu.concatenate %544, %559, %574, %589, %604, %619, %634, %649 in 1 : vector<8x4xf32>, vector<8x4xf32>, vector<8x4xf32>, vector<8x4xf32>, vector<8x4xf32>, vector<8x4xf32>, vector<8x4xf32>, vector<8x4xf32> -> vector<8x32xf32>
    %651 = tpu.concatenate %526, %650 in 0 : vector<8x32xf32>, vector<8x32xf32> -> vector<16x32xf32>
    %c3_212 = arith.constant 3 : index
    %c0_213 = arith.constant 0 : index
    %c0_214 = arith.constant 0 : index
    %652 = vector.load %arg6[%c3_212, %c0_213, %c0_214] : memref<4x32x32xf32, #tpu.memory_space<vmem>>, vector<1x32x32xf32>
    %653 = vector.shape_cast %652 : vector<1x32x32xf32> to vector<32x32xf32>
    %cst_215 = arith.constant dense<0.000000e+00> : vector<16x32xf32>
    %654 = tpu.matmul %651, %653, %cst_215 {dimension_numbers = #tpu.dot_dimension_numbers<[1], [0], [0], [1], [0, 0, 1, 1], [], []>} : vector<16x32xf32>, vector<32x32xf32>, vector<16x32xf32> -> vector<16x32xf32>
    %655 = vector.broadcast %3 : vector<1x32xf32> to vector<16x32xf32>
    %656 = arith.addf %654, %655 : vector<16x32xf32>
    %657 = arith.addf %656, %393 : vector<16x32xf32>
    %cst_216 = arith.constant dense<0.000000e+00> : vector<16xf32>
    %658 = vector.multi_reduction <add>, %657, %cst_216 [1] : vector<16x32xf32> to vector<16xf32>
    %659 = vector.shape_cast %658 : vector<16xf32> to vector<16x1xf32>
    %cst_217 = arith.constant 3.200000e+01 : f32
    %660 = vector.broadcast %cst_217 : f32 to vector<16x1xf32>
    %661 = arith.divf %659, %660 : vector<16x1xf32>
    %662 = vector.broadcast %661 : vector<16x1xf32> to vector<16x32xf32>
    %663 = arith.subf %657, %662 : vector<16x32xf32>
    %664 = arith.mulf %663, %663 : vector<16x32xf32>
    %cst_218 = arith.constant dense<0.000000e+00> : vector<16xf32>
    %665 = vector.multi_reduction <add>, %664, %cst_218 [1] : vector<16x32xf32> to vector<16xf32>
    %666 = vector.shape_cast %665 : vector<16xf32> to vector<16x1xf32>
    %cst_219 = arith.constant 3.200000e+01 : f32
    %667 = vector.broadcast %cst_219 : f32 to vector<16x1xf32>
    %668 = arith.divf %666, %667 : vector<16x1xf32>
    %cst_220 = arith.constant 9.99999974E-6 : f32
    %669 = vector.broadcast %cst_220 : f32 to vector<16x1xf32>
    %670 = arith.addf %668, %669 : vector<16x1xf32>
    %671 = math.rsqrt %670 : vector<16x1xf32>
    %672 = vector.broadcast %671 : vector<16x1xf32> to vector<16x32xf32>
    %673 = arith.mulf %663, %672 : vector<16x32xf32>
    %674 = vector.broadcast %4 : vector<1x32xf32> to vector<16x32xf32>
    %675 = arith.mulf %673, %674 : vector<16x32xf32>
    %676 = vector.broadcast %5 : vector<1x32xf32> to vector<16x32xf32>
    %677 = arith.addf %675, %676 : vector<16x32xf32>
    %c0_221 = arith.constant 0 : index
    %c0_222 = arith.constant 0 : index
    %678 = vector.load %arg7[%c0_221, %c0_222] : memref<32x128xf32, #tpu.memory_space<vmem>>, vector<32x128xf32>
    %cst_223 = arith.constant dense<0.000000e+00> : vector<16x128xf32>
    %679 = tpu.matmul %677, %678, %cst_223 {dimension_numbers = #tpu.dot_dimension_numbers<[1], [0], [0], [1], [0, 0, 1, 1], [], []>} : vector<16x32xf32>, vector<32x128xf32>, vector<16x128xf32> -> vector<16x128xf32>
    %680 = vector.broadcast %9 : vector<1x128xf32> to vector<16x128xf32>
    %681 = arith.addf %679, %680 : vector<16x128xf32>
    %cst_224 = arith.constant 0.000000e+00 : f32
    %682 = vector.broadcast %cst_224 : f32 to vector<16x128xf32>
    %683 = arith.maximumf %681, %682 : vector<16x128xf32>
    %c0_225 = arith.constant 0 : index
    %c0_226 = arith.constant 0 : index
    %684 = vector.load %arg8[%c0_225, %c0_226] : memref<128x32xf32, #tpu.memory_space<vmem>>, vector<128x32xf32>
    %cst_227 = arith.constant dense<0.000000e+00> : vector<16x32xf32>
    %685 = tpu.matmul %683, %684, %cst_227 {dimension_numbers = #tpu.dot_dimension_numbers<[1], [0], [0], [1], [0, 0, 1, 1], [], []>} : vector<16x128xf32>, vector<128x32xf32>, vector<16x32xf32> -> vector<16x32xf32>
    %686 = vector.broadcast %6 : vector<1x32xf32> to vector<16x32xf32>
    %687 = arith.addf %685, %686 : vector<16x32xf32>
    %688 = arith.addf %687, %677 : vector<16x32xf32>
    %cst_228 = arith.constant dense<0.000000e+00> : vector<16xf32>
    %689 = vector.multi_reduction <add>, %688, %cst_228 [1] : vector<16x32xf32> to vector<16xf32>
    %690 = vector.shape_cast %689 : vector<16xf32> to vector<16x1xf32>
    %cst_229 = arith.constant 3.200000e+01 : f32
    %691 = vector.broadcast %cst_229 : f32 to vector<16x1xf32>
    %692 = arith.divf %690, %691 : vector<16x1xf32>
    %693 = vector.broadcast %692 : vector<16x1xf32> to vector<16x32xf32>
    %694 = arith.subf %688, %693 : vector<16x32xf32>
    %695 = arith.mulf %694, %694 : vector<16x32xf32>
    %cst_230 = arith.constant dense<0.000000e+00> : vector<16xf32>
    %696 = vector.multi_reduction <add>, %695, %cst_230 [1] : vector<16x32xf32> to vector<16xf32>
    %697 = vector.shape_cast %696 : vector<16xf32> to vector<16x1xf32>
    %cst_231 = arith.constant 3.200000e+01 : f32
    %698 = vector.broadcast %cst_231 : f32 to vector<16x1xf32>
    %699 = arith.divf %697, %698 : vector<16x1xf32>
    %cst_232 = arith.constant 9.99999974E-6 : f32
    %700 = vector.broadcast %cst_232 : f32 to vector<16x1xf32>
    %701 = arith.addf %699, %700 : vector<16x1xf32>
    %702 = math.rsqrt %701 : vector<16x1xf32>
    %703 = vector.broadcast %702 : vector<16x1xf32> to vector<16x32xf32>
    %704 = arith.mulf %694, %703 : vector<16x32xf32>
    %705 = vector.broadcast %7 : vector<1x32xf32> to vector<16x32xf32>
    %706 = arith.mulf %704, %705 : vector<16x32xf32>
    %707 = vector.broadcast %8 : vector<1x32xf32> to vector<16x32xf32>
    %708 = arith.addf %706, %707 : vector<16x32xf32>
    %c0_233 = arith.constant 0 : index
    %c0_234 = arith.constant 0 : index
    %709 = vector.load %arg11[%c0_233, %c0_234] : memref<16x32xf32, #tpu.memory_space<vmem>>, vector<16x32xf32>
    tpu.vector_store %arg11[%c0_233, %c0_234], %708 {strides = array<i32>} : memref<16x32xf32, #tpu.memory_space<vmem>>, vector<16x32xf32>,
    return
  }
  func.func @transform_0(%arg0: i32) -> (i32, i32) {
    %c0_i32 = arith.constant 0 : i32
    %c0_i32_0 = arith.constant 0 : i32
    %c0_i32_1 = arith.constant 0 : i32
    return %c0_i32, %c0_i32_0 : i32, i32
  }
  func.func @transform_1(%arg0: i32) -> (i32, i32) {
    %c0_i32 = arith.constant 0 : i32
    %c0_i32_0 = arith.constant 0 : i32
    %c0_i32_1 = arith.constant 0 : i32
    return %c0_i32, %c0_i32_0 : i32, i32
  }
  func.func @transform_2(%arg0: i32) -> (i32, i32) {
    %c0_i32 = arith.constant 0 : i32
    %c0_i32_0 = arith.constant 0 : i32
    %c0_i32_1 = arith.constant 0 : i32
    return %c0_i32, %c0_i32_0 : i32, i32
  }
  func.func @transform_3(%arg0: i32) -> (i32, i32, i32) {
    %c0_i32 = arith.constant 0 : i32
    %c0_i32_0 = arith.constant 0 : i32
    %c0_i32_1 = arith.constant 0 : i32
    %c0_i32_2 = arith.constant 0 : i32
    return %c0_i32, %c0_i32_0, %c0_i32_1 : i32, i32, i32
  }
  func.func @transform_4(%arg0: i32) -> (i32, i32, i32) {
    %c0_i32 = arith.constant 0 : i32
    %c0_i32_0 = arith.constant 0 : i32
    %c0_i32_1 = arith.constant 0 : i32
    %c0_i32_2 = arith.constant 0 : i32
    return %c0_i32, %c0_i32_0, %c0_i32_1 : i32, i32, i32
  }
  func.func @transform_5(%arg0: i32) -> (i32, i32, i32) {
    %c0_i32 = arith.constant 0 : i32
    %c0_i32_0 = arith.constant 0 : i32
    %c0_i32_1 = arith.constant 0 : i32
    %c0_i32_2 = arith.constant 0 : i32
    return %c0_i32, %c0_i32_0, %c0_i32_1 : i32, i32, i32
  }
  func.func @transform_6(%arg0: i32) -> (i32, i32) {
    %c0_i32 = arith.constant 0 : i32
    %c0_i32_0 = arith.constant 0 : i32
    %c0_i32_1 = arith.constant 0 : i32
    return %c0_i32, %c0_i32_0 : i32, i32
  }
  func.func @transform_7(%arg0: i32) -> (i32, i32) {
    %c0_i32 = arith.constant 0 : i32
    %c0_i32_0 = arith.constant 0 : i32
    %c0_i32_1 = arith.constant 0 : i32
    return %c0_i32, %c0_i32_0 : i32, i32
  }
  func.func @transform_8(%arg0: i32) -> (i32, i32) {
    %c0_i32 = arith.constant 0 : i32
    %c0_i32_0 = arith.constant 0 : i32
    %c0_i32_1 = arith.constant 0 : i32
    return %c0_i32, %c0_i32_0 : i32, i32
  }
  func.func @transform_9(%arg0: i32) -> (i32, i32) {
    %c0_i32 = arith.constant 0 : i32
    %c0_i32_0 = arith.constant 0 : i32
    %c0_i32_1 = arith.constant 0 : i32
    return %c0_i32, %c0_i32_0 : i32, i32
  }
  func.func @transform_10(%arg0: i32) -> (i32, i32) {
    %c0_i32 = arith.constant 0 : i32
    %c0_i32_0 = arith.constant 0 : i32
    %c0_i32_1 = arith.constant 0 : i32
    return %c0_i32, %c0_i32_0 : i32, i32
  }
}

</mosaic_0001>

<bundles_post_ra>
// kernel: tpu_custom_call.1
= control target key start
LH: loop header
LB: loop body
LE: loop exit
PB: predicated region body
PF: predicated region fallthrough
CT: control target
= control target key end

     0   :  { %15 = vsyncpa [#allocation3], 0  ;;  %s5028_s0 = inlined_call_operand.hbm [shape: f32[16,32], index: 0, kind: input, shape index: {}]   ;;  %s5029_s1 = inlined_call_operand.hbm [shape: f32[16,32], index: 1, kind: input, shape index: {}]   ;;  %s5030_s2 = inlined_call_operand.hbm [shape: f32[16,32], index: 2, kind: input, shape index: {}]   ;;  %s5031_s3 = inlined_call_operand.hbm [shape: f32[2,8,8], index: 3, kind: input, shape index: {}]   ;;  %s5032_s4 = inlined_call_operand.vmem [shape: f32[4,32,32], index: 4, kind: input, shape index: {}]   ;;  %s5033_s5 = inlined_call_operand.hbm [shape: f32[4,32,32], index: 5, kind: input, shape index: {}]   ;;  %s5034_s6 = inlined_call_operand.vmem [shape: f32[32,128], index: 6, kind: input, shape index: {}]   ;;  %s5035_s7 = inlined_call_operand.vmem [shape: f32[128,32], index: 7, kind: input, shape index: {}]   ;;  %s5036_s8 = inlined_call_operand.hbm [shape: f32[9,32], index: 8, kind: input, shape index: {}]   ;;  %s5037_s9 = inlined_call_operand.vmem [shape: f32[1,128], index: 9, kind: input, shape index: {}]   ;;  %s5038_s10 = inlined_call_operand.hbm [shape: f32[16,32], index: 10, kind: output, shape index: {}]  }
   0x1   :  { %16 = vsyncpa [#allocation6], 0 }
   0x2   :  { %17 = vsyncpa [#allocation9], 0 }
   0x3   :  { %18 = vsyncpa [#allocation12], 0 }
   0x4   :  { %19 = vsyncpa [#allocation4], 0  ;;  %s37_s15 = sshll.u32 %s5029_s1, 4  ;;  %s3800_s16 = smov [#allocation5]   ;;  %s38_s15 = int_to_ptr.hbm [resolvable:$true] %s37_s15 }
   0x5   :  { %s39_s17 = sshll.u32 %s3800_s16, 4  ;;  %s63_s20 = sshll.u32 %s5031_s3, 4  ;;  %s40_s17 = int_to_ptr.vmem [resolvable:$true] %s39_s17  ;;  %s64_s20 = int_to_ptr.hbm [resolvable:$true] %s63_s20 }
   0x6   :  { %s3801_s21 = smov 128   ;;  %s3802_s22 = smov 8  }
   0x7   :  { %45 = dma.hbm_to_vmem [thread:$0]  %s38_s15, 256, %s40_s17, [#allocation6], %s3801_s21, %s3801_s21, %s3802_s22  }
   0x8   :  { %s3803_s23 = smov [#allocation8]   ;;  %s24_s1 = sshll.u32 %s5028_s0, 4  ;;  %s25_s1 = int_to_ptr.hbm [resolvable:$true] %s24_s1 }
   0x9   :  { %s65_s24 = sshll.u32 %s3803_s23, 4  ;;  %s50_s28 = sshll.u32 %s5030_s2, 4  ;;  %s66_s24 = int_to_ptr.vmem [resolvable:$true] %s65_s24  ;;  %s51_s28 = int_to_ptr.hbm [resolvable:$true] %s50_s28 }
   0xa   :  { %71 = dma.hbm_to_vmem [thread:$0]  %s64_s20, 256, %s66_s24, [#allocation9], %s3801_s21, %s3801_s21, %s3802_s22  }
   0xb   :  { %s3804_s29 = smov [#allocation2]   ;;  %s3805_s11 = smov [#allocation7]  }
   0xc   :  { %s26_s30 = sshll.u32 %s3804_s29, 4  ;;  %s52_s0 = sshll.u32 %s3805_s11, 4  ;;  %s27_s30 = int_to_ptr.vmem [resolvable:$true] %s26_s30  ;;  %s53_s0 = int_to_ptr.vmem [resolvable:$true] %s52_s0 }
   0xd   :  { %32 = dma.hbm_to_vmem [thread:$0]  %s25_s1, 256, %s27_s30, [#allocation3], %s3801_s21, %s3801_s21, %s3802_s22  }
   0xe   :  { %s78_s14 = sshll.u32 %s5033_s5, 4  ;;  %s95_s16 = sshll.u32 %s5036_s8, 4  ;;  %s79_s14 = int_to_ptr.hbm [resolvable:$true] %s78_s14  ;;  %s96_s16 = int_to_ptr.hbm [resolvable:$true] %s95_s16 }
   0xf   :  { %58 = dma.hbm_to_vmem [thread:$0]  %s51_s28, 256, %s53_s0, [#allocation6], %s3801_s21, %s3801_s21, %s3802_s22  }
  0x10   :  { %s3806_s17 = smov [#allocation10]   ;;  %s3807_s19 = smov [#allocation11]  }
  0x11   :  { %s80_s18 = sshll.u32 %s3806_s17, 4  ;;  %s97_s5 = sshll.u32 %s3807_s19, 4  ;;  %s81_s18 = int_to_ptr.vmem [resolvable:$true] %s80_s18  ;;  %s98_s5 = int_to_ptr.vmem [resolvable:$true] %s97_s5 }
  0x12   :  { %86 = dma.hbm_to_vmem [thread:$0]  %s79_s14, 2048, %s81_s18, [#allocation9], %s3801_s21, %s3801_s21, %s3802_s22  }
  0x13   :  { %103 = dma.hbm_to_vmem [thread:$0]  %s96_s16, 256, %s98_s5, [#allocation12], %s3801_s21, %s3801_s21, %s3802_s22  }
  0x14   :  { %3790 = dma.done.wait [#allocation3], 256  }
  0x15   :  { %3791 = vsyncadd [#allocation3], 4294967040 }
  0x16   :  { %3792 = dma.done.wait [#allocation6], 512  }
  0x17   :  { %3793 = vsyncadd [#allocation6], 4294966784 }
  0x18   :  { %3794 = dma.done.wait [#allocation9], 2304  }
  0x19   :  { %3795 = vsyncadd [#allocation9], 4294964992 }
  0x1a   :  { %3796 = dma.done.wait [#allocation12], 256  }
  0x1b   :  { %3797 = vsyncadd [#allocation12], 4294967040  ;;  %v151_v0 = vld [vmem:[%s5032_s4 + $0x18] sm:$0xff]  ;;  %v150_v2 = vld [vmem:[%s5032_s4 + $0x10] sm:$0xff]  ;;  %vm152_vm0 = vcmask 261120   ;;  %vm238_vm1 = vcmask 31744  }
  0x1c   :  { %v3324_v1 = vld [vmem:[%s5032_s4 + $0x38] sm:$0xff]  ;;  %171 = vmatpush.msra.mxu0 %v151_v0  ;;  %v3323_v3 = vld [vmem:[%s5032_s4 + $0x30] sm:$0xff]  ;;  %v149_v4 = vld [vmem:[%s5032_s4 + $0x8] sm:$0xff]  ;;  %s3808_s8 = smov 120   ;;  %s3809_s20 = smov 124   ;;  %vm267_vm3 = vcmask 64512  }
  0x1d   :  { %199 = vmatpush.msra.mxu1 %v3324_v1  ;;  %v3322_v5 = vld [vmem:[%s5032_s4 + $0x28] sm:$0xff]  ;;  %v148_v6 = vld [vmem:[%s5032_s4] sm:$0xff]  ;;  %v3330_v7 = vld [vmem:[%s5032_s4 + $0x58] sm:$0xff]  ;;  %s3810_s23 = smov 116   ;;  %s3811_s24 = smov 100  }
  0x1e   :  { %172 = vmatpush.msra.mxu0 %v150_v2  ;;  %v3329_v8 = vld [vmem:[%s5032_s4 + $0x50] sm:$0xff]  ;;  %v3321_v9 = vld [vmem:[%s5032_s4 + $0x20] sm:$0xff]  ;;  %227 = vmatpush.msra.mxu2 %v3330_v7  ;;  %v3328_v11 = vld [vmem:[%s5032_s4 + $0x48] sm:$0xff]  ;;  %s3812_s25 = smov 112   ;;  %s3813_s26 = smov 108  }
  0x1f   :  { %200 = vmatpush.msra.mxu1 %v3323_v3  ;;  %v140_v10 = vld [vmem:[#allocation7] sm:$0xff]  ;;  %v141_v13 = vld [vmem:[#allocation7 + $0x8] sm:$0xff]  ;;  %s3814_s1 = smov 104   ;;  %v4011_v27 = vld [vmem:[#allocation8] sm:$0xff]  ;;  %s3815_s3 = smov 4  }
  0x20   :  { %173 = vmatpush.msra.mxu0 %v149_v4  ;;  %228 = vmatpush.msra.mxu2 %v3329_v8  ;;  %v3327_v12 = vld [vmem:[%s5032_s4 + $0x40] sm:$0xff]  ;;  %vm265_vm2 = vcmp.eq.f32.partialorder %v4011_v27, 0.0  ;;  %v4055_v52 = vld [vmem:[#allocation8 + $0x8] sm:$0xff]  ;;  %s3816_s27 = smov 16   ;;  %s3817_s28 = smov 12  }
  0x21   :  { %201 = vmatpush.msra.mxu1 %v3322_v5  ;;  %vm935_vm4 = vcmp.eq.f32.partialorder %v4055_v52, 0.0  ;;  %s3818_s29 = smov 24   ;;  %s3819_s30 = smov 20  }
  0x22   :  { %174 = vmatpush.msra.mxu0 %v148_v6  ;;  %229 = vmatpush.msra.mxu2 %v3328_v11  ;;  %s3820_s11 = smov 28   ;;  %s3303_s0 = sshll.u32 %s5038_s10, 4  ;;  %s3304_s0 = int_to_ptr.hbm [resolvable:$true] %s3303_s0 }
  0x23   :  { %202 = vmatpush.msra.mxu1 %v3321_v9  ;;  %3319 = vmatmul.msk.f32.vlgmr.msra.gmra.mxu0 %vm152_vm0, %v140_v10 }
  0x24   :  { %3325 = vmatmul.msk.f32.vlgmr.msra.gmra.mxu1 %vm152_vm0, %v140_v10  ;;  %230 = vmatpush.msra.mxu2 %v3327_v12 }
  0x25   :  { %3331 = vmatmul.msk.f32.vlgmr.msra.gmra.mxu2 %vm152_vm0, %v140_v10 }
  0x2b   :  { %3320 = vmatmul.msk.f32.gmra.mxu0 %vm152_vm0, %v141_v13 }
  0x2c   :  { %3326 = vmatmul.msk.f32.gmra.mxu1 %vm152_vm0, %v141_v13 }
  0x2d   :  { %3332 = vmatmul.msk.f32.gmra.mxu2 %vm152_vm0, %v141_v13 }
  0xa0   :  { %v176_v14 = vpop.f32.mrf.mxu0 }
  0xa1   :  { %v204_v15 = vpop.f32.mrf.mxu1  ;;  %395 = vrot.lane.b32.xlu0 %v176_v14, %s3808_s8 }
  0xa2   :  { %397 = vrot.lane.b32.xlu2 %v204_v15, %s3808_s8  ;;  %317 = vrot.lane.b32.xlu1 %v204_v15, %s3809_s20 }
  0xa3   :  { %3333 = vmatpush.xpose.msk.msrb.mxu1 %vm238_vm1, %v204_v15 }
  0xa6   :  { %3334 = vmatmul.msk.f32.vlgmr.msrb.gmra.mxu1 %vm238_vm1, %v176_v14 }
  0xa8   :  { %v3976_v17 = vpop.f32.mrf.mxu0  ;;  %v3994_v18 = vpop.f32.mrf.mxu2 }
  0xa9   :  { %792 = vrot.lane.b32.xlu0 %v204_v15, %s3811_s24  ;;  %v3966_v16 = vpop.f32.mrf.mxu1  ;;  %310 = vmatpush.msra.mxu3 %v3994_v18 }
  0xaa   :  { %476 = vrot.lane.b32.xlu2 %v204_v15, %s3810_s23  ;;  %315 = vrot.lane.b32.xlu1 %v176_v14, %s3809_s20 }
  0xb1   :  { %986 = vrot.lane.b32.xlu0 %v3966_v16, %s3809_s20 }
  0xb2   :  { %555 = vrot.lane.b32.xlu2 %v204_v15, %s3812_s25  ;;  %474 = vrot.lane.b32.xlu1 %v176_v14, %s3810_s23 }
  0xba   :  { %553 = vrot.lane.b32.xlu2 %v176_v14, %s3812_s25  ;;  %634 = vrot.lane.b32.xlu1 %v204_v15, %s3813_s26 }
  0xc2   :  { %713 = vrot.lane.b32.xlu2 %v204_v15, %s3814_s1  ;;  %632 = vrot.lane.b32.xlu1 %v176_v14, %s3813_s26 }
  0xca   :  { %790 = vrot.lane.b32.xlu2 %v176_v14, %s3811_s24  ;;  %711 = vrot.lane.b32.xlu1 %v176_v14, %s3814_s1 }
  0xd2   :  { %1066 = vrot.lane.b32.xlu2 %v3966_v16, %s3808_s8  ;;  %984 = vrot.lane.b32.xlu1 %v3976_v17, %s3809_s20 }
  0xda   :  { %1143 = vrot.lane.b32.xlu2 %v3976_v17, %s3810_s23  ;;  %1064 = vrot.lane.b32.xlu1 %v3976_v17, %s3808_s8 }
  0xe2   :  { %1222 = vrot.lane.b32.xlu2 %v3976_v17, %s3812_s25  ;;  %1303 = vrot.lane.b32.xlu1 %v3966_v16, %s3813_s26 }
  0xea   :  { %1461 = vrot.lane.b32.xlu2 %v3966_v16, %s3811_s24  ;;  %1382 = vrot.lane.b32.xlu1 %v3966_v16, %s3814_s1 }
  0xf2   :  { %1459 = vrot.lane.b32.xlu1 %v3976_v17, %s3811_s24 }
  0xfa   :  { %369 = vrot.lane.b32.xlu1 %v3994_v18, %s3809_s20 }
  0xfc   :  { %v398_v19 = vpop.permute.xlu2 %397 }
  0xfd   :  { %3339 = vmatpush.xpose.msk.msra.mxu1 %vm238_vm1, %v398_v19 }
 0x104   :  { %v4002_v20 = vpop.permute.xlu2 %476 }
 0x10c   :  { %v556_v21 = vpop.permute.xlu2 %555 }
 0x10d   :  { %3345 = vmatpush.xpose.msk.msrb.mxu1 %vm238_vm1, %v556_v21 }
 0x113   :  { %v396_v24 = vpop.permute.xlu0 %395 }
 0x114   :  { %v318_v22 = vpop.permute.xlu1 %317  ;;  %v554_v23 = vpop.permute.xlu2 %553  ;;  %3340 = vmatmul.msk.f32.vlgmr.msra.gmra.mxu1 %vm238_vm1, %v396_v24 }
 0x115   :  { %3336 = vmatpush.xpose.msk.msrb.mxu3 %vm238_vm1, %v318_v22 }
 0x11b   :  { %v4036_v39 = vpop.permute.xlu0 %792 }
 0x11c   :  { %v714_v25 = vpop.permute.xlu2 %713  ;;  %v4007_v26 = vpop.permute.xlu1 %315  ;;  %3346 = vmatmul.msk.f32.vlgmr.msrb.gmra.mxu1 %vm238_vm1, %v554_v23 }
 0x11d   :  { %3351 = vmatpush.xpose.msk.msra.mxu1 %vm238_vm1, %v714_v25 }
 0x121   :  { %3357 = vmatpush.xpose.msk.msrb.mxu1 %vm238_vm1, %v3966_v16 }
 0x123   :  { %v262_v28 = vpop.f32.mrf.mxu1  ;;  %v4038_v40 = vpop.permute.xlu0 %986 }
 0x124   :  { %v266_v29 = vsel %vm265_vm2, -1e+20, %v262_v28  ;;  %v4018_v30 = vpop.permute.xlu1 %474  ;;  %v4025_v34 = vpop.permute.xlu2 %790 }
 0x125   :  { %v268_v31 = vsel %vm267_vm3, %v266_v29, -inf }
 0x126   :  { %269 = vmax.xlane.f32.xlu0 %v268_v31 }
 0x12c   :  { %v4021_v32 = vpop.permute.xlu1 %634  ;;  %v1067_v36 = vpop.permute.xlu2 %1066 }
 0x134   :  { %v4023_v33 = vpop.permute.xlu1 %632  ;;  %v1144_v60 = vpop.permute.xlu2 %1143 }
 0x13a   :  { %1145 = vrot.lane.b32.xlu0 %v3966_v16, %s3810_s23 }
 0x13c   :  { %v712_v35 = vpop.permute.xlu1 %711  ;;  %v1223_v63 = vpop.permute.xlu2 %1222 }
 0x13d   :  { %3352 = vmatmul.msk.f32.vlgmr.msra.gmra.mxu1 %vm238_vm1, %v712_v35 }
 0x13e   :  { %3363 = vmatpush.xpose.msk.msra.mxu1 %vm238_vm1, %v1067_v36 }
 0x144   :  { %v4031_v37 = vpop.permute.xlu1 %984  ;;  %v1462_v4 = vpop.permute.xlu2 %1461 }
 0x145   :  { %3358 = vmatmul.msk.f32.vlgmr.msrb.gmra.mxu1 %vm238_vm1, %v3976_v17 }
 0x14c   :  { %v1065_v38 = vpop.permute.xlu1 %1064 }
 0x14d   :  { %3364 = vmatmul.msk.f32.vlgmr.msra.gmra.mxu1 %vm238_vm1, %v1065_v38 }
 0x154   :  { %v1304_v62 = vpop.permute.xlu1 %1303 }
 0x15c   :  { %v1383_v2 = vpop.permute.xlu1 %1382 }
 0x164   :  { %v1460_v11 = vpop.permute.xlu1 %1459 }
 0x191   :  { %v420_v41 = vpop.f32.mrf.mxu1 }
 0x192   :  { %v423_v58 = vsel %vm265_vm2, -1e+20, %v420_v41 }
 0x193   :  { %v424_v59 = vsel %vm267_vm3, %v423_v58, -inf }
 0x199   :  { %v270_v42 = vpop.xlane.xlu0 %269  ;;  %v578_v44 = vpop.f32.mrf.mxu1 }
 0x19a   :  { %v271_v43 = vsub.f32 %v266_v29, %v270_v42  ;;  %v4042_v46 = vsel %vm265_vm2, -1e+20, %v578_v44 }
 0x19b   :  { %v582_v47 = vsel %vm267_vm3, %v4042_v46, -inf }
 0x19c   :  { %v272_v45 = vmul.f32 1.442695, %v271_v43  ;;  %583 = vmax.xlane.f32.xlu2 %v582_v47 }
 0x19e   :  { %3478 = vpow2.f32 %v272_v45 }
 0x1a4   :  { %v3479_v48 = vpop.eup %3478 }
 0x1a5   :  { %v274_v49 = vsel %vm267_vm3, %v3479_v48, 0.0 }
 0x1a6   :  { %275 = vadd.xlane.f32.xlu0 %v274_v49 }
 0x1ac   :  { %v1146_v61 = vpop.permute.xlu0 %1145 }
 0x1b4   :  { %527 = vrot.lane.b32.xlu2 %v3994_v18, %s3810_s23 }
 0x1ba   :  { %1224 = vrot.lane.b32.xlu0 %v3966_v16, %s3812_s25  ;;  %v736_v50 = vpop.f32.mrf.mxu1 }
 0x1bb   :  { %v4068_v56 = vsel %vm265_vm2, -1e+20, %v736_v50 }
 0x1bc   :  { %685 = vrot.lane.b32.xlu2 %v3994_v18, %s3813_s26  ;;  %v740_v57 = vsel %vm267_vm3, %v4068_v56, -inf }
 0x1c2   :  { %1301 = vrot.lane.b32.xlu0 %v3976_v17, %s3813_s26  ;;  %v932_v51 = vpop.f32.mrf.mxu1 }
 0x1c3   :  { %v936_v22 = vsel %vm935_vm4, -1e+20, %v932_v51 }
 0x1ca   :  { %1380 = vrot.lane.b32.xlu0 %v3976_v17, %s3814_s1  ;;  %v1089_v53 = vpop.f32.mrf.mxu1  ;;  %v370_v17 = vpop.permute.xlu1 %369 }
 0x1cb   :  { %v4062_v54 = vsel %vm935_vm4, -1e+20, %v1089_v53  ;;  %390 = vmatpush.msrb.mxu0 %v370_v17 }
 0x1cc   :  { %v1093_v55 = vsel %vm267_vm3, %v4062_v54, -inf }
 0x1cd   :  { %1094 = vmax.xlane.f32.xlu1 %v1093_v55 }
 0x1e5   :  { %741 = vmax.xlane.f32.xlu2 %v740_v57 }
 0x1f4   :  { %425 = vmax.xlane.f32.xlu0 %v424_v59 }
 0x208   :  { %448 = vrot.lane.b32.xlu0 %v3994_v18, %s3808_s8 }
 0x20f   :  { %v584_v13 = vpop.xlane.xlu2 %583 }
 0x210   :  { %606 = vrot.lane.b32.xlu0 %v3994_v18, %s3812_s25 }
 0x217   :  { %v528_v19 = vpop.permute.xlu2 %527 }
 0x218   :  { %548 = vmatpush.msra.mxu0 %v528_v19 }
 0x219   :  { %v276_v0 = vpop.xlane.xlu0 %275 }
 0x21a   :  { %3480 = vrcp.f32 %v276_v0  ;;  %v288_v6 = vand.u32 2147483648, %v276_v0  ;;  %v286_v8 = vand.u32 2147483647, %v276_v0  ;;  %vm282_vm6 = vweird.f32 %v276_v0 }
 0x21c   :  { %v289_v10 = vor.u32 1.1754944e-38, %v288_v6  ;;  %vm287_vm8 = vcmp.eq.f32.partialorder %v286_v8, 8.507059e+37 }
 0x21f   :  { %v4120_v36 = vpop.permute.xlu2 %685 }
 0x220   :  { %v3481_v1 = vpop.eup %3480 }
 0x221   :  { %v278_v3 = vmul.f32 %v3481_v1, %v276_v0  ;;  %vm283_vm5 = vweird.f32 %v3481_v1 }
 0x222   :  { %vm284_vm7 = vmor %vm282_vm6, %vm283_vm5 }
 0x223   :  { %v279_v5 = vsub.f32 1.0, %v278_v3 }
 0x225   :  { %v280_v7 = vmul.f32 %v3481_v1, %v279_v5 }
 0x227   :  { %v281_v9 = vadd.f32 %v3481_v1, %v280_v7 }
 0x229   :  { %v285_v12 = vsel %vm284_vm7, %v3481_v1, %v281_v9 }
 0x22a   :  { %v290_v14 = vsel %vm287_vm8, %v289_v10, %v285_v12 }
 0x22b   :  { %v291_v15 = vmul.f32 %v3479_v48, %v290_v14 }
 0x22c   :  { %v1225_v16 = vpop.permute.xlu0 %1224 }
 0x22d   :  { %3335 = vmatmul.msk.f32.vlgmr.msra.gmra.mxu3 %vm267_vm3, %v291_v15  ;;  %3369 = vmatpush.xpose.msk.msrb.mxu1 %vm238_vm1, %v1225_v16 }
 0x22e   :  { %3342 = vmatpush.xpose.msk.msra.mxu3 %vm238_vm1, %v4002_v20  ;;  %v937_v20 = vsel %vm267_vm3, %v936_v22, -inf }
 0x230   :  { %3370 = vmatmul.msk.f32.vlgmr.msrb.gmra.mxu1 %vm238_vm1, %v1223_v63 }
 0x231   :  { %3375 = vmatpush.xpose.msk.msra.mxu1 %vm238_vm1, %v1383_v2 }
 0x234   :  { %v1302_v21 = vpop.permute.xlu0 %1301 }
 0x235   :  { %3337 = vmatmul.msk.f32.vlgmr.msrb.gmra.mxu3 %vm238_vm1, %v4007_v26  ;;  %v585_v26 = vsub.f32 %v4042_v46, %v584_v13 }
 0x236   :  { %3348 = vmatpush.xpose.msk.msrb.mxu3 %vm238_vm1, %v4021_v32 }
 0x237   :  { %v586_v29 = vmul.f32 1.442695, %v585_v26 }
 0x23a   :  { %938 = vmax.xlane.f32.xlu0 %v937_v20 }
 0x23c   :  { %v1381_v23 = vpop.permute.xlu0 %1380 }
 0x23d   :  { %3343 = vmatmul.msk.f32.vlgmr.msra.gmra.mxu3 %vm238_vm1, %v4018_v30  ;;  %3376 = vmatmul.msk.f32.vlgmr.msra.gmra.mxu1 %vm238_vm1, %v1381_v23 }
 0x23e   :  { %3354 = vmatpush.xpose.msk.msra.mxu3 %vm238_vm1, %v4036_v39 }
 0x240   :  { %v1095_v45 = vpop.xlane.xlu1 %1094 }
 0x241   :  { %v1096_v48 = vsub.f32 %v4062_v54, %v1095_v45 }
 0x243   :  { %v1097_v50 = vmul.f32 1.442695, %v1096_v48 }
 0x245   :  { %3349 = vmatmul.msk.f32.vlgmr.msrb.gmra.mxu3 %vm238_vm1, %v4023_v33 }
 0x246   :  { %3360 = vmatpush.xpose.msk.msrb.mxu3 %vm238_vm1, %v4038_v40 }
 0x24d   :  { %3355 = vmatmul.msk.f32.vlgmr.msra.gmra.mxu3 %vm238_vm1, %v4025_v34 }
 0x24e   :  { %3366 = vmatpush.xpose.msk.msra.mxu3 %vm238_vm1, %v1146_v61 }
 0x255   :  { %3361 = vmatmul.msk.f32.vlgmr.msrb.gmra.mxu3 %vm238_vm1, %v4031_v37 }
 0x256   :  { %3372 = vmatpush.xpose.msk.msrb.mxu3 %vm238_vm1, %v1304_v62 }
 0x258   :  { %v742_v37 = vpop.xlane.xlu2 %741 }
 0x259   :  { %v743_v38 = vsub.f32 %v4068_v56, %v742_v37 }
 0x25b   :  { %v744_v39 = vmul.f32 1.442695, %v743_v38 }
 0x25d   :  { %3367 = vmatmul.msk.f32.vlgmr.msra.gmra.mxu3 %vm238_vm1, %v1144_v60 }
 0x25e   :  { %3378 = vmatpush.xpose.msk.msra.mxu3 %vm238_vm1, %v1462_v4 }
 0x265   :  { %3373 = vmatmul.msk.f32.vlgmr.msrb.gmra.mxu3 %vm238_vm1, %v1302_v21 }
 0x267   :  { %v426_v24 = vpop.xlane.xlu0 %425 }
 0x268   :  { %v427_v25 = vsub.f32 %v423_v58, %v426_v24 }
 0x26a   :  { %v428_v28 = vmul.f32 1.442695, %v427_v25 }
 0x26c   :  { %3482 = vpow2.f32 %v428_v28 }
 0x26d   :  { %3379 = vmatmul.msk.f32.vlgmr.msra.gmra.mxu3 %vm238_vm1, %v1460_v11  ;;  %3484 = vpow2.f32 %v586_v29 }
 0x26e   :  { %3486 = vpow2.f32 %v744_v39 }
 0x272   :  { %v4112_v30 = vpop.eup %3482 }
 0x273   :  { %v430_v31 = vsel %vm267_vm3, %v4112_v30, 0.0  ;;  %v4116_v32 = vpop.eup %3484 }
 0x274   :  { %431 = vadd.xlane.f32.xlu1 %v430_v31  ;;  %v588_v34 = vsel %vm267_vm3, %v4116_v32, 0.0  ;;  %v4132_v49 = vpop.eup %3486 }
 0x275   :  { %v746_v51 = vsel %vm267_vm3, %v4132_v49, 0.0 }
 0x27a   :  { %v449_v33 = vpop.permute.xlu0 %448 }
 0x27b   :  { %469 = vmatpush.msrb.mxu2 %v449_v33 }
 0x27c   :  { %589 = vadd.xlane.f32.xlu1 %v588_v34 }
 0x282   :  { %v607_v35 = vpop.permute.xlu0 %606 }
 0x283   :  { %627 = vmatpush.msra.mxu2 %v607_v35 }
 0x2ad   :  { %v1247_v40 = vpop.f32.mrf.mxu1  ;;  %v939_v41 = vpop.xlane.xlu0 %938 }
 0x2ae   :  { %v4125_v42 = vsel %vm935_vm4, -1e+20, %v1247_v40  ;;  %v940_v43 = vsub.f32 %v936_v22, %v939_v41 }
 0x2af   :  { %v1251_v44 = vsel %vm267_vm3, %v4125_v42, -inf }
 0x2b0   :  { %v4129_v46 = vpop.f32.mrf.mxu3  ;;  %1252 = vmax.xlane.f32.xlu2 %v1251_v44  ;;  %v941_v47 = vmul.f32 1.442695, %v940_v43 }
 0x2b2   :  { %3488 = vpow2.f32 %v941_v47 }
 0x2b3   :  { %3490 = vpow2.f32 %v1097_v50 }
 0x2b8   :  { %v340_v53 = vpop.f32.mrf.mxu3  ;;  %747 = vadd.xlane.f32.xlu2 %v746_v51  ;;  %v4140_v57 = vpop.eup %3488 }
 0x2b9   :  { %v943_v58 = vsel %vm267_vm3, %v4140_v57, 0.0  ;;  %v4146_v60 = vpop.eup %3490  ;;  %v4156_v63 = vsel %vm265_vm2, -1e+20, %v340_v53 }
 0x2ba   :  { %v1405_v55 = vpop.f32.mrf.mxu1  ;;  %v1099_v0 = vsel %vm267_vm3, %v4146_v60, 0.0  ;;  %v344_v1 = vsel %vm267_vm3, %v4156_v63, -inf }
 0x2bb   :  { %v4138_v56 = vsel %vm935_vm4, -1e+20, %v1405_v55 }
 0x2bc   :  { %v1409_v54 = vsel %vm267_vm3, %v4138_v56, -inf }
 0x2bd   :  { %1410 = vmax.xlane.f32.xlu0 %v1409_v54 }
 0x2c0   :  { %v499_v59 = vpop.f32.mrf.mxu3  ;;  %944 = vadd.xlane.f32.xlu2 %v943_v58 }
 0x2c1   :  { %v4150_v61 = vsel %vm265_vm2, -1e+20, %v499_v59 }
 0x2c2   :  { %v503_v62 = vsel %vm267_vm3, %v4150_v61, -inf }
 0x2c3   :  { %504 = vmax.xlane.f32.xlu1 %v503_v62 }
 0x2c5   :  { %1100 = vadd.xlane.f32.xlu0 %v1099_v0 }
 0x2c8   :  { %v657_v2 = vpop.f32.mrf.mxu3  ;;  %345 = vmax.xlane.f32.xlu2 %v344_v1 }
 0x2c9   :  { %v4164_v3 = vsel %vm265_vm2, -1e+20, %v657_v2 }
 0x2ca   :  { %v661_v4 = vsel %vm267_vm3, %v4164_v3, -inf }
 0x2cd   :  { %662 = vmax.xlane.f32.xlu0 %v661_v4 }
 0x2d0   :  { %v815_v5 = vpop.f32.mrf.mxu3 }
 0x2d1   :  { %v4170_v6 = vsel %vm265_vm2, -1e+20, %v815_v5 }
 0x2d2   :  { %v819_v7 = vsel %vm267_vm3, %v4170_v6, -inf }
 0x2d3   :  { %820 = vmax.xlane.f32.xlu1 %v819_v7 }
 0x2d8   :  { %v1009_v8 = vpop.f32.mrf.mxu3 }
 0x2d9   :  { %v4176_v9 = vsel %vm935_vm4, -1e+20, %v1009_v8 }
 0x2da   :  { %v1013_v10 = vsel %vm267_vm3, %v4176_v9, -inf }
 0x2db   :  { %1014 = vmax.xlane.f32.xlu2 %v1013_v10 }
 0x2e0   :  { %v1168_v24 = vpop.f32.mrf.mxu3 }
 0x2e1   :  { %843 = vrot.lane.b32.xlu0 %v3994_v18, %s3811_s24 }
 0x2e7   :  { %v432_v11 = vpop.xlane.xlu1 %431 }
 0x2e8   :  { %3492 = vrcp.f32 %v432_v11  ;;  %v444_v15 = vand.u32 2147483648, %v432_v11  ;;  %v442_v17 = vand.u32 2147483647, %v432_v11  ;;  %vm438_vm10 = vweird.f32 %v432_v11  ;;  %v1326_v39 = vpop.f32.mrf.mxu3 }
 0x2ea   :  { %v445_v22 = vor.u32 1.1754944e-38, %v444_v15  ;;  %vm443_vm12 = vcmp.eq.f32.partialorder %v442_v17, 8.507059e+37 }
 0x2ee   :  { %v3493_v27 = vpop.eup %3492 }
 0x2ef   :  { %v434_v12 = vmul.f32 %v3493_v27, %v432_v11  ;;  %v590_v13 = vpop.xlane.xlu1 %589  ;;  %vm439_vm9 = vweird.f32 %v3493_v27  ;;  %v4220_v11 = vsel %vm935_vm4, -1e+20, %v1326_v39 }
 0x2f0   :  { %3494 = vrcp.f32 %v590_v13  ;;  %vm440_vm11 = vmor %vm438_vm10, %vm439_vm9  ;;  %v602_v29 = vand.u32 2147483648, %v590_v13  ;;  %v600_v33 = vand.u32 2147483647, %v590_v13  ;;  %vm596_vm14 = vweird.f32 %v590_v13  ;;  %v1484_v41 = vpop.f32.mrf.mxu3 }
 0x2f1   :  { %v435_v14 = vsub.f32 1.0, %v434_v12  ;;  %v4196_v43 = vsel %vm935_vm4, -1e+20, %v1484_v41  ;;  %v4244_v41 = vpop.f32.mrf.mxu2 }
 0x2f2   :  { %v603_v34 = vor.u32 1.1754944e-38, %v602_v29  ;;  %vm601_vm2 = vcmp.eq.f32.partialorder %v600_v33, 8.507059e+37  ;;  %v1488_v44 = vsel %vm267_vm3, %v4196_v43, -inf }
 0x2f3   :  { %v436_v16 = vmul.f32 %v3493_v27, %v435_v14  ;;  %764 = vrot.lane.b32.xlu2 %v3994_v18, %s3814_s1 }
 0x2f5   :  { %v437_v19 = vadd.f32 %v3493_v27, %v436_v16 }
 0x2f6   :  { %v3495_v21 = vpop.eup %3494 }
 0x2f7   :  { %v592_v20 = vmul.f32 %v3495_v21, %v590_v13  ;;  %v441_v23 = vsel %vm440_vm11, %v3493_v27, %v437_v19  ;;  %vm597_vm13 = vweird.f32 %v3495_v21 }
 0x2f8   :  { %v446_v25 = vsel %vm443_vm12, %v445_v22, %v441_v23  ;;  %vm598_vm15 = vmor %vm596_vm14, %vm597_vm13 }
 0x2f9   :  { %v593_v26 = vsub.f32 1.0, %v592_v20  ;;  %v447_v28 = vmul.f32 %v4112_v30, %v446_v25  ;;  %v4190_v30 = vsel %vm935_vm4, -1e+20, %v1168_v24 }
 0x2fa   :  { %v1172_v40 = vsel %vm267_vm3, %v4190_v30, -inf }
 0x2fb   :  { %v594_v31 = vmul.f32 %v3495_v21, %v593_v26  ;;  %3341 = vmatmul.msk.f32.vlgmr.msrb.gmra.mxu2 %vm267_vm3, %v447_v28 }
 0x2fd   :  { %v595_v18 = vadd.f32 %v3495_v21, %v594_v31 }
 0x2ff   :  { %v599_v35 = vsel %vm598_vm15, %v3495_v21, %v595_v18 }
 0x300   :  { %v604_v37 = vsel %vm601_vm2, %v603_v34, %v599_v35 }
 0x301   :  { %v605_v38 = vmul.f32 %v4116_v32, %v604_v37 }
 0x303   :  { %3347 = vmatmul.msk.f32.vlgmr.msra.gmra.mxu2 %vm267_vm3, %v605_v38 }
 0x30b   :  { %1173 = vmax.xlane.f32.xlu0 %v1172_v40 }
 0x313   :  { %1489 = vmax.xlane.f32.xlu0 %v1488_v44 }
 0x323   :  { %v1253_v32 = vpop.xlane.xlu2 %1252 }
 0x324   :  { %v1254_v45 = vsub.f32 %v4125_v42, %v1253_v32 }
 0x326   :  { %v1255_v47 = vmul.f32 1.442695, %v1254_v45 }
 0x328   :  { %3496 = vpow2.f32 %v1255_v47 }
 0x32b   :  { %v748_v48 = vpop.xlane.xlu2 %747 }
 0x32c   :  { %v760_v25 = vand.u32 2147483648, %v748_v48  ;;  %vm754_vm5 = vweird.f32 %v748_v48 }
 0x32e   :  { %v4201_v50 = vpop.eup %3496  ;;  %v761_v33 = vor.u32 1.1754944e-38, %v760_v25 }
 0x32f   :  { %v1257_v51 = vsel %vm267_vm3, %v4201_v50, 0.0 }
 0x330   :  { %1258 = vadd.xlane.f32.xlu1 %v1257_v51  ;;  %v1411_v53 = vpop.xlane.xlu0 %1410 }
 0x331   :  { %v1412_v55 = vsub.f32 %v4138_v56, %v1411_v53 }
 0x333   :  { %v1413_v54 = vmul.f32 1.442695, %v1412_v55  ;;  %v4206_v58 = vpop.xlane.xlu2 %944 }
 0x334   :  { %v957_v37 = vand.u32 2147483648, %v4206_v58  ;;  %vm951_vm9 = vweird.f32 %v4206_v58  ;;  %v955_v38 = vand.u32 2147483647, %v4206_v58 }
 0x335   :  { %3498 = vpow2.f32 %v1413_v54 }
 0x336   :  { %3500 = vrcp.f32 %v748_v48  ;;  %v505_v62 = vpop.xlane.xlu1 %504  ;;  %v958_v45 = vor.u32 1.1754944e-38, %v957_v37  ;;  %vm956_vm11 = vcmp.eq.f32.partialorder %v955_v38, 8.507059e+37 }
 0x337   :  { %v506_v5 = vsub.f32 %v4150_v61, %v505_v62  ;;  %3502 = vrcp.f32 %v4206_v58  ;;  %v1330_v61 = vsel %vm267_vm3, %v4220_v11, -inf }
 0x338   :  { %v4208_v59 = vpop.xlane.xlu0 %1100 }
 0x339   :  { %vm1107_vm15 = vweird.f32 %v4208_v59 }
 0x33b   :  { %v4210_v42 = vpop.eup %3498  ;;  %v346_v0 = vpop.xlane.xlu2 %345 }
 0x33c   :  { %v347_v1 = vsub.f32 %v4156_v63, %v346_v0  ;;  %v3501_v2 = vpop.eup %3500  ;;  %v1415_v4 = vsel %vm267_vm3, %v4210_v42, 0.0  ;;  %v507_v63 = vmul.f32 1.442695, %v506_v5 }
 0x33d   :  { %1416 = vadd.xlane.f32.xlu1 %v1415_v4  ;;  %v750_v7 = vmul.f32 %v3501_v2, %v748_v48  ;;  %v3503_v13 = vpop.eup %3502  ;;  %vm755_vm4 = vweird.f32 %v3501_v2 }
 0x33e   :  { %v348_v56 = vmul.f32 1.442695, %v347_v1  ;;  %v947_v17 = vmul.f32 %v3503_v13, %v4206_v58  ;;  %vm756_vm6 = vmor %vm754_vm5, %vm755_vm4  ;;  %vm952_vm8 = vweird.f32 %v3503_v13 }
 0x33f   :  { %v751_v12 = vsub.f32 1.0, %v750_v7  ;;  %vm953_vm10 = vmor %vm951_vm9, %vm952_vm8 }
 0x340   :  { %3504 = vpow2.f32 %v348_v56  ;;  %v663_v8 = vpop.xlane.xlu0 %662  ;;  %v948_v23 = vsub.f32 1.0, %v947_v17 }
 0x341   :  { %v664_v10 = vsub.f32 %v4164_v3, %v663_v8  ;;  %v752_v3 = vmul.f32 %v3501_v2, %v751_v12 }
 0x342   :  { %v949_v31 = vmul.f32 %v3503_v13, %v948_v23 }
 0x343   :  { %v665_v27 = vmul.f32 1.442695, %v664_v10  ;;  %v753_v20 = vadd.f32 %v3501_v2, %v752_v3 }
 0x344   :  { %v950_v35 = vadd.f32 %v3503_v13, %v949_v31  ;;  %v1113_v31 = vand.u32 2147483648, %v4208_v59 }
 0x345   :  { %3506 = vpow2.f32 %v665_v27  ;;  %1331 = vmax.xlane.f32.xlu1 %v1330_v61  ;;  %v757_v29 = vsel %vm756_vm6, %v3501_v2, %v753_v20 }
 0x346   :  { %v4224_v14 = vpop.eup %3504  ;;  %3508 = vpow2.f32 %v507_v63  ;;  %v821_v15 = vpop.xlane.xlu1 %820  ;;  %v954_v32 = vsel %vm953_vm10, %v3503_v13, %v950_v35 }
 0x347   :  { %v822_v16 = vsub.f32 %v4170_v6, %v821_v15  ;;  %v350_v52 = vsel %vm267_vm3, %v4224_v14, 0.0  ;;  %v758_v6 = vand.u32 2147483647, %v748_v48  ;;  %v959_v47 = vsel %vm956_vm11, %v958_v45, %v954_v32 }
 0x348   :  { %351 = vadd.xlane.f32.xlu2 %v350_v52  ;;  %v960_v48 = vmul.f32 %v4140_v57, %v959_v47  ;;  %v1114_v45 = vor.u32 1.1754944e-38, %v1113_v31 }
 0x349   :  { %v823_v19 = vmul.f32 1.442695, %v822_v16  ;;  %vm759_vm7 = vcmp.eq.f32.partialorder %v758_v6, 8.507059e+37 }
 0x34a   :  { %v762_v18 = vsel %vm759_vm7, %v761_v33, %v757_v29  ;;  %v1111_v33 = vand.u32 2147483647, %v4208_v59 }
 0x34b   :  { %v4230_v21 = vpop.eup %3506  ;;  %3510 = vpow2.f32 %v823_v19  ;;  %v763_v40 = vmul.f32 %v4132_v49, %v762_v18 }
 0x34c   :  { %v4232_v22 = vpop.eup %3508  ;;  %v667_v24 = vsel %vm267_vm3, %v4230_v21, 0.0  ;;  %vm1112_vm6 = vcmp.eq.f32.partialorder %v1111_v33, 8.507059e+37 }
 0x34d   :  { %668 = vadd.xlane.f32.xlu0 %v667_v24  ;;  %v509_v28 = vsel %vm267_vm3, %v4232_v22, 0.0 }
 0x34e   :  { %v1015_v26 = vpop.xlane.xlu2 %1014 }
 0x34f   :  { %v1016_v51 = vsub.f32 %v4176_v9, %v1015_v26 }
 0x350   :  { %510 = vadd.xlane.f32.xlu2 %v509_v28 }
 0x351   :  { %v4238_v34 = vpop.eup %3510  ;;  %v1017_v53 = vmul.f32 1.442695, %v1016_v51 }
 0x352   :  { %v825_v44 = vsel %vm267_vm3, %v4238_v34, 0.0 }
 0x353   :  { %v4256_v49 = vpop.permute.xlu0 %843  ;;  %3512 = vpow2.f32 %v1017_v53 }
 0x356   :  { %v765_v39 = vpop.permute.xlu2 %764 }
 0x357   :  { %785 = vmatpush.msrb.mxu2 %v765_v39 }
 0x358   :  { %826 = vadd.xlane.f32.xlu2 %v825_v44  ;;  %3353 = vmatmul.msk.f32.vlgmr.msrb.gmra.mxu2 %vm267_vm3, %v763_v40 }
 0x359   :  { %979 = vmatpush.msra.mxu2 %v4244_v41  ;;  %v4260_v57 = vpop.eup %3512 }
 0x35a   :  { %v1019_v1 = vsel %vm267_vm3, %v4260_v57, 0.0 }
 0x35e   :  { %1038 = vrot.lane.b32.xlu1 %v4244_v41, %s3809_s20 }
 0x360   :  { %3359 = vmatmul.msk.f32.vlgmr.msra.gmra.mxu2 %vm267_vm3, %v960_v48 }
 0x361   :  { %1117 = vrot.lane.b32.xlu0 %v4244_v41, %s3808_s8 }
 0x37e   :  { %v1174_v55 = vpop.xlane.xlu0 %1173 }
 0x37f   :  { %v1175_v54 = vsub.f32 %v4190_v30, %v1174_v55 }
 0x381   :  { %v1176_v58 = vmul.f32 1.442695, %v1175_v54 }
 0x383   :  { %3514 = vpow2.f32 %v1176_v58 }
 0x386   :  { %v1490_v62 = vpop.xlane.xlu0 %1489 }
 0x387   :  { %v1491_v0 = vsub.f32 %v4196_v43, %v1490_v62 }
 0x388   :  { %1020 = vadd.xlane.f32.xlu1 %v1019_v1 }
 0x389   :  { %v4265_v2 = vpop.eup %3514  ;;  %v1492_v4 = vmul.f32 1.442695, %v1491_v0 }
 0x38a   :  { %v1178_v9 = vsel %vm267_vm3, %v4265_v2, 0.0 }
 0x38b   :  { %3516 = vpow2.f32 %v1492_v4  ;;  %1179 = vadd.xlane.f32.xlu2 %v1178_v9 }
 0x38c   :  { %3518 = vrcp.f32 %v4208_v59 }
 0x391   :  { %v4269_v30 = vpop.eup %3516 }
 0x392   :  { %v1494_v5 = vsel %vm267_vm3, %v4269_v30, 0.0  ;;  %v3519_v8 = vpop.eup %3518 }
 0x393   :  { %1495 = vadd.xlane.f32.xlu0 %v1494_v5  ;;  %v1103_v12 = vmul.f32 %v3519_v8, %v4208_v59  ;;  %vm1108_vm13 = vweird.f32 %v3519_v8 }
 0x394   :  { %vm1109_vm4 = vmor %vm1107_vm15, %vm1108_vm13 }
 0x395   :  { %v1104_v61 = vsub.f32 1.0, %v1103_v12 }
 0x397   :  { %v1105_v17 = vmul.f32 %v3519_v8, %v1104_v61 }
 0x399   :  { %v1106_v26 = vadd.f32 %v3519_v8, %v1105_v17 }
 0x39b   :  { %v1110_v40 = vsel %vm1109_vm4, %v3519_v8, %v1106_v26 }
 0x39c   :  { %v1115_v59 = vsel %vm1112_vm6, %v1114_v45, %v1110_v40 }
 0x39d   :  { %v1116_v4 = vmul.f32 %v4146_v60, %v1115_v59 }
 0x3a3   :  { %1196 = vrot.lane.b32.xlu2 %v4244_v41, %s3810_s23  ;;  %v4275_v43 = vpop.xlane.xlu1 %1258 }
 0x3ab   :  { %1433 = vrot.lane.b32.xlu2 %v4244_v41, %s3814_s1 }
 0x3b0   :  { %v4279_v56 = vpop.xlane.xlu1 %1416 }
 0x3b8   :  { %v1332_v7 = vpop.xlane.xlu1 %1331 }
 0x3b9   :  { %v1333_v10 = vsub.f32 %v4220_v11, %v1332_v7 }
 0x3bb   :  { %v352_v63 = vpop.xlane.xlu2 %351  ;;  %v1334_v27 = vmul.f32 1.442695, %v1333_v10 }
 0x3bc   :  { %3520 = vrcp.f32 %v352_v63  ;;  %v364_v24 = vand.u32 2147483648, %v352_v63  ;;  %v362_v25 = vand.u32 2147483647, %v352_v63  ;;  %vm358_vm14 = vweird.f32 %v352_v63 }
 0x3bd   :  { %3522 = vpow2.f32 %v1334_v27 }
 0x3be   :  { %v365_v18 = vor.u32 1.1754944e-38, %v364_v24  ;;  %vm363_vm5 = vcmp.eq.f32.partialorder %v362_v25, 8.507059e+37 }
 0x3c0   :  { %v4284_v13 = vpop.xlane.xlu0 %668 }
 0x3c1   :  { %3524 = vrcp.f32 %v4284_v13  ;;  %v681_v7 = vand.u32 2147483648, %v4284_v13  ;;  %v679_v10 = vand.u32 2147483647, %v4284_v13 }
 0x3c2   :  { %v3521_v15 = vpop.eup %3520 }
 0x3c3   :  { %v354_v16 = vmul.f32 %v3521_v15, %v352_v63  ;;  %v511_v52 = vpop.xlane.xlu2 %510  ;;  %v4287_v3 = vpop.eup %3522  ;;  %vm359_vm12 = vweird.f32 %v3521_v15  ;;  %v682_v27 = vor.u32 1.1754944e-38, %v681_v7 }
 0x3c4   :  { %3526 = vrcp.f32 %v511_v52  ;;  %v1336_v11 = vsel %vm267_vm3, %v4287_v3, 0.0  ;;  %vm360_vm2 = vmor %vm358_vm14, %vm359_vm12  ;;  %v523_v47 = vand.u32 2147483648, %v511_v52  ;;  %v521_v53 = vand.u32 2147483647, %v511_v52 }
 0x3c5   :  { %v355_v19 = vsub.f32 1.0, %v354_v16  ;;  %1337 = vadd.xlane.f32.xlu1 %v1336_v11  ;;  %vm517_vm8 = vweird.f32 %v511_v52  ;;  %vm675_vm12 = vweird.f32 %v4284_v13  ;;  %vm680_vm14 = vcmp.eq.f32.partialorder %v679_v10, 8.507059e+37 }
 0x3c6   :  { %v524_v62 = vor.u32 1.1754944e-38, %v523_v47  ;;  %vm522_vm10 = vcmp.eq.f32.partialorder %v521_v53, 8.507059e+37 }
 0x3c7   :  { %v4291_v20 = vpop.eup %3524  ;;  %v356_v23 = vmul.f32 %v3521_v15, %v355_v19 }
 0x3c8   :  { %v671_v6 = vmul.f32 %v4291_v20, %v4284_v13  ;;  %vm676_vm11 = vweird.f32 %v4291_v20 }
 0x3c9   :  { %v357_v28 = vadd.f32 %v3521_v15, %v356_v23  ;;  %vm677_vm13 = vmor %vm675_vm12, %vm676_vm11 }
 0x3ca   :  { %v3527_v29 = vpop.eup %3526  ;;  %v672_v39 = vsub.f32 1.0, %v671_v6 }
 0x3cb   :  { %v513_v35 = vmul.f32 %v3527_v29, %v511_v52  ;;  %v827_v37 = vpop.xlane.xlu2 %826  ;;  %v361_v38 = vsel %vm360_vm2, %v3521_v15, %v357_v28  ;;  %vm518_vm7 = vweird.f32 %v3527_v29 }
 0x3cc   :  { %3528 = vrcp.f32 %v827_v37  ;;  %v366_v32 = vsel %vm363_vm5, %v365_v18, %v361_v38  ;;  %v673_v55 = vmul.f32 %v4291_v20, %v672_v39  ;;  %vm519_vm9 = vmor %vm517_vm8, %vm518_vm7  ;;  %v839_v15 = vand.u32 2147483648, %v827_v37 }
 0x3cd   :  { %v514_v44 = vsub.f32 1.0, %v513_v35  ;;  %v367_v48 = vmul.f32 %v4224_v14, %v366_v32  ;;  %vm833_vm2 = vweird.f32 %v827_v37 }
 0x3ce   :  { %v674_v9 = vadd.f32 %v4291_v20, %v673_v55  ;;  %v840_v17 = vor.u32 1.1754944e-38, %v839_v15 }
 0x3cf   :  { %v515_v51 = vmul.f32 %v3527_v29, %v514_v44  ;;  %3338 = vmatmul.msk.f32.vlgmr.msrb.gmra.mxu0 %vm267_vm3, %v367_v48 }
 0x3d0   :  { %706 = vmatpush.msrb.mxu0 %v4120_v36  ;;  %v678_v60 = vsel %vm677_vm13, %v4291_v20, %v674_v9  ;;  %v1039_v52 = vpop.permute.xlu1 %1038 }
 0x3d1   :  { %v516_v54 = vadd.f32 %v3527_v29, %v515_v51  ;;  %v683_v12 = vsel %vm680_vm14, %v682_v27, %v678_v60 }
 0x3d2   :  { %v3529_v58 = vpop.eup %3528  ;;  %v684_v16 = vmul.f32 %v4230_v21, %v683_v12  ;;  %v471_v21 = vpop.f32.mrf.mxu2 }
 0x3d3   :  { %v520_v0 = vsel %vm519_vm9, %v3527_v29, %v516_v54  ;;  %v829_v1 = vmul.f32 %v3529_v58, %v827_v37  ;;  %v1118_v14 = vpop.permute.xlu0 %1117  ;;  %vm834_vm15 = vweird.f32 %v3529_v58 }
 0x3d4   :  { %v525_v5 = vsel %vm522_vm10, %v524_v62, %v520_v0  ;;  %1138 = vmatpush.msrb.mxu2 %v1118_v14  ;;  %vm835_vm4 = vmor %vm833_vm2, %vm834_vm15  ;;  %vm1265_vm15 = vweird.f32 %v4275_v43 }
 0x3d5   :  { %v830_v8 = vsub.f32 1.0, %v829_v1  ;;  %3365 = vmatmul.msk.f32.vlgmr.msrb.gmra.mxu2 %vm267_vm3, %v1116_v4  ;;  %v526_v36 = vmul.f32 %v4232_v22, %v525_v5  ;;  %v837_v22 = vand.u32 2147483647, %v827_v37 }
 0x3d7   :  { %v831_v63 = vmul.f32 %v3529_v58, %v830_v8  ;;  %3344 = vmatmul.msk.f32.vlgmr.msra.gmra.mxu0 %vm267_vm3, %v526_v36  ;;  %vm838_vm5 = vcmp.eq.f32.partialorder %v837_v22, 8.507059e+37  ;;  %v1271_v8 = vand.u32 2147483648, %v4275_v43  ;;  %v1269_v36 = vand.u32 2147483647, %v4275_v43 }
 0x3d8   :  { %864 = vmatpush.msra.mxu0 %v4256_v49 }
 0x3d9   :  { %v832_v61 = vadd.f32 %v3529_v58, %v831_v63  ;;  %v1272_v12 = vor.u32 1.1754944e-38, %v1271_v8 }
 0x3da   :  { %v629_v14 = vpop.f32.mrf.mxu2 }
 0x3db   :  { %v836_v13 = vsel %vm835_vm4, %v3529_v58, %v832_v61  ;;  %vm1270_vm4 = vcmp.eq.f32.partialorder %v1269_v36, 8.507059e+37 }
 0x3dc   :  { %v841_v49 = vsel %vm838_vm5, %v840_v17, %v836_v13 }
 0x3dd   :  { %v842_v19 = vmul.f32 %v4238_v34, %v841_v49 }
 0x3de   :  { %1275 = vrot.lane.b32.xlu1 %v4244_v41, %s3812_s25 }
 0x3df   :  { %3350 = vmatmul.msk.f32.vlgmr.msrb.gmra.mxu0 %vm267_vm3, %v684_v16 }
 0x3e0   :  { %1059 = vmatpush.msrb.mxu0 %v1039_v52  ;;  %v1429_v52 = vand.u32 2147483648, %v4279_v56 }
 0x3e2   :  { %v4342_v61 = vpop.f32.mrf.mxu2 }
 0x3e6   :  { %1354 = vrot.lane.b32.xlu1 %v4244_v41, %s3813_s26 }
 0x3e7   :  { %3356 = vmatmul.msk.f32.vlgmr.msra.gmra.mxu0 %vm267_vm3, %v842_v19  ;;  %v1427_v19 = vand.u32 2147483647, %v4279_v56 }
 0x3ee   :  { %1512 = vrot.lane.b32.xlu1 %v4244_v41, %s3811_s24 }
 0x3f6   :  { %874 = vrot.lane.b32.xlu1 %v471_v21, %s3802_s22 }
 0x3fb   :  { %v1021_v11 = vpop.xlane.xlu1 %1020 }
 0x3fc   :  { %3530 = vrcp.f32 %v1021_v11  ;;  %v1033_v28 = vand.u32 2147483648, %v1021_v11  ;;  %v1031_v31 = vand.u32 2147483647, %v1021_v11  ;;  %vm1027_vm7 = vweird.f32 %v1021_v11 }
 0x3fe   :  { %v1180_v20 = vpop.xlane.xlu2 %1179  ;;  %v1034_v35 = vor.u32 1.1754944e-38, %v1033_v28  ;;  %vm1032_vm9 = vcmp.eq.f32.partialorder %v1031_v31, 8.507059e+37 }
 0x3ff   :  { %3532 = vrcp.f32 %v1180_v20  ;;  %v1192_v40 = vand.u32 2147483648, %v1180_v20  ;;  %vm1186_vm11 = vweird.f32 %v1180_v20  ;;  %v1190_v44 = vand.u32 2147483647, %v1180_v20 }
 0x400   :  { %3534 = vrcp.f32 %v4275_v43 }
 0x401   :  { %v1193_v47 = vor.u32 1.1754944e-38, %v1192_v40  ;;  %vm1191_vm13 = vcmp.eq.f32.partialorder %v1190_v44, 8.507059e+37  ;;  %3536 = vrcp.f32 %v4279_v56 }
 0x402   :  { %v3531_v23 = vpop.eup %3530 }
 0x403   :  { %v1023_v24 = vmul.f32 %v3531_v23, %v1021_v11  ;;  %vm1028_vm6 = vweird.f32 %v3531_v23 }
 0x404   :  { %vm1029_vm8 = vmor %vm1027_vm7, %vm1028_vm6  ;;  %vm1423_vm7 = vweird.f32 %v4279_v56 }
 0x405   :  { %v3533_v25 = vpop.eup %3532  ;;  %v1024_v6 = vsub.f32 1.0, %v1023_v24  ;;  %v1670_v24 = vld [vmem:[#allocation10 + $0x18] sm:$0xff] }
 0x406   :  { %v1182_v34 = vmul.f32 %v3533_v25, %v1180_v20  ;;  %v1197_v26 = vpop.permute.xlu2 %1196  ;;  %vm1187_vm10 = vweird.f32 %v3533_v25  ;;  %v3535_v53 = vpop.eup %3534 }
 0x407   :  { %1217 = vmatpush.msra.mxu0 %v1197_v26  ;;  %v1025_v29 = vmul.f32 %v3531_v23, %v1024_v6  ;;  %vm1188_vm12 = vmor %vm1186_vm11, %vm1187_vm10  ;;  %v3537_v55 = vpop.eup %3536  ;;  %v4331_v58 = vpop.xlane.xlu0 %1495  ;;  %vm1266_vm14 = vweird.f32 %v3535_v53  ;;  %v1430_v26 = vor.u32 1.1754944e-38, %v1429_v52  ;;  %vm1428_vm11 = vcmp.eq.f32.partialorder %v1427_v19, 8.507059e+37 }
 0x408   :  { %v1183_v33 = vsub.f32 1.0, %v1182_v34  ;;  %vm1267_vm2 = vmor %vm1265_vm15, %vm1266_vm14  ;;  %vm1424_vm5 = vweird.f32 %v3537_v55  ;;  %vm1502_vm14 = vweird.f32 %v4331_v58 }
 0x409   :  { %v1026_v41 = vadd.f32 %v3531_v23, %v1025_v29 }
 0x40a   :  { %v1184_v18 = vmul.f32 %v3533_v25, %v1183_v33  ;;  %v4363_v33 = vpop.f32.mrf.mxu2 }
 0x40b   :  { %v1030_v37 = vsel %vm1029_vm8, %v3531_v23, %v1026_v41  ;;  %vm4347_vm8 = vmor %vm1423_vm7, %vm1424_vm5  ;;  %vm901_vm5 = vcmask 130048   ;;  %vm905_vm7 = vcmask 195584  }
 0x40c   :  { %v1185_v38 = vadd.f32 %v3533_v25, %v1184_v18  ;;  %v1035_v39 = vsel %vm1032_vm9, %v1034_v35, %v1030_v37  ;;  %v1668_v18 = vld [vmem:[#allocation10 + $0x8] sm:$0xff]  ;;  %v1508_v37 = vand.u32 2147483648, %v4331_v58 }
 0x40d   :  { %v1036_v32 = vmul.f32 %v4260_v57, %v1035_v39  ;;  %v1261_v57 = vmul.f32 %v3535_v53, %v4275_v43 }
 0x40e   :  { %v1189_v45 = vsel %vm1188_vm12, %v3533_v25, %v1185_v38  ;;  %v1434_v34 = vpop.permute.xlu2 %1433  ;;  %v1506_v38 = vand.u32 2147483647, %v4331_v58 }
 0x40f   :  { %3362 = vmatmul.msk.f32.vlgmr.msrb.gmra.mxu0 %vm267_vm3, %v1036_v32  ;;  %v1194_v48 = vsel %vm1191_vm13, %v1193_v47, %v1189_v45  ;;  %v1262_v54 = vsub.f32 1.0, %v1261_v57  ;;  %v1667_v32 = vld [vmem:[#allocation10] sm:$0xff]  ;;  %v1509_v47 = vor.u32 1.1754944e-38, %v1508_v37 }
 0x410   :  { %v1195_v51 = vmul.f32 %v4265_v2, %v1194_v48  ;;  %v1419_v2 = vmul.f32 %v3537_v55, %v4279_v56 }
 0x411   :  { %v1263_v0 = vmul.f32 %v3535_v53, %v1262_v54  ;;  %v1704_v54 = vld [vmem:[#allocation10 + $0x38] sm:$0xff] }
 0x412   :  { %v1420_v9 = vsub.f32 1.0, %v1419_v2  ;;  %v143_v2 = vld [vmem:[#allocation2 + $0x8] sm:$0xff] }
 0x413   :  { %v1264_v4 = vadd.f32 %v3535_v53, %v1263_v0  ;;  %v1701_v0 = vld [vmem:[#allocation10 + $0x20] sm:$0xff] }
 0x414   :  { %v1421_v60 = vmul.f32 %v3537_v55, %v1420_v9  ;;  %v3383_v9 = vld [vmem:[%s5032_s4 + $0x70] sm:$0xff] }
 0x415   :  { %v1268_v10 = vsel %vm1267_vm2, %v3535_v53, %v1264_v4  ;;  %vm1507_vm2 = vcmp.eq.f32.partialorder %v1506_v38, 8.507059e+37  ;;  %v3384_v4 = vld [vmem:[%s5032_s4 + $0x78] sm:$0xff]  ;;  %v4463_v38 = vld [vmem:[#allocation11] ss:$0 sm:$0xff] }
 0x416   :  { %v1273_v22 = vsel %vm1270_vm4, %v1272_v12, %v1268_v10  ;;  %v1422_v16 = vadd.f32 %v3537_v55, %v1421_v60  ;;  %1597 = vmatpush.msrb.mxu1 %v3384_v4  ;;  %vm899_vm4 = vcmask 97280  }
 0x417   :  { %3368 = vmatmul.msk.f32.vlgmr.msra.gmra.mxu0 %vm267_vm3, %v1195_v51  ;;  %v1274_v20 = vmul.f32 %v4201_v50, %v1273_v22  ;;  %v1669_v50 = vld [vmem:[#allocation10 + $0x10] sm:$0xff] }
 0x418   :  { %v1426_v25 = vsel %vm4347_vm8, %v3537_v55, %v1422_v16  ;;  %v145_v55 = vld [vmem:[#allocation5 + $0x8] sm:$0xff]  ;;  %1598 = vmatpush.msrb.mxu1 %v3383_v9  ;;  %vm907_vm8 = vcmask 228352  }
 0x419   :  { %v1431_v31 = vsel %vm1428_vm11, %v1430_v26, %v1426_v25 }
 0x41a   :  { %v1432_v44 = vmul.f32 %v4210_v42, %v1431_v31  ;;  %v144_v42 = vld [vmem:[#allocation5] sm:$0xff] }
 0x438   :  { %v1338_v59 = vpop.xlane.xlu1 %1337 }
 0x439   :  { %3538 = vrcp.f32 %v1338_v59  ;;  %v1350_v17 = vand.u32 2147483648, %v1338_v59  ;;  %vm1344_vm9 = vweird.f32 %v1338_v59  ;;  %v1348_v21 = vand.u32 2147483647, %v1338_v59 }
 0x43a   :  { %3540 = vrcp.f32 %v4331_v58 }
 0x43b   :  { %v1351_v28 = vor.u32 1.1754944e-38, %v1350_v17  ;;  %vm1349_vm12 = vcmp.eq.f32.partialorder %v1348_v21, 8.507059e+37 }
 0x43f   :  { %v3539_v62 = vpop.eup %3538 }
 0x440   :  { %v1340_v1 = vmul.f32 %v3539_v62, %v1338_v59  ;;  %v4335_v7 = vpop.eup %3540  ;;  %vm1345_vm6 = vweird.f32 %v3539_v62 }
 0x441   :  { %v1498_v63 = vmul.f32 %v4335_v7, %v4331_v58  ;;  %vm4353_vm10 = vmor %vm1344_vm9, %vm1345_vm6  ;;  %vm1503_vm13 = vweird.f32 %v4335_v7  ;;  %v1703_v58 = vld [vmem:[#allocation10 + $0x30] sm:$0xff]  ;;  %vm903_vm6 = vcmask 162816  }
 0x442   :  { %v1341_v5 = vsub.f32 1.0, %v1340_v1  ;;  %vm1504_vm15 = vmor %vm1502_vm14, %vm1503_vm13 }
 0x443   :  { %v1499_v13 = vsub.f32 1.0, %v1498_v63 }
 0x444   :  { %v1342_v27 = vmul.f32 %v3539_v62, %v1341_v5  ;;  %v3382_v5 = vld [vmem:[%s5032_s4 + $0x68] sm:$0xff] }
 0x445   :  { %v1500_v6 = vmul.f32 %v4335_v7, %v1499_v13  ;;  %1599 = vmatpush.msrb.mxu1 %v3382_v5 }
 0x446   :  { %v1343_v43 = vadd.f32 %v3539_v62, %v1342_v27 }
 0x447   :  { %v1501_v35 = vadd.f32 %v4335_v7, %v1500_v6 }
 0x448   :  { %v1347_v56 = vsel %vm4353_vm10, %v3539_v62, %v1343_v43  ;;  %v1702_v62 = vld [vmem:[#allocation10 + $0x28] sm:$0xff] }
 0x449   :  { %v1352_v41 = vsel %vm1349_vm12, %v1351_v28, %v1347_v56  ;;  %v1505_v45 = vsel %vm1504_vm15, %v4335_v7, %v1501_v35  ;;  %v3381_v7 = vld [vmem:[%s5032_s4 + $0x60] sm:$0xff] }
 0x44a   :  { %v1353_v40 = vmul.f32 %v4287_v3, %v1352_v41  ;;  %v1510_v51 = vsel %vm1507_vm2, %v1509_v47, %v1505_v45  ;;  %1600 = vmatpush.msrb.mxu1 %v3381_v7 }
 0x44b   :  { %v1511_v59 = vmul.f32 %v4269_v30, %v1510_v51  ;;  %v142_v30 = vld [vmem:[#allocation2] sm:$0xff] }
 0x44c   :  { %v392_v15 = vpop.f32.mrf.mxu0 }
 0x44d   :  { %870 = vrot.lane.b32.xlu2 %v392_v15, %s3815_s3 }
 0x450   :  { %v1276_v11 = vpop.permute.xlu1 %1275 }
 0x451   :  { %1296 = vmatpush.msra.mxu2 %v1276_v11 }
 0x452   :  { %3371 = vmatmul.msk.f32.vlgmr.msra.gmra.mxu2 %vm267_vm3, %v1274_v20 }
 0x453   :  { %1454 = vmatpush.msrb.mxu2 %v1434_v34 }
 0x454   :  { %v550_v29 = vpop.f32.mrf.mxu0 }
 0x455   :  { %1689 = vmatpush.msra.mxu2 %v1670_v24  ;;  %882 = vrot.lane.b32.xlu2 %v629_v14, %s3816_s27 }
 0x456   :  { %878 = vrot.lane.b32.xlu0 %v550_v29, %s3817_s28 }
 0x457   :  { %1690 = vmatpush.msra.mxu2 %v1669_v50 }
 0x458   :  { %v1355_v39 = vpop.permute.xlu1 %1354  ;;  %v1140_v53 = vpop.f32.mrf.mxu2 }
 0x459   :  { %1691 = vmatpush.msra.mxu2 %v1668_v18  ;;  %1375 = vmatpush.msrb.mxu0 %v1355_v39 }
 0x45a   :  { %3374 = vmatmul.msk.f32.vlgmr.msrb.gmra.mxu0 %vm267_vm3, %v1353_v40  ;;  %3377 = vmatmul.msk.f32.vlgmr.msrb.gmra.mxu2 %vm267_vm3, %v1432_v44  ;;  %v3620_v44 = vld [vmem:[#allocation7] sm:$0xff] }
 0x45b   :  { %1692 = vmatpush.msra.mxu2 %v1667_v32 }
 0x45c   :  { %v708_v48 = vpop.f32.mrf.mxu0 }
 0x45d   :  { %890 = vrot.lane.b32.xlu2 %v4342_v61, %s3818_s29  ;;  %886 = vrot.lane.b32.xlu1 %v708_v48, %s3819_s30 }
 0x45e   :  { %1543 = vrot.lane.b32.xlu0 %v1140_v53, %s3802_s22 }
 0x460   :  { %v1513_v3 = vpop.permute.xlu1 %1512 }
 0x461   :  { %1533 = vmatpush.msra.mxu0 %v1513_v3 }
 0x462   :  { %3380 = vmatmul.msk.f32.vlgmr.msra.gmra.mxu0 %vm267_vm3, %v1511_v59  ;;  %3387 = vmatmul.msk.f32.vlgmr.msra.gmra.mxu2 %vm152_vm0, %v144_v42 }
 0x463   :  { %1723 = vmatpush.msrb.mxu0 %v1704_v54 }
 0x464   :  { %v866_v57 = vpop.f32.mrf.mxu0 }
 0x465   :  { %894 = vrot.lane.b32.xlu1 %v866_v57, %s3820_s11  ;;  %1724 = vmatpush.msrb.mxu0 %v1703_v58 }
 0x467   :  { %1725 = vmatpush.msrb.mxu0 %v1702_v62 }
 0x468   :  { %v875_v36 = vpop.permute.xlu1 %874 }
 0x469   :  { %1726 = vmatpush.msrb.mxu0 %v1701_v0 }
 0x46a   :  { %3388 = vmatmul.msk.f32.gmra.mxu2 %vm152_vm0, %v145_v55  ;;  %3389 = vmatmul.msk.f32.vlgmr.msrb.gmra.mxu0 %vm152_vm0, %v142_v30 }
 0x472   :  { %3390 = vmatmul.msk.f32.gmra.mxu0 %vm152_vm0, %v143_v2 }
 0x48c   :  { %v1061_v1 = vpop.f32.mrf.mxu0 }
 0x494   :  { %v1219_v14 = vpop.f32.mrf.mxu0 }
 0x495   :  { %1547 = vrot.lane.b32.xlu1 %v1219_v14, %s3817_s28 }
 0x4a7   :  { %v871_v8 = vpop.permute.xlu2 %870 }
 0x4a8   :  { %v897_v10 = vsel %vm238_vm1, %v4129_v46, %v871_v8 }
 0x4a9   :  { %v898_v27 = vsel %vm267_vm3, %v897_v10, %v875_v36  ;;  %v3821_v10 = vmov 32.0  }
 0x4aa   :  { %3542 = vrcp.f32 %v3821_v10 }
 0x4af   :  { %v883_v60 = vpop.permute.xlu2 %882 }
 0x4b7   :  { %v891_v13 = vpop.permute.xlu2 %890 }
 0x4c8   :  { %v879_v63 = vpop.permute.xlu0 %878 }
 0x4c9   :  { %v900_v61 = vsel %vm899_vm4, %v898_v27, %v879_v63 }
 0x4ca   :  { %v902_v15 = vsel %vm901_vm5, %v900_v61, %v883_v60  ;;  %v3543_v60 = vpop.eup %3542 }
 0x4cb   :  { %v1617_v63 = vmul.f32 32.0, %v3543_v60  ;;  %vm1621_vm9 = vweird.f32 %v3543_v60 }
 0x4cd   :  { %v1618_v27 = vsub.f32 1.0, %v1617_v63 }
 0x4cf   :  { %v887_v12 = vpop.permute.xlu1 %886 }
 0x4d0   :  { %v904_v22 = vsel %vm903_vm6, %v902_v15, %v887_v12  ;;  %v1544_v6 = vpop.permute.xlu0 %1543  ;;  %v1619_v12 = vmul.f32 %v3543_v60, %v1618_v27 }
 0x4d1   :  { %v906_v43 = vsel %vm905_vm7, %v904_v22, %v891_v13 }
 0x4d2   :  { %v1620_v61 = vadd.f32 %v3543_v60, %v1619_v12 }
 0x4d4   :  { %v4505_v15 = vsel %vm1621_vm9, %v3543_v60, %v1620_v61 }
 0x4d5   :  { %v1298_v16 = vpop.f32.mrf.mxu2 }
 0x4d6   :  { %1551 = vrot.lane.b32.xlu2 %v1298_v16, %s3816_s27 }
 0x4d7   :  { %v895_v46 = vpop.permute.xlu1 %894  ;;  %v1377_v52 = vpop.f32.mrf.mxu0 }
 0x4d8   :  { %v908_v17 = vsel %vm907_vm8, %v906_v43, %v895_v46  ;;  %1555 = vrot.lane.b32.xlu0 %v1377_v52, %s3819_s30  ;;  %v3621_v52 = vld [vmem:[#allocation7 + $0x8] sm:$0xff] }
 0x4d9   :  { %3385 = vmatmul.msk.f32.vlgmr.msrb.gmra.mxu1 %vm152_vm0, %v908_v17 }
 0x4dd   :  { %v1456_v49 = vpop.f32.mrf.mxu2 }
 0x4de   :  { %1539 = vrot.lane.b32.xlu2 %v1061_v1, %s3815_s3  ;;  %1559 = vrot.lane.b32.xlu1 %v1456_v49, %s3818_s29 }
 0x4df   :  { %v1535_v19 = vpop.f32.mrf.mxu0 }
 0x4e5   :  { %v1694_v21 = vpop.f32.mrf.mxu2 }
 0x4e6   :  { %1920 = vrot.lane.b32.xlu0 %v1694_v21, %s3808_s8  ;;  %1563 = vrot.lane.b32.xlu2 %v1535_v19, %s3820_s11 }
 0x4e7   :  { %1841 = vrot.lane.b32.xlu1 %v1694_v21, %s3809_s20  ;;  %v1728_v20 = vpop.f32.mrf.mxu0 }
 0x4e8   :  { %3393 = vmatpush.xpose.msk.msra.mxu1 %vm238_vm1, %v1728_v20 }
 0x4ed   :  { %v4420_v11 = vpop.f32.mrf.mxu2 }
 0x4ee   :  { %2076 = vrot.lane.b32.xlu0 %v1694_v21, %s3812_s25  ;;  %2232 = vrot.lane.b32.xlu2 %v1694_v21, %s3814_s1 }
 0x4ef   :  { %1998 = vrot.lane.b32.xlu1 %v1694_v21, %s3810_s23  ;;  %v4434_v23 = vpop.f32.mrf.mxu0 }
 0x4f6   :  { %2310 = vrot.lane.b32.xlu0 %v1694_v21, %s3811_s24  ;;  %2653 = vrot.lane.b32.xlu2 %v4420_v11, %s3810_s23 }
 0x4f7   :  { %2154 = vrot.lane.b32.xlu1 %v1694_v21, %s3813_s26 }
 0x4fe   :  { %2496 = vrot.lane.b32.xlu0 %v4420_v11, %s3809_s20  ;;  %2809 = vrot.lane.b32.xlu2 %v4420_v11, %s3813_s26 }
 0x4ff   :  { %2000 = vrot.lane.b32.xlu1 %v1728_v20, %s3810_s23 }
 0x506   :  { %2575 = vrot.lane.b32.xlu0 %v4420_v11, %s3808_s8  ;;  %2655 = vrot.lane.b32.xlu2 %v4434_v23, %s3810_s23 }
 0x507   :  { %2156 = vrot.lane.b32.xlu1 %v1728_v20, %s3813_s26  ;;  %v1548_v56 = vpop.permute.xlu1 %1547 }
 0x50e   :  { %2731 = vrot.lane.b32.xlu0 %v4420_v11, %s3812_s25  ;;  %2811 = vrot.lane.b32.xlu2 %v4434_v23, %s3813_s26 }
 0x50f   :  { %2312 = vrot.lane.b32.xlu1 %v1728_v20, %s3811_s24 }
 0x516   :  { %1843 = vrot.lane.b32.xlu0 %v1728_v20, %s3809_s20 }
 0x517   :  { %2498 = vrot.lane.b32.xlu1 %v4434_v23, %s3809_s20 }
 0x51e   :  { %1922 = vrot.lane.b32.xlu0 %v1728_v20, %s3808_s8 }
 0x526   :  { %2078 = vrot.lane.b32.xlu0 %v1728_v20, %s3812_s25 }
 0x52e   :  { %2234 = vrot.lane.b32.xlu0 %v1728_v20, %s3814_s1 }
 0x530   :  { %v1552_v24 = vpop.permute.xlu2 %1551 }
 0x536   :  { %2577 = vrot.lane.b32.xlu0 %v4434_v23, %s3808_s8 }
 0x538   :  { %v1540_v25 = vpop.permute.xlu2 %1539 }
 0x539   :  { %v1566_v34 = vsel %vm238_vm1, %v4363_v33, %v1540_v25 }
 0x53a   :  { %v1567_v26 = vsel %vm267_vm3, %v1566_v34, %v1544_v6 }
 0x53b   :  { %v1568_v28 = vsel %vm899_vm4, %v1567_v26, %v1548_v56 }
 0x53c   :  { %v1569_v29 = vsel %vm901_vm5, %v1568_v28, %v1552_v24 }
 0x53e   :  { %2733 = vrot.lane.b32.xlu0 %v4434_v23, %s3812_s25 }
 0x540   :  { %v1564_v18 = vpop.permute.xlu2 %1563 }
 0x548   :  { %v2233_v58 = vpop.permute.xlu2 %2232 }
 0x54a   :  { %v1556_v50 = vpop.permute.xlu0 %1555 }
 0x54b   :  { %v1570_v31 = vsel %vm903_vm6, %v1569_v29, %v1556_v50 }
 0x550   :  { %v1560_v41 = vpop.permute.xlu1 %1559  ;;  %v2654_v0 = vpop.permute.xlu2 %2653 }
 0x551   :  { %v1571_v35 = vsel %vm905_vm7, %v1570_v31, %v1560_v41 }
 0x552   :  { %v1572_v37 = vsel %vm907_vm8, %v1571_v35, %v1564_v18 }
 0x553   :  { %3386 = vmatmul.msk.f32.gmra.mxu1 %vm152_vm0, %v1572_v37 }
 0x556   :  { %v1602_v33 = vpop.f32.mrf.mxu1 }
 0x557   :  { %v1603_v39 = vadd.f32 %v4463_v38, %v1602_v33 }
 0x558   :  { %v1921_v40 = vpop.permute.xlu0 %1920  ;;  %v2810_v14 = vpop.permute.xlu2 %2809 }
 0x559   :  { %v4466_v32 = vadd.f32 %v3620_v44, %v1603_v39  ;;  %v1842_v48 = vpop.permute.xlu1 %1841 }
 0x55b   :  { %3394 = vmatmul.msk.f32.vlgmr.msra.gmra.mxu1 %vm238_vm1, %v1694_v21  ;;  %v1610_v45 = vsel %vm152_vm0, %v4466_v32, 0.0 }
 0x55c   :  { %1611 = vadd.xlane.f32.xlu2 %v1610_v45 }
 0x560   :  { %v2077_v47 = vpop.permute.xlu0 %2076  ;;  %v2656_v5 = vpop.permute.xlu2 %2655 }
 0x561   :  { %v1999_v53 = vpop.permute.xlu1 %1998 }
 0x568   :  { %v2311_v51 = vpop.permute.xlu0 %2310  ;;  %v2812_v8 = vpop.permute.xlu2 %2811 }
 0x569   :  { %v2155_v3 = vpop.permute.xlu1 %2154 }
 0x570   :  { %v2497_v42 = vpop.permute.xlu0 %2496 }
 0x571   :  { %v2001_v57 = vpop.permute.xlu1 %2000 }
 0x574   :  { %2967 = vrot.lane.b32.xlu2 %v4434_v23, %s3811_s24 }
 0x578   :  { %v2576_v59 = vpop.permute.xlu0 %2575 }
 0x579   :  { %v2157_v54 = vpop.permute.xlu1 %2156 }
 0x57c   :  { %2887 = vrot.lane.b32.xlu2 %v4420_v11, %s3814_s1 }
 0x580   :  { %v2732_v55 = vpop.permute.xlu0 %2731 }
 0x581   :  { %v2313_v2 = vpop.permute.xlu1 %2312 }
 0x584   :  { %2965 = vrot.lane.b32.xlu2 %v4420_v11, %s3811_s24 }
 0x588   :  { %v1844_v62 = vpop.permute.xlu0 %1843 }
 0x589   :  { %3396 = vmatpush.xpose.msk.msrb.mxu3 %vm238_vm1, %v1844_v62  ;;  %v2499_v4 = vpop.permute.xlu1 %2498 }
 0x58c   :  { %3397 = vmatmul.msk.f32.vlgmr.msrb.gmra.mxu3 %vm238_vm1, %v1842_v48 }
 0x58d   :  { %3402 = vmatpush.xpose.msk.msra.mxu3 %vm238_vm1, %v2001_v57  ;;  %v1738_v57 = vld [vmem:[#allocation10 + $0x58] sm:$0xff] }
 0x58e   :  { %1757 = vmatpush.msra.mxu0 %v1738_v57 }
 0x590   :  { %v1923_v30 = vpop.permute.xlu0 %1922 }
 0x591   :  { %3408 = vmatpush.xpose.msk.msrb.mxu3 %vm238_vm1, %v2157_v54  ;;  %3399 = vmatpush.xpose.msk.msrb.mxu1 %vm238_vm1, %v1923_v30  ;;  %v1736_v54 = vld [vmem:[#allocation10 + $0x48] sm:$0xff] }
 0x594   :  { %3400 = vmatmul.msk.f32.vlgmr.msrb.gmra.mxu1 %vm238_vm1, %v1921_v40  ;;  %3403 = vmatmul.msk.f32.vlgmr.msra.gmra.mxu3 %vm238_vm1, %v1999_v53 }
 0x595   :  { %3414 = vmatpush.xpose.msk.msra.mxu3 %vm238_vm1, %v2313_v2 }
 0x598   :  { %v2079_v1 = vpop.permute.xlu0 %2078 }
 0x599   :  { %3405 = vmatpush.xpose.msk.msra.mxu1 %vm238_vm1, %v2079_v1 }
 0x59c   :  { %3406 = vmatmul.msk.f32.vlgmr.msra.gmra.mxu1 %vm238_vm1, %v2077_v47  ;;  %3409 = vmatmul.msk.f32.vlgmr.msrb.gmra.mxu3 %vm238_vm1, %v2155_v3 }
 0x59d   :  { %3420 = vmatpush.xpose.msk.msrb.mxu3 %vm238_vm1, %v2499_v4 }
 0x5a0   :  { %v2235_v9 = vpop.permute.xlu0 %2234 }
 0x5a1   :  { %3411 = vmatpush.xpose.msk.msrb.mxu1 %vm238_vm1, %v2235_v9 }
 0x5a4   :  { %3412 = vmatmul.msk.f32.vlgmr.msrb.gmra.mxu1 %vm238_vm1, %v2233_v58  ;;  %3415 = vmatmul.msk.f32.vlgmr.msra.gmra.mxu3 %vm238_vm1, %v2311_v51  ;;  %v1735_v58 = vld [vmem:[#allocation10 + $0x40] sm:$0xff] }
 0x5a5   :  { %3417 = vmatpush.xpose.msk.msra.mxu1 %vm238_vm1, %v4434_v23  ;;  %3426 = vmatpush.xpose.msk.msra.mxu3 %vm238_vm1, %v2656_v5 }
 0x5a8   :  { %v2578_v7 = vpop.permute.xlu0 %2577 }
 0x5a9   :  { %3423 = vmatpush.xpose.msk.msrb.mxu1 %vm238_vm1, %v2578_v7 }
 0x5ac   :  { %3418 = vmatmul.msk.f32.vlgmr.msra.gmra.mxu1 %vm238_vm1, %v4420_v11  ;;  %3421 = vmatmul.msk.f32.vlgmr.msrb.gmra.mxu3 %vm238_vm1, %v2497_v42 }
 0x5ad   :  { %3432 = vmatpush.xpose.msk.msrb.mxu3 %vm238_vm1, %v2812_v8 }
 0x5b0   :  { %v2734_v36 = vpop.permute.xlu0 %2733 }
 0x5b1   :  { %3429 = vmatpush.xpose.msk.msra.mxu1 %vm238_vm1, %v2734_v36 }
 0x5b4   :  { %3424 = vmatmul.msk.f32.vlgmr.msrb.gmra.mxu1 %vm238_vm1, %v2576_v59  ;;  %3427 = vmatmul.msk.f32.vlgmr.msra.gmra.mxu3 %vm238_vm1, %v2654_v0 }
 0x5bc   :  { %3430 = vmatmul.msk.f32.vlgmr.msra.gmra.mxu1 %vm238_vm1, %v2732_v55  ;;  %3433 = vmatmul.msk.f32.vlgmr.msrb.gmra.mxu3 %vm238_vm1, %v2810_v14  ;;  %v1737_v55 = vld [vmem:[#allocation10 + $0x50] sm:$0xff] }
 0x5bd   :  { %1758 = vmatpush.msra.mxu0 %v1737_v55 }
 0x5bf   :  { %1759 = vmatpush.msra.mxu0 %v1736_v54 }
 0x5c1   :  { %1760 = vmatpush.msra.mxu0 %v1735_v58 }
 0x5cf   :  { %v1612_v22 = vpop.xlane.xlu2 %1611 }
 0x5d0   :  { %v1623_v16 = vmul.f32 %v4505_v15, %v1612_v22  ;;  %v1605_v13 = vpop.f32.mrf.mxu1 }
 0x5d1   :  { %v1606_v46 = vadd.f32 %v4463_v38, %v1605_v13 }
 0x5d2   :  { %v4510_v43 = vsub.f32 %v4466_v32, %v1623_v16  ;;  %v4594_v16 = vld [vmem:[#allocation11 + $0x1] ss:$0 sm:$0xff] }
 0x5d3   :  { %v4512_v17 = vadd.f32 %v3621_v52, %v1606_v46 }
 0x5d4   :  { %v1627_v49 = vmul.f32 %v4510_v43, %v4510_v43 }
 0x5d5   :  { %v1613_v19 = vsel %vm152_vm0, %v4512_v17, 0.0 }
 0x5d6   :  { %1614 = vadd.xlane.f32.xlu1 %v1613_v19  ;;  %v1629_v21 = vsel %vm152_vm0, %v1627_v49, 0.0 }
 0x5d7   :  { %1630 = vadd.xlane.f32.xlu0 %v1629_v21  ;;  %v2968_v11 = vpop.permute.xlu2 %2967 }
 0x5d8   :  { %v4519_v20 = vpop.f32.mrf.mxu1  ;;  %3438 = vmatpush.xpose.msk.msra.mxu3 %vm238_vm1, %v2968_v11 }
 0x5d9   :  { %v1794_v24 = vsel %vm267_vm3, %v4519_v20, -inf }
 0x5da   :  { %1795 = vmax.xlane.f32.xlu2 %v1794_v24 }
 0x5df   :  { %v4524_v25 = vpop.permute.xlu2 %2887 }
 0x5e7   :  { %v2966_v6 = vpop.permute.xlu2 %2965 }
 0x5e8   :  { %3439 = vmatmul.msk.f32.vlgmr.msra.gmra.mxu3 %vm238_vm1, %v2966_v6 }
 0x5ef   :  { %2889 = vrot.lane.b32.xlu1 %v4434_v23, %s3814_s1 }
 0x60f   :  { %v4529_v34 = vpop.f32.mrf.mxu3 }
 0x610   :  { %v1869_v56 = vsel %vm267_vm3, %v4529_v34, -inf }
 0x611   :  { %v4533_v26 = vpop.f32.mrf.mxu1  ;;  %1870 = vmax.xlane.f32.xlu0 %v1869_v56 }
 0x612   :  { %v1948_v50 = vsel %vm267_vm3, %v4533_v26, -inf }
 0x617   :  { %v4535_v28 = vpop.f32.mrf.mxu3 }
 0x618   :  { %v2026_v41 = vsel %vm267_vm3, %v4535_v28, -inf }
 0x619   :  { %v4539_v29 = vpop.f32.mrf.mxu1  ;;  %1949 = vmax.xlane.f32.xlu0 %v1948_v50 }
 0x61a   :  { %v2104_v38 = vsel %vm267_vm3, %v4539_v29, -inf }
 0x61f   :  { %v4541_v31 = vpop.f32.mrf.mxu3 }
 0x620   :  { %v2182_v23 = vsel %vm267_vm3, %v4541_v31, -inf }
 0x621   :  { %v4547_v18 = vpop.f32.mrf.mxu1  ;;  %2183 = vmax.xlane.f32.xlu1 %v2182_v23  ;;  %2027 = vmax.xlane.f32.xlu0 %v2026_v41 }
 0x622   :  { %v2260_v35 = vsel %vm267_vm3, %v4547_v18, -inf }
 0x623   :  { %2261 = vmax.xlane.f32.xlu2 %v2260_v35 }
 0x627   :  { %v4551_v37 = vpop.f32.mrf.mxu3 }
 0x628   :  { %v2338_v32 = vsel %vm267_vm3, %v4551_v37, -inf }
 0x629   :  { %v4555_v33 = vpop.f32.mrf.mxu1  ;;  %2105 = vmax.xlane.f32.xlu0 %v2104_v38 }
 0x62a   :  { %v2449_v39 = vsel %vm267_vm3, %v4555_v33, -inf }
 0x62b   :  { %2450 = vmax.xlane.f32.xlu1 %v2449_v39 }
 0x62f   :  { %v4559_v40 = vpop.f32.mrf.mxu3 }
 0x630   :  { %v2524_v44 = vsel %vm267_vm3, %v4559_v40, -inf }
 0x631   :  { %v4565_v45 = vpop.f32.mrf.mxu1  ;;  %2525 = vmax.xlane.f32.xlu2 %v2524_v44  ;;  %2339 = vmax.xlane.f32.xlu0 %v2338_v32 }
 0x632   :  { %v2603_v51 = vsel %vm267_vm3, %v4565_v45, -inf }
 0x637   :  { %v4567_v47 = vpop.f32.mrf.mxu3 }
 0x638   :  { %v2681_v48 = vsel %vm267_vm3, %v4567_v47, -inf }
 0x639   :  { %v4573_v53 = vpop.f32.mrf.mxu1  ;;  %2682 = vmax.xlane.f32.xlu1 %v2681_v48  ;;  %2604 = vmax.xlane.f32.xlu0 %v2603_v51 }
 0x63a   :  { %v2759_v42 = vsel %vm267_vm3, %v4573_v53, -inf }
 0x63b   :  { %2760 = vmax.xlane.f32.xlu2 %v2759_v42 }
 0x63f   :  { %v4577_v3 = vpop.f32.mrf.mxu3 }
 0x640   :  { %v2837_v59 = vsel %vm267_vm3, %v4577_v3, -inf }
 0x641   :  { %2838 = vmax.xlane.f32.xlu1 %v2837_v59 }
 0x649   :  { %v1615_v62 = vpop.xlane.xlu1 %1614 }
 0x64a   :  { %v1624_v0 = vmul.f32 %v4505_v15, %v1615_v62  ;;  %v1631_v30 = vpop.xlane.xlu0 %1630 }
 0x64b   :  { %v1635_v2 = vmul.f32 %v1631_v30, %v4505_v15 }
 0x64c   :  { %v4584_v1 = vsub.f32 %v4512_v17, %v1624_v0  ;;  %v4597_v17 = vld [vmem:[#allocation11 + $0x2] ss:$0 sm:$0xff] }
 0x64d   :  { %v1637_v14 = vadd.f32 1e-05, %v1635_v2  ;;  %v1796_v4 = vpop.xlane.xlu2 %1795 }
 0x64e   :  { %v1797_v9 = vsub.f32 %v4519_v20, %v1796_v4  ;;  %v1628_v5 = vmul.f32 %v4584_v1, %v4584_v1 }
 0x64f   :  { %3544 = vrsqrt.f32 %v1637_v14  ;;  %vm1645_vm11 = vweird.f32 %v1637_v14 }
 0x650   :  { %v1798_v7 = vmul.f32 1.442695, %v1797_v9  ;;  %v1632_v8 = vsel %vm152_vm0, %v1628_v5, 0.0 }
 0x651   :  { %1633 = vadd.xlane.f32.xlu1 %v1632_v8 }
 0x652   :  { %3546 = vpow2.f32 %v1798_v7 }
 0x655   :  { %v3545_v36 = vpop.eup %3544 }
 0x656   :  { %v1640_v10 = vmul.f32 %v3545_v36, %v1637_v14  ;;  %vm1646_vm10 = vweird.f32 %v3545_v36 }
 0x657   :  { %vm1647_vm12 = vmor %vm1645_vm11, %vm1646_vm10 }
 0x658   :  { %v4590_v60 = vpop.eup %3546  ;;  %v1641_v63 = vmul.f32 %v3545_v36, %v1640_v10 }
 0x659   :  { %v1800_v27 = vsel %vm267_vm3, %v4590_v60, 0.0 }
 0x65a   :  { %v1642_v12 = vmul.f32 0.5, %v1641_v63  ;;  %1801 = vadd.xlane.f32.xlu0 %v1800_v27 }
 0x65c   :  { %v1643_v61 = vsub.f32 1.5, %v1642_v12 }
 0x65e   :  { %v1644_v22 = vmul.f32 %v3545_v36, %v1643_v61 }
 0x660   :  { %v1648_v13 = vsel %vm1647_vm12, %v3545_v36, %v1644_v22 }
 0x661   :  { %v1659_v46 = vmul.f32 %v1648_v13, %v4510_v43  ;;  %v2890_v52 = vpop.permute.xlu1 %2889 }
 0x662   :  { %3435 = vmatpush.xpose.msk.msrb.mxu1 %vm238_vm1, %v2890_v52 }
 0x663   :  { %v1662_v49 = vmul.f32 %v4594_v16, %v1659_v46 }
 0x665   :  { %3436 = vmatmul.msk.f32.vlgmr.msrb.gmra.mxu1 %vm238_vm1, %v4524_v25  ;;  %v4604_v19 = vadd.f32 %v4597_v17, %v1662_v49 }
 0x667   :  { %3391 = vmatmul.msk.f32.vlgmr.msra.gmra.mxu0 %vm152_vm0, %v4604_v19 }
 0x684   :  { %v1871_v21 = vpop.xlane.xlu0 %1870 }
 0x685   :  { %v1872_v11 = vsub.f32 %v4529_v34, %v1871_v21 }
 0x687   :  { %v1873_v43 = vmul.f32 1.442695, %v1872_v11 }
 0x689   :  { %3548 = vpow2.f32 %v1873_v43 }
 0x68c   :  { %v1950_v20 = vpop.xlane.xlu0 %1949 }
 0x68d   :  { %v1951_v24 = vsub.f32 %v4533_v26, %v1950_v20 }
 0x68f   :  { %v4610_v6 = vpop.eup %3548  ;;  %v1952_v56 = vmul.f32 1.442695, %v1951_v24 }
 0x690   :  { %v1875_v25 = vsel %vm267_vm3, %v4610_v6, 0.0 }
 0x691   :  { %3550 = vpow2.f32 %v1952_v56  ;;  %1876 = vadd.xlane.f32.xlu0 %v1875_v25 }
 0x694   :  { %v2028_v50 = vpop.xlane.xlu0 %2027  ;;  %v4620_v32 = vpop.xlane.xlu1 %2183 }
 0x695   :  { %v2029_v23 = vsub.f32 %v4535_v28, %v2028_v50 }
 0x696   :  { %v2262_v41 = vpop.xlane.xlu2 %2261 }
 0x697   :  { %v4615_v35 = vpop.eup %3550  ;;  %v2030_v34 = vmul.f32 1.442695, %v2029_v23  ;;  %v2263_v38 = vsub.f32 %v4547_v18, %v2262_v41 }
 0x698   :  { %v1954_v26 = vsel %vm267_vm3, %v4615_v35, 0.0 }
 0x699   :  { %1955 = vadd.xlane.f32.xlu1 %v1954_v26  ;;  %3552 = vpow2.f32 %v2030_v34  ;;  %v2264_v39 = vmul.f32 1.442695, %v2263_v38 }
 0x69b   :  { %3554 = vpow2.f32 %v2264_v39 }
 0x69c   :  { %v2106_v44 = vpop.xlane.xlu0 %2105 }
 0x69d   :  { %v2107_v48 = vsub.f32 %v4539_v29, %v2106_v44 }
 0x69e   :  { %v2451_v59 = vpop.xlane.xlu1 %2450 }
 0x69f   :  { %v2108_v51 = vmul.f32 1.442695, %v2107_v48  ;;  %v4623_v42 = vpop.eup %3552  ;;  %v2452_v29 = vsub.f32 %v4555_v33, %v2451_v59 }
 0x6a0   :  { %v2032_v28 = vsel %vm267_vm3, %v4623_v42, 0.0 }
 0x6a1   :  { %3556 = vpow2.f32 %v2108_v51  ;;  %2033 = vadd.xlane.f32.xlu0 %v2032_v28  ;;  %v4628_v55 = vpop.eup %3554  ;;  %v2453_v30 = vmul.f32 1.442695, %v2452_v29  ;;  %v2185_v28 = vsub.f32 %v4541_v31, %v4620_v32  ;;  %v4680_v32 = vpop.f32.mrf.mxu3 }
 0x6a2   :  { %v2266_v0 = vsel %vm267_vm3, %v4628_v55, 0.0 }
 0x6a4   :  { %v2340_v18 = vpop.xlane.xlu0 %2339  ;;  %v2526_v31 = vpop.xlane.xlu2 %2525 }
 0x6a5   :  { %v2341_v57 = vsub.f32 %v4551_v37, %v2340_v18 }
 0x6a7   :  { %v4630_v54 = vpop.eup %3556  ;;  %v2342_v58 = vmul.f32 1.442695, %v2341_v57  ;;  %v2527_v57 = vsub.f32 %v4559_v40, %v2526_v31 }
 0x6a8   :  { %v2110_v62 = vsel %vm267_vm3, %v4630_v54, 0.0 }
 0x6a9   :  { %3558 = vpow2.f32 %v2342_v58  ;;  %2111 = vadd.xlane.f32.xlu1 %v2110_v62  ;;  %2267 = vadd.xlane.f32.xlu0 %v2266_v0  ;;  %v2528_v58 = vmul.f32 1.442695, %v2527_v57 }
 0x6aa   :  { %3560 = vpow2.f32 %v2453_v30 }
 0x6ac   :  { %v2605_v2 = vpop.xlane.xlu0 %2604  ;;  %v2683_v14 = vpop.xlane.xlu1 %2682 }
 0x6ad   :  { %v2606_v37 = vsub.f32 %v4565_v45, %v2605_v2  ;;  %v2684_v33 = vsub.f32 %v4567_v47, %v2683_v14 }
 0x6af   :  { %v4638_v4 = vpop.eup %3558  ;;  %v2607_v9 = vmul.f32 1.442695, %v2606_v37  ;;  %v2685_v7 = vmul.f32 1.442695, %v2684_v33  ;;  %v2761_v33 = vpop.xlane.xlu2 %2760 }
 0x6b0   :  { %v2344_v5 = vsel %vm267_vm3, %v4638_v4, 0.0  ;;  %v4643_v8 = vpop.eup %3560 }
 0x6b1   :  { %3562 = vpow2.f32 %v2607_v9  ;;  %2345 = vadd.xlane.f32.xlu0 %v2344_v5  ;;  %v2455_v10 = vsel %vm267_vm3, %v4643_v8, 0.0 }
 0x6b2   :  { %3564 = vpow2.f32 %v2685_v7  ;;  %v2762_v7 = vsub.f32 %v4573_v53, %v2761_v33 }
 0x6b4   :  { %v4651_v47 = vpop.xlane.xlu1 %2838 }
 0x6b5   :  { %v2840_v30 = vsub.f32 %v4577_v3, %v4651_v47  ;;  %v2763_v3 = vmul.f32 1.442695, %v2762_v7 }
 0x6b7   :  { %v4645_v36 = vpop.eup %3562  ;;  %v2841_v2 = vmul.f32 1.442695, %v2840_v30 }
 0x6b8   :  { %v2609_v45 = vsel %vm267_vm3, %v4645_v36, 0.0  ;;  %v4653_v63 = vpop.eup %3564 }
 0x6b9   :  { %2610 = vadd.xlane.f32.xlu1 %v2609_v45  ;;  %2456 = vadd.xlane.f32.xlu0 %v2455_v10  ;;  %v2687_v27 = vsel %vm267_vm3, %v4653_v63, 0.0 }
 0x6c1   :  { %2688 = vadd.xlane.f32.xlu0 %v2687_v27 }
 0x6c4   :  { %v1634_v12 = vpop.xlane.xlu1 %1633 }
 0x6c5   :  { %v1636_v61 = vmul.f32 %v1634_v12, %v4505_v15 }
 0x6c7   :  { %v1638_v22 = vadd.f32 1e-05, %v1636_v61 }
 0x6c9   :  { %3566 = vrsqrt.f32 %v1638_v22  ;;  %vm1655_vm14 = vweird.f32 %v1638_v22 }
 0x6cd   :  { %v1802_v13 = vpop.xlane.xlu0 %1801 }
 0x6ce   :  { %3568 = vrcp.f32 %v1802_v13  ;;  %v1814_v41 = vand.u32 2147483648, %v1802_v13  ;;  %vm1808_vm9 = vweird.f32 %v1802_v13  ;;  %v1812_v38 = vand.u32 2147483647, %v1802_v13 }
 0x6cf   :  { %v3567_v46 = vpop.eup %3566 }
 0x6d0   :  { %v1650_v52 = vmul.f32 %v3567_v46, %v1638_v22  ;;  %vm1656_vm13 = vweird.f32 %v3567_v46  ;;  %v1815_v44 = vor.u32 1.1754944e-38, %v1814_v41  ;;  %vm1813_vm11 = vcmp.eq.f32.partialorder %v1812_v38, 8.507059e+37 }
 0x6d1   :  { %vm1657_vm15 = vmor %vm1655_vm14, %vm1656_vm13 }
 0x6d2   :  { %v1651_v49 = vmul.f32 %v3567_v46, %v1650_v52 }
 0x6d4   :  { %v3569_v21 = vpop.eup %3568  ;;  %v1652_v11 = vmul.f32 0.5, %v1651_v49 }
 0x6d5   :  { %v1804_v43 = vmul.f32 %v3569_v21, %v1802_v13  ;;  %vm1809_vm2 = vweird.f32 %v3569_v21 }
 0x6d6   :  { %v1653_v20 = vsub.f32 1.5, %v1652_v11  ;;  %vm1810_vm10 = vmor %vm1808_vm9, %vm1809_vm2 }
 0x6d7   :  { %v1805_v24 = vsub.f32 1.0, %v1804_v43 }
 0x6d8   :  { %v1654_v56 = vmul.f32 %v3567_v46, %v1653_v20 }
 0x6d9   :  { %v1806_v25 = vmul.f32 %v3569_v21, %v1805_v24 }
 0x6da   :  { %v1658_v50 = vsel %vm1657_vm15, %v3567_v46, %v1654_v56 }
 0x6db   :  { %v1807_v23 = vadd.f32 %v3569_v21, %v1806_v25  ;;  %v1660_v34 = vmul.f32 %v1658_v50, %v4584_v1 }
 0x6dd   :  { %v1663_v26 = vmul.f32 %v4594_v16, %v1660_v34  ;;  %v1811_v39 = vsel %vm1810_vm10, %v3569_v21, %v1807_v23 }
 0x6de   :  { %v1816_v51 = vsel %vm1813_vm11, %v1815_v44, %v1811_v39 }
 0x6df   :  { %v4661_v48 = vadd.f32 %v4597_v17, %v1663_v26  ;;  %v1817_v16 = vmul.f32 %v4590_v60, %v1816_v51  ;;  %v2186_v17 = vmul.f32 1.442695, %v2185_v28  ;;  %v2993_v60 = vsel %vm267_vm3, %v4680_v32, -inf }
 0x6e1   :  { %3392 = vmatmul.msk.f32.gmra.mxu0 %vm152_vm0, %v4661_v48  ;;  %3570 = vpow2.f32 %v2186_v17 }
 0x6e2   :  { %v4667_v18 = vpop.f32.mrf.mxu1  ;;  %3572 = vpow2.f32 %v2528_v58 }
 0x6e3   :  { %v2915_v1 = vsel %vm267_vm3, %v4667_v18, -inf  ;;  %3574 = vpow2.f32 %v2841_v2 }
 0x6e4   :  { %v4671_v59 = vpop.f32.mrf.mxu0  ;;  %2916 = vmax.xlane.f32.xlu2 %v2915_v1  ;;  %3576 = vpow2.f32 %v2763_v3 }
 0x6e5   :  { %1836 = vmatpush.msrb.mxu2 %v4671_v59  ;;  %1894 = vrot.lane.b32.xlu1 %v4671_v59, %s3809_s20 }
 0x6e6   :  { %2050 = vrot.lane.b32.xlu0 %v4671_v59, %s3810_s23  ;;  %3395 = vmatmul.msk.f32.vlgmr.msrb.gmra.mxu2 %vm267_vm3, %v1817_v16 }
 0x6e7   :  { %v4687_v29 = vpop.eup %3570 }
 0x6e8   :  { %v2188_v62 = vsel %vm267_vm3, %v4687_v29, 0.0  ;;  %v4693_v0 = vpop.eup %3572 }
 0x6e9   :  { %v2530_v40 = vsel %vm267_vm3, %v4693_v0, 0.0  ;;  %v4699_v14 = vpop.eup %3574 }
 0x6ea   :  { %v2843_v37 = vsel %vm267_vm3, %v4699_v14, 0.0  ;;  %v4710_v10 = vpop.eup %3576 }
 0x6eb   :  { %v2765_v27 = vsel %vm267_vm3, %v4710_v10, 0.0 }
 0x6ec   :  { %2994 = vmax.xlane.f32.xlu2 %v2993_v60 }
 0x6ee   :  { %2206 = vrot.lane.b32.xlu0 %v4671_v59, %s3813_s26 }
 0x6f4   :  { %2189 = vadd.xlane.f32.xlu2 %v2188_v62 }
 0x6f6   :  { %2284 = vrot.lane.b32.xlu0 %v4671_v59, %s3814_s1 }
 0x6fc   :  { %2531 = vadd.xlane.f32.xlu2 %v2530_v40 }
 0x704   :  { %v1877_v9 = vpop.xlane.xlu0 %1876 }
 0x705   :  { %3578 = vrcp.f32 %v1877_v9  ;;  %v1889_v43 = vand.u32 2147483648, %v1877_v9  ;;  %vm1883_vm13 = vweird.f32 %v1877_v9  ;;  %v1887_v24 = vand.u32 2147483647, %v1877_v9 }
 0x707   :  { %v1890_v23 = vor.u32 1.1754944e-38, %v1889_v43  ;;  %vm1888_vm15 = vcmp.eq.f32.partialorder %v1887_v24, 8.507059e+37 }
 0x70b   :  { %v3579_v12 = vpop.eup %3578 }
 0x70c   :  { %v4716_v61 = vpop.xlane.xlu1 %1955  ;;  %v1879_v22 = vmul.f32 %v3579_v12, %v1877_v9  ;;  %vm1884_vm12 = vweird.f32 %v3579_v12 }
 0x70d   :  { %vm1885_vm14 = vmor %vm1883_vm13, %vm1884_vm12  ;;  %vm1962_vm13 = vweird.f32 %v4716_v61 }
 0x70e   :  { %v1880_v13 = vsub.f32 1.0, %v1879_v22  ;;  %v1966_v22 = vand.u32 2147483647, %v4716_v61 }
 0x70f   :  { %2844 = vadd.xlane.f32.xlu1 %v2843_v37 }
 0x710   :  { %v1881_v49 = vmul.f32 %v3579_v12, %v1880_v13 }
 0x712   :  { %v1882_v11 = vadd.f32 %v3579_v12, %v1881_v49 }
 0x714   :  { %1972 = vrot.lane.b32.xlu2 %v4671_v59, %s3808_s8  ;;  %v2034_v5 = vpop.xlane.xlu0 %2033  ;;  %v1886_v50 = vsel %vm1885_vm14, %v3579_v12, %v1882_v11  ;;  %v1968_v12 = vand.u32 2147483648, %v4716_v61 }
 0x715   :  { %3580 = vrcp.f32 %v2034_v5  ;;  %v1891_v34 = vsel %vm1888_vm15, %v1890_v23, %v1886_v50  ;;  %v2046_v26 = vand.u32 2147483648, %v2034_v5  ;;  %vm2040_vm9 = vweird.f32 %v2034_v5 }
 0x716   :  { %v1892_v51 = vmul.f32 %v4610_v6, %v1891_v34  ;;  %3582 = vrcp.f32 %v4716_v61  ;;  %v2044_v28 = vand.u32 2147483647, %v2034_v5  ;;  %v1969_v11 = vor.u32 1.1754944e-38, %v1968_v12 }
 0x717   :  { %v2047_v31 = vor.u32 1.1754944e-38, %v2046_v26  ;;  %vm1967_vm15 = vcmp.eq.f32.partialorder %v1966_v22, 8.507059e+37 }
 0x718   :  { %vm2045_vm11 = vcmp.eq.f32.partialorder %v2044_v28, 8.507059e+37 }
 0x71b   :  { %v3581_v46 = vpop.eup %3580 }
 0x71c   :  { %v4708_v45 = vpop.xlane.xlu0 %2267  ;;  %v4720_v52 = vpop.xlane.xlu1 %2111  ;;  %v2036_v21 = vmul.f32 %v3581_v46, %v2034_v5  ;;  %vm2041_vm2 = vweird.f32 %v3581_v46 }
 0x71d   :  { %vm2042_vm10 = vmor %vm2040_vm9, %vm2041_vm2  ;;  %v3583_v60 = vpop.eup %3582 }
 0x71e   :  { %v2037_v20 = vsub.f32 1.0, %v2036_v21  ;;  %v1958_v30 = vmul.f32 %v3583_v60, %v4716_v61  ;;  %vm1963_vm12 = vweird.f32 %v3583_v60 }
 0x71f   :  { %vm1964_vm14 = vmor %vm1962_vm13, %vm1963_vm12  ;;  %vm2118_vm13 = vweird.f32 %v4720_v52 }
 0x720   :  { %v2038_v41 = vmul.f32 %v3581_v46, %v2037_v20  ;;  %v1959_v33 = vsub.f32 1.0, %v1958_v30 }
 0x722   :  { %v2039_v38 = vadd.f32 %v3581_v46, %v2038_v41 }
 0x724   :  { %v4712_v47 = vpop.xlane.xlu0 %2345  ;;  %v2043_v17 = vsel %vm2042_vm10, %v3581_v46, %v2039_v38 }
 0x725   :  { %v2048_v57 = vsel %vm2045_vm11, %v2047_v31, %v2043_v17  ;;  %v2124_v31 = vand.u32 2147483648, %v4720_v52 }
 0x726   :  { %v2049_v40 = vmul.f32 %v4623_v42, %v2048_v57  ;;  %v1960_v42 = vmul.f32 %v3583_v60, %v1959_v33  ;;  %v2122_v57 = vand.u32 2147483647, %v4720_v52  ;;  %v2280_v33 = vand.u32 2147483648, %v4708_v45 }
 0x728   :  { %2128 = vrot.lane.b32.xlu1 %v4671_v59, %s3812_s25  ;;  %v1961_v3 = vadd.f32 %v3583_v60, %v1960_v42  ;;  %v2281_v12 = vor.u32 1.1754944e-38, %v2280_v33 }
 0x72a   :  { %v1965_v49 = vsel %vm1964_vm14, %v3583_v60, %v1961_v3 }
 0x72b   :  { %v1970_v50 = vsel %vm1967_vm15, %v1969_v11, %v1965_v49  ;;  %vm2123_vm15 = vcmp.eq.f32.partialorder %v2122_v57, 8.507059e+37 }
 0x72c   :  { %v4718_v53 = vpop.xlane.xlu0 %2456  ;;  %v4722_v56 = vpop.xlane.xlu1 %2610  ;;  %v1971_v38 = vmul.f32 %v4615_v35, %v1970_v50 }
 0x734   :  { %v4724_v25 = vpop.xlane.xlu0 %2688 }
 0x73d   :  { %2766 = vadd.xlane.f32.xlu2 %v2765_v27 }
 0x755   :  { %2362 = vrot.lane.b32.xlu2 %v4671_v59, %s3811_s24 }
 0x757   :  { %v1895_v39 = vpop.permute.xlu1 %1894  ;;  %v2917_v44 = vpop.xlane.xlu2 %2916 }
 0x758   :  { %v2051_v1 = vpop.permute.xlu0 %2050  ;;  %v2918_v16 = vsub.f32 %v4667_v18, %v2917_v44  ;;  %1915 = vmatpush.msrb.mxu0 %v1895_v39 }
 0x759   :  { %3398 = vmatmul.msk.f32.vlgmr.msrb.gmra.mxu0 %vm267_vm3, %v1892_v51 }
 0x75a   :  { %v2919_v59 = vmul.f32 1.442695, %v2918_v16  ;;  %2071 = vmatpush.msra.mxu0 %v2051_v1 }
 0x75c   :  { %3584 = vpow2.f32 %v2919_v59 }
 0x75e   :  { %v4732_v6 = vpop.f32.mrf.mxu0 }
 0x75f   :  { %2627 = vrot.lane.b32.xlu2 %v4732_v6, %s3808_s8  ;;  %v2995_v58 = vpop.xlane.xlu2 %2994 }
 0x760   :  { %v2207_v62 = vpop.permute.xlu0 %2206  ;;  %v2996_v18 = vsub.f32 %v4680_v32, %v2995_v58 }
 0x761   :  { %2227 = vmatpush.msrb.mxu0 %v2207_v62 }
 0x762   :  { %v4739_v2 = vpop.eup %3584  ;;  %v2997_v37 = vmul.f32 1.442695, %v2996_v18  ;;  %3404 = vmatmul.msk.f32.vlgmr.msra.gmra.mxu0 %vm267_vm3, %v2049_v40  ;;  %v2125_v40 = vor.u32 1.1754944e-38, %v2124_v31 }
 0x763   :  { %v2921_v9 = vsel %vm267_vm3, %v4739_v2, 0.0 }
 0x764   :  { %3586 = vpow2.f32 %v2997_v37  ;;  %2922 = vadd.xlane.f32.xlu1 %v2921_v9 }
 0x767   :  { %2705 = vrot.lane.b32.xlu2 %v4732_v6, %s3810_s23  ;;  %v2190_v32 = vpop.xlane.xlu2 %2189 }
 0x768   :  { %3588 = vrcp.f32 %v2190_v32  ;;  %v2202_v43 = vand.u32 2147483648, %v2190_v32  ;;  %v2200_v24 = vand.u32 2147483647, %v2190_v32  ;;  %vm2196_vm9 = vweird.f32 %v2190_v32 }
 0x769   :  { %3590 = vrcp.f32 %v4720_v52 }
 0x76a   :  { %v4746_v5 = vpop.eup %3586  ;;  %v2203_v61 = vor.u32 1.1754944e-38, %v2202_v43  ;;  %vm2201_vm11 = vcmp.eq.f32.partialorder %v2200_v24, 8.507059e+37  ;;  %3592 = vrcp.f32 %v4708_v45 }
 0x76b   :  { %v2999_v7 = vsel %vm267_vm3, %v4746_v5, 0.0  ;;  %3594 = vrcp.f32 %v4718_v53 }
 0x76c   :  { %3000 = vadd.xlane.f32.xlu0 %v2999_v7  ;;  %3596 = vrcp.f32 %v4712_v47 }
 0x76d   :  { %3598 = vrcp.f32 %v4722_v56 }
 0x76e   :  { %v3589_v27 = vpop.eup %3588 }
 0x76f   :  { %v2192_v13 = vmul.f32 %v3589_v27, %v2190_v32  ;;  %2861 = vrot.lane.b32.xlu2 %v4732_v6, %s3813_s26  ;;  %v4755_v46 = vpop.xlane.xlu2 %2531  ;;  %vm2197_vm2 = vweird.f32 %v3589_v27  ;;  %v3591_v44 = vpop.eup %3590 }
 0x770   :  { %vm2198_vm10 = vmor %vm2196_vm9, %vm2197_vm2  ;;  %v2114_v35 = vmul.f32 %v3591_v44, %v4720_v52  ;;  %vm2119_vm12 = vweird.f32 %v3591_v44  ;;  %vm2274_vm9 = vweird.f32 %v4708_v45  ;;  %v2278_v52 = vand.u32 2147483647, %v4708_v45 }
 0x771   :  { %v2193_v21 = vsub.f32 1.0, %v2192_v13  ;;  %vm2120_vm14 = vmor %vm2118_vm13, %vm2119_vm12  ;;  %vm2463_vm13 = vweird.f32 %v4718_v53  ;;  %3600 = vrcp.f32 %v4755_v46 }
 0x772   :  { %v2115_v51 = vsub.f32 1.0, %v2114_v35 }
 0x773   :  { %v2194_v20 = vmul.f32 %v3589_v27, %v2193_v21  ;;  %v2467_v21 = vand.u32 2147483647, %v4718_v53 }
 0x774   :  { %v2116_v28 = vmul.f32 %v3591_v44, %v2115_v51 }
 0x775   :  { %v2195_v23 = vadd.f32 %v3589_v27, %v2194_v20 }
 0x776   :  { %v2117_v16 = vadd.f32 %v3591_v44, %v2116_v28  ;;  %v2621_v28 = vand.u32 2147483647, %v4722_v56 }
 0x777   :  { %v2199_v41 = vsel %vm2198_vm10, %v3589_v27, %v2195_v23  ;;  %3017 = vrot.lane.b32.xlu2 %v4732_v6, %s3811_s24  ;;  %v1973_v34 = vpop.permute.xlu2 %1972  ;;  %v2285_v27 = vpop.permute.xlu0 %2284 }
 0x778   :  { %v2204_v26 = vsel %vm2201_vm11, %v2203_v61, %v2199_v41  ;;  %1993 = vmatpush.msra.mxu2 %v1973_v34  ;;  %v2121_v58 = vsel %vm2120_vm14, %v3591_v44, %v2117_v16  ;;  %vm2279_vm11 = vcmp.eq.f32.partialorder %v2278_v52, 8.507059e+37 }
 0x779   :  { %3401 = vmatmul.msk.f32.vlgmr.msra.gmra.mxu2 %vm267_vm3, %v1971_v38  ;;  %v2205_v39 = vmul.f32 %v4687_v29, %v2204_v26  ;;  %v3593_v29 = vpop.eup %3592  ;;  %v2126_v30 = vsel %vm2123_vm15, %v2125_v40, %v2121_v58  ;;  %vm2468_vm15 = vcmp.eq.f32.partialorder %v2467_v21, 8.507059e+37  ;;  %v2356_v38 = vand.u32 2147483647, %v4712_v47 }
 0x77a   :  { %v2270_v1 = vmul.f32 %v3593_v29, %v4708_v45  ;;  %v3595_v59 = vpop.eup %3594  ;;  %vm2275_vm2 = vweird.f32 %v3593_v29  ;;  %v2127_v42 = vmul.f32 %v4630_v54, %v2126_v30  ;;  %v2469_v54 = vand.u32 2147483648, %v4718_v53 }
 0x77b   :  { %3410 = vmatmul.msk.f32.vlgmr.msrb.gmra.mxu0 %vm267_vm3, %v2205_v39  ;;  %v2459_v18 = vmul.f32 %v3595_v59, %v4718_v53  ;;  %vm2276_vm10 = vmor %vm2274_vm9, %vm2275_vm2  ;;  %v3597_v22 = vpop.eup %3596  ;;  %vm2464_vm12 = vweird.f32 %v3595_v59  ;;  %vm2352_vm9 = vweird.f32 %v4712_v47 }
 0x77c   :  { %v2271_v17 = vsub.f32 1.0, %v2270_v1  ;;  %v2348_v45 = vmul.f32 %v3597_v22, %v4712_v47  ;;  %vm2465_vm14 = vmor %vm2463_vm13, %vm2464_vm12  ;;  %v3599_v24 = vpop.eup %3598  ;;  %vm2353_vm2 = vweird.f32 %v3597_v22  ;;  %vm2617_vm13 = vweird.f32 %v4722_v56 }
 0x77d   :  { %2549 = vrot.lane.b32.xlu1 %v4732_v6, %s3809_s20  ;;  %v2460_v9 = vsub.f32 1.0, %v2459_v18  ;;  %v2613_v61 = vmul.f32 %v3599_v24, %v4722_v56  ;;  %vm2618_vm12 = vweird.f32 %v3599_v24 }
 0x77e   :  { %v2272_v62 = vmul.f32 %v3593_v29, %v2271_v17  ;;  %v2349_v20 = vsub.f32 1.0, %v2348_v45 }
 0x77f   :  { %v2461_v3 = vmul.f32 %v3595_v59, %v2460_v9  ;;  %v2614_v53 = vsub.f32 1.0, %v2613_v61 }
 0x780   :  { %2783 = vrot.lane.b32.xlu0 %v4732_v6, %s3812_s25  ;;  %v2273_v37 = vadd.f32 %v3593_v29, %v2272_v62  ;;  %v2350_v23 = vmul.f32 %v3597_v22, %v2349_v20 }
 0x781   :  { %v2462_v49 = vadd.f32 %v3595_v59, %v2461_v3  ;;  %v2615_v44 = vmul.f32 %v3599_v24, %v2614_v53 }
 0x782   :  { %v4777_v60 = vpop.xlane.xlu1 %2844  ;;  %v2277_v7 = vsel %vm2276_vm10, %v3593_v29, %v2273_v37  ;;  %v2351_v34 = vadd.f32 %v3597_v22, %v2350_v23  ;;  %vm2354_vm10 = vmor %vm2352_vm9, %vm2353_vm2  ;;  %v2623_v29 = vand.u32 2147483648, %v4722_v56  ;;  %v3601_v56 = vpop.eup %3600  ;;  %vm2538_vm9 = vweird.f32 %v4755_v46 }
 0x783   :  { %v2282_v13 = vsel %vm2279_vm11, %v2281_v12, %v2277_v7  ;;  %v2466_v43 = vsel %vm2465_vm14, %v3595_v59, %v2462_v49  ;;  %vm2357_vm11 = vcmp.eq.f32.partialorder %v2356_v38, 8.507059e+37  ;;  %vm2619_vm14 = vmor %vm2617_vm13, %vm2618_vm12  ;;  %v2534_v18 = vmul.f32 %v3601_v56, %v4755_v46 }
 0x784   :  { %v2283_v11 = vmul.f32 %v4628_v55, %v2282_v13  ;;  %v2358_v55 = vand.u32 2147483648, %v4712_v47  ;;  %v2355_v39 = vsel %vm2354_vm10, %v3597_v22, %v2351_v34  ;;  %v2624_v17 = vor.u32 1.1754944e-38, %v2623_v29 }
 0x785   :  { %2939 = vrot.lane.b32.xlu1 %v4732_v6, %s3814_s1  ;;  %v2535_v40 = vsub.f32 1.0, %v2534_v18  ;;  %vm2539_vm2 = vweird.f32 %v3601_v56  ;;  %v2544_v49 = vand.u32 2147483648, %v4755_v46  ;;  %v2701_v38 = vand.u32 2147483648, %v4724_v25 }
 0x786   :  { %v2359_v35 = vor.u32 1.1754944e-38, %v2358_v55  ;;  %vm2540_vm10 = vmor %vm2538_vm9, %vm2539_vm2  ;;  %vm2695_vm9 = vweird.f32 %v4724_v25  ;;  %v2857_v18 = vand.u32 2147483648, %v4777_v60 }
 0x788   :  { %v2360_v51 = vsel %vm2357_vm11, %v2359_v35, %v2355_v39 }
 0x789   :  { %v2361_v16 = vmul.f32 %v4638_v4, %v2360_v51 }
 0x79a   :  { %v2129_v32 = vpop.permute.xlu1 %2128 }
 0x79b   :  { %2149 = vmatpush.msrb.mxu2 %v2129_v32  ;;  %v2536_v32 = vmul.f32 %v3601_v56, %v2535_v40 }
 0x79c   :  { %3407 = vmatmul.msk.f32.vlgmr.msrb.gmra.mxu2 %vm267_vm3, %v2127_v42 }
 0x79d   :  { %2305 = vmatpush.msra.mxu2 %v2285_v27  ;;  %v2537_v27 = vadd.f32 %v3601_v56, %v2536_v32  ;;  %v2858_v32 = vor.u32 1.1754944e-38, %v2857_v18 }
 0x79f   :  { %2491 = vmatpush.msrb.mxu2 %v4732_v6  ;;  %v2470_v6 = vor.u32 1.1754944e-38, %v2469_v54  ;;  %v2542_v54 = vand.u32 2147483647, %v4755_v46 }
 0x7a1   :  { %v2471_v50 = vsel %vm2468_vm15, %v2470_v6, %v2466_v43  ;;  %vm2622_vm15 = vcmp.eq.f32.partialorder %v2621_v28, 8.507059e+37  ;;  %v2541_v43 = vsel %vm2540_vm10, %v3601_v56, %v2537_v27  ;;  %vm2543_vm13 = vcmp.eq.f32.partialorder %v2542_v54, 8.507059e+37  ;;  %v4872_v56 = vpop.f32.mrf.mxu2 }
 0x7a2   :  { %v2472_v41 = vmul.f32 %v4643_v8, %v2471_v50  ;;  %v2616_v8 = vadd.f32 %v3599_v24, %v2615_v44 }
 0x7a4   :  { %3413 = vmatmul.msk.f32.vlgmr.msra.gmra.mxu2 %vm267_vm3, %v2283_v11  ;;  %v2620_v47 = vsel %vm2619_vm14, %v3599_v24, %v2616_v8  ;;  %v2545_v24 = vor.u32 1.1754944e-38, %v2544_v49 }
 0x7a5   :  { %v2625_v59 = vsel %vm2622_vm15, %v2624_v17, %v2620_v47 }
 0x7a6   :  { %v2626_v57 = vmul.f32 %v4645_v36, %v2625_v59  ;;  %v2546_v46 = vsel %vm2543_vm13, %v2545_v24, %v2541_v43 }
 0x7a7   :  { %v2547_v51 = vmul.f32 %v4693_v0, %v2546_v46  ;;  %v3082_v46 = vld [vmem:[#allocation10 + $0x78] sm:$0xff] }
 0x7a8   :  { %3102 = vmatpush.msra.mxu1 %v3082_v46 }
 0x7ac   :  { %3419 = vmatmul.msk.f32.vlgmr.msrb.gmra.mxu2 %vm267_vm3, %v2472_v41 }
 0x7b0   :  { %v4800_v26 = vpop.xlane.xlu2 %2766 }
 0x7b1   :  { %3602 = vrcp.f32 %v4800_v26  ;;  %v2779_v20 = vand.u32 2147483648, %v4800_v26  ;;  %vm2773_vm12 = vweird.f32 %v4800_v26  ;;  %v2777_v50 = vand.u32 2147483647, %v4800_v26 }
 0x7b2   :  { %3604 = vrcp.f32 %v4724_v25 }
 0x7b3   :  { %v2780_v53 = vor.u32 1.1754944e-38, %v2779_v20  ;;  %vm2778_vm2 = vcmp.eq.f32.partialorder %v2777_v50, 8.507059e+37 }
 0x7b7   :  { %v3603_v62 = vpop.eup %3602 }
 0x7b8   :  { %v2363_v1 = vpop.permute.xlu2 %2362  ;;  %v2769_v36 = vmul.f32 %v3603_v62, %v4800_v26  ;;  %v4818_v30 = vpop.eup %3604  ;;  %vm2774_vm11 = vweird.f32 %v3603_v62  ;;  %v2699_v26 = vand.u32 2147483647, %v4724_v25 }
 0x7b9   :  { %2383 = vmatpush.msra.mxu0 %v2363_v1  ;;  %v2691_v52 = vmul.f32 %v4818_v30, %v4724_v25  ;;  %vm2775_vm14 = vmor %vm2773_vm12, %vm2774_vm11  ;;  %vm2696_vm15 = vweird.f32 %v4818_v30 }
 0x7ba   :  { %3416 = vmatmul.msk.f32.vlgmr.msra.gmra.mxu0 %vm267_vm3, %v2361_v16  ;;  %v2770_v9 = vsub.f32 1.0, %v2769_v36  ;;  %vm4851_vm10 = vmor %vm2695_vm9, %vm2696_vm15  ;;  %v2702_v16 = vor.u32 1.1754944e-38, %v2701_v38  ;;  %vm2700_vm13 = vcmp.eq.f32.partialorder %v2699_v26, 8.507059e+37  ;;  %vm2851_vm9 = vweird.f32 %v4777_v60 }
 0x7bb   :  { %v2692_v3 = vsub.f32 1.0, %v2691_v52  ;;  %v2855_v36 = vand.u32 2147483647, %v4777_v60 }
 0x7bc   :  { %v2771_v42 = vmul.f32 %v3603_v62, %v2770_v9 }
 0x7bd   :  { %v2693_v11 = vmul.f32 %v4818_v30, %v2692_v3 }
 0x7be   :  { %v2772_v45 = vadd.f32 %v3603_v62, %v2771_v42 }
 0x7bf   :  { %v2694_v41 = vadd.f32 %v4818_v30, %v2693_v11 }
 0x7c0   :  { %v2628_v31 = vpop.permute.xlu2 %2627  ;;  %v2776_v23 = vsel %vm2775_vm14, %v3603_v62, %v2772_v45 }
 0x7c1   :  { %2648 = vmatpush.msra.mxu2 %v2628_v31  ;;  %v2781_v39 = vsel %vm2778_vm2, %v2780_v53, %v2776_v23  ;;  %v2698_v28 = vsel %vm4851_vm10, %v4818_v30, %v2694_v41  ;;  %v3081_v23 = vld [vmem:[#allocation10 + $0x70] sm:$0xff] }
 0x7c2   :  { %3425 = vmatmul.msk.f32.vlgmr.msra.gmra.mxu2 %vm267_vm3, %v2626_v57  ;;  %v2782_v59 = vmul.f32 %v4710_v10, %v2781_v39  ;;  %v2703_v57 = vsel %vm2700_vm13, %v2702_v16, %v2698_v28  ;;  %3103 = vmatpush.msra.mxu1 %v3081_v23 }
 0x7c8   :  { %v2706_v12 = vpop.permute.xlu2 %2705 }
 0x7d0   :  { %v2862_v44 = vpop.permute.xlu2 %2861 }
 0x7d6   :  { %v1917_v4 = vpop.f32.mrf.mxu0 }
 0x7d7   :  { %2389 = vrot.lane.b32.xlu1 %v1917_v4, %s3815_s3  ;;  %v4813_v58 = vpop.xlane.xlu1 %2922 }
 0x7d8   :  { %3606 = vrcp.f32 %v4813_v58  ;;  %v2935_v1 = vand.u32 2147483648, %v4813_v58  ;;  %vm2929_vm12 = vweird.f32 %v4813_v58  ;;  %v2933_v47 = vand.u32 2147483647, %v4813_v58 }
 0x7d9   :  { %3608 = vrcp.f32 %v4777_v60 }
 0x7da   :  { %v2936_v10 = vor.u32 1.1754944e-38, %v2935_v1  ;;  %vm2934_vm2 = vcmp.eq.f32.partialorder %v2933_v47, 8.507059e+37 }
 0x7de   :  { %v4822_v33 = vpop.eup %3606 }
 0x7df   :  { %v2073_v37 = vpop.f32.mrf.mxu0  ;;  %v2925_v7 = vmul.f32 %v4822_v33, %v4813_v58  ;;  %v4828_v22 = vpop.xlane.xlu0 %3000  ;;  %vm2930_vm11 = vweird.f32 %v4822_v33 }
 0x7e0   :  { %2397 = vrot.lane.b32.xlu2 %v2073_v37, %s3817_s28  ;;  %v4830_v13 = vpop.eup %3608  ;;  %3610 = vrcp.f32 %v4828_v22  ;;  %vm4868_vm14 = vmor %vm2929_vm12, %vm2930_vm11  ;;  %v2704_v37 = vmul.f32 %v4653_v63, %v2703_v57  ;;  %vm2856_vm11 = vcmp.eq.f32.partialorder %v2855_v36, 8.507059e+37  ;;  %v3013_v3 = vand.u32 2147483648, %v4828_v22 }
 0x7e1   :  { %v2926_v21 = vsub.f32 1.0, %v2925_v7  ;;  %v2847_v6 = vmul.f32 %v4830_v13, %v4777_v60  ;;  %vm2852_vm15 = vweird.f32 %v4830_v13  ;;  %vm3007_vm13 = vweird.f32 %v4828_v22 }
 0x7e2   :  { %vm2853_vm10 = vmor %vm2851_vm9, %vm2852_vm15  ;;  %v3011_v27 = vand.u32 2147483647, %v4828_v22 }
 0x7e3   :  { %v2927_v61 = vmul.f32 %v4822_v33, %v2926_v21  ;;  %v2848_v34 = vsub.f32 1.0, %v2847_v6 }
 0x7e4   :  { %vm3012_vm15 = vcmp.eq.f32.partialorder %v3011_v27, 8.507059e+37 }
 0x7e5   :  { %v2928_v29 = vadd.f32 %v4822_v33, %v2927_v61  ;;  %v2849_v25 = vmul.f32 %v4830_v13, %v2848_v34  ;;  %v3080_v61 = vld [vmem:[#allocation10 + $0x68] sm:$0xff]  ;;  %v3079_v34 = vld [vmem:[#allocation10 + $0x60] sm:$0xff] }
 0x7e6   :  { %v4845_v55 = vpop.eup %3610  ;;  %3104 = vmatpush.msra.mxu1 %v3080_v61  ;;  %v3472_v61 = vld [vmem:[#allocation11 + $0x4] ss:$0 sm:$0xff] }
 0x7e7   :  { %v3003_v0 = vmul.f32 %v4845_v55, %v4828_v22  ;;  %v2932_v4 = vsel %vm4868_vm14, %v4822_v33, %v2928_v29  ;;  %v2850_v58 = vadd.f32 %v4830_v13, %v2849_v25  ;;  %v3018_v33 = vpop.permute.xlu2 %3017  ;;  %vm3008_vm12 = vweird.f32 %v4845_v55 }
 0x7e8   :  { %v2937_v40 = vsel %vm2934_vm2, %v2936_v10, %v2932_v4  ;;  %vm3009_vm14 = vmor %vm3007_vm13, %vm3008_vm12  ;;  %3105 = vmatpush.msra.mxu1 %v3079_v34 }
 0x7e9   :  { %v3004_v62 = vsub.f32 1.0, %v3003_v0  ;;  %v2854_v9 = vsel %vm2853_vm10, %v4830_v13, %v2850_v58  ;;  %v2938_v42 = vmul.f32 %v4739_v2, %v2937_v40  ;;  %v3014_v13 = vor.u32 1.1754944e-38, %v3013_v3 }
 0x7ea   :  { %v2859_v7 = vsel %vm2856_vm11, %v2858_v32, %v2854_v9 }
 0x7eb   :  { %v3005_v52 = vmul.f32 %v4845_v55, %v3004_v62 }
 0x7ed   :  { %v3006_v63 = vadd.f32 %v4845_v55, %v3005_v52 }
 0x7ef   :  { %v2550_v35 = vpop.permute.xlu1 %2549  ;;  %v3010_v2 = vsel %vm3009_vm14, %v4845_v55, %v3006_v63 }
 0x7f0   :  { %2570 = vmatpush.msrb.mxu0 %v2550_v35  ;;  %v3015_v49 = vsel %vm3012_vm15, %v3014_v13, %v3010_v2 }
 0x7f1   :  { %3422 = vmatmul.msk.f32.vlgmr.msrb.gmra.mxu0 %vm267_vm3, %v2547_v51  ;;  %v3016_v45 = vmul.f32 %v4746_v5, %v3015_v49 }
 0x7f2   :  { %2726 = vmatpush.msra.mxu0 %v2706_v12  ;;  %v2784_v17 = vpop.permute.xlu0 %2783  ;;  %v2860_v12 = vmul.f32 %v4699_v14, %v2859_v7 }
 0x7f3   :  { %2804 = vmatpush.msrb.mxu2 %v2784_v17 }
 0x7f4   :  { %2882 = vmatpush.msrb.mxu0 %v2862_v44  ;;  %3431 = vmatmul.msk.f32.vlgmr.msrb.gmra.mxu2 %vm267_vm3, %v2782_v59 }
 0x7f7   :  { %v2940_v30 = vpop.permute.xlu1 %2939 }
 0x7f8   :  { %2960 = vmatpush.msra.mxu2 %v2940_v30  ;;  %v2229_v54 = vpop.f32.mrf.mxu0  ;;  %v3471_v30 = vld [vmem:[#allocation11 + $0x3] ss:$0 sm:$0xff] }
 0x7f9   :  { %3428 = vmatmul.msk.f32.vlgmr.msra.gmra.mxu0 %vm267_vm3, %v2704_v37 }
 0x7fa   :  { %3038 = vmatpush.msra.mxu0 %v3018_v33 }
 0x7fc   :  { %v1995_v60 = vpop.f32.mrf.mxu2  ;;  %3437 = vmatmul.msk.f32.vlgmr.msra.gmra.mxu2 %vm267_vm3, %v2938_v42 }
 0x7fd   :  { %2393 = vrot.lane.b32.xlu0 %v1995_v60, %s3802_s22 }
 0x801   :  { %3434 = vmatmul.msk.f32.vlgmr.msrb.gmra.mxu0 %vm267_vm3, %v2860_v12 }
 0x805   :  { %2405 = vrot.lane.b32.xlu0 %v2229_v54, %s3819_s30 }
 0x809   :  { %3440 = vmatmul.msk.f32.vlgmr.msra.gmra.mxu0 %vm267_vm3, %v3016_v45  ;;  %v3168_v45 = vld [vmem:[%s5034_s6 + $0x18] sm:$0xff] }
 0x80a   :  { %3190 = vmatpush.msrb.mxu2 %v3168_v45 }
 0x81f   :  { %v2151_v21 = vpop.f32.mrf.mxu2 }
 0x820   :  { %2401 = vrot.lane.b32.xlu1 %v2151_v21, %s3816_s27  ;;  %v3167_v21 = vld [vmem:[%s5034_s6 + $0x10] sm:$0xff] }
 0x821   :  { %3191 = vmatpush.msrb.mxu2 %v3167_v21 }
 0x827   :  { %v2307_v22 = vpop.f32.mrf.mxu2 }
 0x828   :  { %2409 = vrot.lane.b32.xlu2 %v2307_v22, %s3818_s29  ;;  %v3166_v22 = vld [vmem:[%s5034_s6 + $0x8] sm:$0xff] }
 0x829   :  { %3192 = vmatpush.msrb.mxu2 %v3166_v22 }
 0x82f   :  { %v2493_v11 = vpop.f32.mrf.mxu2 }
 0x837   :  { %v2385_v14 = vpop.f32.mrf.mxu0 }
 0x838   :  { %2413 = vrot.lane.b32.xlu1 %v2385_v14, %s3820_s11  ;;  %v3165_v14 = vld [vmem:[%s5034_s6] sm:$0xff] }
 0x839   :  { %3193 = vmatpush.msrb.mxu2 %v3165_v14 }
 0x83a   :  { %v2398_v39 = vpop.permute.xlu2 %2397 }
 0x845   :  { %v2650_v43 = vpop.f32.mrf.mxu2 }
 0x846   :  { %3048 = vrot.lane.b32.xlu2 %v2650_v43, %s3802_s22 }
 0x849   :  { %v2390_v53 = vpop.permute.xlu1 %2389 }
 0x84a   :  { %v2416_v38 = vsel %vm238_vm1, %v4872_v56, %v2390_v53  ;;  %v3473_v53 = vld [vmem:[#allocation11 + $0x5] ss:$0 sm:$0xff] }
 0x86e   :  { %v2572_v6 = vpop.f32.mrf.mxu0 }
 0x86f   :  { %3044 = vrot.lane.b32.xlu0 %v2572_v6, %s3815_s3  ;;  %v2394_v55 = vpop.permute.xlu0 %2393 }
 0x870   :  { %v2417_v26 = vsel %vm267_vm3, %v2416_v38, %v2394_v55 }
 0x871   :  { %v2418_v35 = vsel %vm899_vm4, %v2417_v26, %v2398_v39  ;;  %v3218_v26 = vld [vmem:[%s5035_s7 + $0x78] sm:$0xff]  ;;  %v3217_v39 = vld [vmem:[%s5035_s7 + $0x70] sm:$0xff] }
 0x872   :  { %3220 = vmatpush.msrb.mxu3 %v3218_v26 }
 0x874   :  { %3221 = vmatpush.msrb.mxu3 %v3217_v39  ;;  %v3476_v39 = vld [vmem:[#allocation11 + $0x7] ss:$0 sm:$0xff] }
 0x876   :  { %v2728_v20 = vpop.f32.mrf.mxu0 }
 0x877   :  { %v2806_v5 = vpop.f32.mrf.mxu2  ;;  %3052 = vrot.lane.b32.xlu1 %v2728_v20, %s3817_s28  ;;  %v2406_v8 = vpop.permute.xlu0 %2405 }
 0x878   :  { %3056 = vrot.lane.b32.xlu0 %v2806_v5, %s3816_s27 }
 0x87e   :  { %v2884_v24 = vpop.f32.mrf.mxu0 }
 0x87f   :  { %v2962_v50 = vpop.f32.mrf.mxu2  ;;  %3060 = vrot.lane.b32.xlu2 %v2884_v24, %s3819_s30 }
 0x880   :  { %3064 = vrot.lane.b32.xlu1 %v2962_v50, %s3818_s29 }
 0x882   :  { %v2410_v28 = vpop.permute.xlu2 %2409 }
 0x886   :  { %v3040_v41 = vpop.f32.mrf.mxu0 }
 0x887   :  { %3068 = vrot.lane.b32.xlu0 %v3040_v41, %s3820_s11 }
 0x892   :  { %v2402_v44 = vpop.permute.xlu1 %2401 }
 0x893   :  { %v2419_v51 = vsel %vm901_vm5, %v2418_v35, %v2402_v44  ;;  %v3216_v44 = vld [vmem:[%s5035_s7 + $0x68] sm:$0xff] }
 0x894   :  { %v2420_v29 = vsel %vm903_vm6, %v2419_v51, %v2406_v8  ;;  %v3215_v8 = vld [vmem:[%s5035_s7 + $0x60] sm:$0xff]  ;;  %3222 = vmatpush.msrb.mxu3 %v3216_v44 }
 0x895   :  { %v2421_v1 = vsel %vm905_vm7, %v2420_v29, %v2410_v28  ;;  %v3214_v28 = vld [vmem:[%s5035_s7 + $0x58] sm:$0xff] }
 0x896   :  { %3223 = vmatpush.msrb.mxu3 %v3215_v8 }
 0x898   :  { %3224 = vmatpush.msrb.mxu3 %v3214_v28 }
 0x8a0   :  { %v3049_v59 = vpop.permute.xlu2 %3048 }
 0x8aa   :  { %v2414_v25 = vpop.permute.xlu1 %2413 }
 0x8ab   :  { %v2422_v0 = vsel %vm907_vm8, %v2421_v1, %v2414_v25  ;;  %v3213_v25 = vld [vmem:[%s5035_s7 + $0x50] sm:$0xff]  ;;  %v3212_v1 = vld [vmem:[%s5035_s7 + $0x48] sm:$0xff] }
 0x8ac   :  { %3441 = vmatmul.msk.f32.vlgmr.msra.gmra.mxu1 %vm152_vm0, %v2422_v0  ;;  %3225 = vmatpush.msrb.mxu3 %v3213_v25  ;;  %v3211_v0 = vld [vmem:[%s5035_s7 + $0x40] sm:$0xff] }
 0x8ae   :  { %3226 = vmatpush.msrb.mxu3 %v3212_v1 }
 0x8b0   :  { %3227 = vmatpush.msrb.mxu3 %v3211_v0 }
 0x8d9   :  { %v3061_v10 = vpop.permute.xlu2 %3060 }
 0x8e1   :  { %v3045_v16 = vpop.permute.xlu0 %3044 }
 0x8e2   :  { %v3071_v17 = vsel %vm238_vm1, %v2493_v11, %v3045_v16 }
 0x8e3   :  { %v3072_v31 = vsel %vm267_vm3, %v3071_v17, %v3049_v59  ;;  %v3209_v59 = vld [vmem:[%s5035_s7 + $0x30] sm:$0xff] }
 0x8e9   :  { %v3053_v47 = vpop.permute.xlu1 %3052 }
 0x8ea   :  { %v3057_v57 = vpop.permute.xlu0 %3056  ;;  %v3073_v56 = vsel %vm899_vm4, %v3072_v31, %v3053_v47  ;;  %v3210_v47 = vld [vmem:[%s5035_s7 + $0x38] sm:$0xff] }
 0x8eb   :  { %v3074_v4 = vsel %vm901_vm5, %v3073_v56, %v3057_v57  ;;  %3228 = vmatpush.msrb.mxu3 %v3210_v47  ;;  %v3208_v57 = vld [vmem:[%s5035_s7 + $0x28] sm:$0xff] }
 0x8ec   :  { %v3075_v62 = vsel %vm903_vm6, %v3074_v4, %v3061_v10  ;;  %v3207_v4 = vld [vmem:[%s5035_s7 + $0x20] sm:$0xff]  ;;  %v3206_v10 = vld [vmem:[%s5035_s7 + $0x18] sm:$0xff] }
 0x8ed   :  { %3229 = vmatpush.msrb.mxu3 %v3209_v59 }
 0x8ef   :  { %3230 = vmatpush.msrb.mxu3 %v3208_v57 }
 0x8f1   :  { %3231 = vmatpush.msrb.mxu3 %v3207_v4 }
 0x8f2   :  { %v3065_v58 = vpop.permute.xlu1 %3064 }
 0x8f3   :  { %v3076_v18 = vsel %vm905_vm7, %v3075_v62, %v3065_v58  ;;  %3232 = vmatpush.msrb.mxu3 %v3206_v10 }
 0x8f9   :  { %v3069_v36 = vpop.permute.xlu0 %3068 }
 0x8fa   :  { %v3077_v40 = vsel %vm907_vm8, %v3076_v18, %v3069_v36 }
 0x8fb   :  { %3442 = vmatmul.msk.f32.gmra.mxu1 %vm152_vm0, %v3077_v40 }
 0x929   :  { %v3107_v37 = vpop.f32.mrf.mxu1 }
 0x92a   :  { %v3108_v9 = vadd.f32 %v3471_v30, %v3107_v37  ;;  %v3205_v37 = vld [vmem:[%s5035_s7 + $0x10] sm:$0xff] }
 0x92b   :  { %3233 = vmatpush.msrb.mxu3 %v3205_v37 }
 0x92c   :  { %v3113_v33 = vadd.f32 %v3108_v9, %v4604_v19  ;;  %v3204_v9 = vld [vmem:[%s5035_s7 + $0x8] sm:$0xff] }
 0x92d   :  { %3234 = vmatpush.msrb.mxu3 %v3204_v9 }
 0x92e   :  { %v3115_v52 = vsel %vm152_vm0, %v3113_v33, 0.0 }
 0x92f   :  { %3116 = vadd.xlane.f32.xlu2 %v3115_v52  ;;  %v3474_v52 = vld [vmem:[%s5037_s9] ss:$0 sm:$0xff] }
 0x978   :  { %v3110_v32 = vpop.f32.mrf.mxu1 }
 0x979   :  { %v3111_v42 = vadd.f32 %v3471_v30, %v3110_v32 }
 0x97b   :  { %v3114_v7 = vadd.f32 %v3111_v42, %v4661_v48 }
 0x97d   :  { %v3118_v60 = vsel %vm152_vm0, %v3114_v7, 0.0 }
 0x97e   :  { %3119 = vadd.xlane.f32.xlu1 %v3118_v60 }
 0x9a2   :  { %v3117_v63 = vpop.xlane.xlu2 %3116 }
 0x9a3   :  { %v3121_v3 = vmul.f32 %v3117_v63, %v4505_v15 }
 0x9a5   :  { %v3123_v27 = vsub.f32 %v3113_v33, %v3121_v3  ;;  %v3203_v33 = vld [vmem:[%s5035_s7] sm:$0xff]  ;;  %s3822_s7 = smov [#allocation13]  }
 0x9a6   :  { %3235 = vmatpush.msrb.mxu3 %v3203_v33  ;;  %s3301_s9 = sshll.u32 %s3822_s7, 4  ;;  %s3302_s9 = int_to_ptr.vmem [resolvable:$true] %s3301_s9 }
 0x9a7   :  { %v3125_v12 = vmul.f32 %v3123_v27, %v3123_v27 }
 0x9a9   :  { %v3127_v2 = vsel %vm152_vm0, %v3125_v12, 0.0 }
 0x9aa   :  { %3128 = vadd.xlane.f32.xlu0 %v3127_v2 }
 0x9f1   :  { %v3120_v13 = vpop.xlane.xlu1 %3119 }
 0x9f2   :  { %v3122_v19 = vmul.f32 %v3120_v13, %v4505_v15 }
 0x9f4   :  { %v4935_v49 = vsub.f32 %v3114_v7, %v3122_v19 }
 0x9f6   :  { %v3126_v54 = vmul.f32 %v4935_v49, %v4935_v49 }
 0x9f8   :  { %v3130_v48 = vsel %vm152_vm0, %v3126_v54, 0.0 }
 0x9f9   :  { %3131 = vadd.xlane.f32.xlu2 %v3130_v48 }
 0xa1d   :  { %v3129_v11 = vpop.xlane.xlu0 %3128 }
 0xa1e   :  { %v3133_v43 = vmul.f32 %v3129_v11, %v4505_v15 }
 0xa20   :  { %v3135_v6 = vadd.f32 1e-05, %v3133_v43 }
 0xa22   :  { %3612 = vrsqrt.f32 %v3135_v6  ;;  %vm3143_vm3 = vweird.f32 %v3135_v6 }
 0xa28   :  { %v3613_v20 = vpop.eup %3612 }
 0xa29   :  { %v3138_v5 = vmul.f32 %v3613_v20, %v3135_v6  ;;  %vm3144_vm1 = vweird.f32 %v3613_v20 }
 0xa2a   :  { %vm3145_vm4 = vmor %vm3143_vm3, %vm3144_vm1 }
 0xa2b   :  { %v3139_v24 = vmul.f32 %v3613_v20, %v3138_v5 }
 0xa2d   :  { %v3140_v50 = vmul.f32 0.5, %v3139_v24 }
 0xa2f   :  { %v3141_v46 = vsub.f32 1.5, %v3140_v50 }
 0xa31   :  { %v3142_v23 = vmul.f32 %v3613_v20, %v3141_v46 }
 0xa33   :  { %v3146_v41 = vsel %vm3145_vm4, %v3613_v20, %v3142_v23 }
 0xa34   :  { %v3157_v34 = vmul.f32 %v3146_v41, %v3123_v27  ;;  %v3475_v27 = vld [vmem:[#allocation11 + $0x6] ss:$0 sm:$0xff] }
 0xa36   :  { %v3160_v55 = vmul.f32 %v3472_v61, %v3157_v34 }
 0xa38   :  { %v4953_v38 = vadd.f32 %v3473_v53, %v3160_v55 }
 0xa3a   :  { %3443 = vmatmul.msk.f32.vlgmr.msrb.gmra.mxu2 %vm152_vm0, %v4953_v38 }
 0xa6c   :  { %v3132_v35 = vpop.xlane.xlu2 %3131 }
 0xa6d   :  { %v3134_v51 = vmul.f32 %v3132_v35, %v4505_v15 }
 0xa6f   :  { %v3136_v29 = vadd.f32 1e-05, %v3134_v51  ;;  %v3477_v51 = vld [vmem:[#allocation11 + $0x8] ss:$0 sm:$0xff] }
 0xa71   :  { %3614 = vrsqrt.f32 %v3136_v29  ;;  %vm3153_vm6 = vweird.f32 %v3136_v29 }
 0xa77   :  { %v3615_v16 = vpop.eup %3614 }
 0xa78   :  { %v3148_v17 = vmul.f32 %v3615_v16, %v3136_v29  ;;  %vm3154_vm5 = vweird.f32 %v3615_v16 }
 0xa79   :  { %vm3155_vm7 = vmor %vm3153_vm6, %vm3154_vm5 }
 0xa7a   :  { %v3149_v31 = vmul.f32 %v3615_v16, %v3148_v17 }
 0xa7c   :  { %v3150_v56 = vmul.f32 0.5, %v3149_v31 }
 0xa7e   :  { %v3151_v58 = vsub.f32 1.5, %v3150_v56 }
 0xa80   :  { %v3152_v62 = vmul.f32 %v3615_v16, %v3151_v58 }
 0xa82   :  { %v3156_v18 = vsel %vm3155_vm7, %v3615_v16, %v3152_v62 }
 0xa83   :  { %v3158_v36 = vmul.f32 %v3156_v18, %v4935_v49 }
 0xa85   :  { %v3161_v40 = vmul.f32 %v3472_v61, %v3158_v36 }
 0xa87   :  { %v3164_v30 = vadd.f32 %v3473_v53, %v3161_v40 }
 0xa89   :  { %3444 = vmatmul.msk.f32.gmra.mxu2 %vm152_vm0, %v3164_v30 }
 0xabd   :  { %v3195_v32 = vpop.f32.mrf.mxu2 }
 0xabe   :  { %v3196_v42 = vadd.f32 %v3474_v52, %v3195_v32 }
 0xac0   :  { %v3201_v7 = vmax.f32 %v3196_v42, 0.0 }
 0xac2   :  { %3236 = vmatmul.f32.vlgmr.msrb.gmra.mxu3 %v3201_v7 }
 0xb0c   :  { %v3198_v60 = vpop.f32.mrf.mxu2 }
 0xb0d   :  { %v3199_v63 = vadd.f32 %v3474_v52, %v3198_v60 }
 0xb0f   :  { %v3202_v3 = vmax.f32 %v3199_v63, 0.0 }
 0xb11   :  { %3239 = vmatmul.f32.gmra.mxu3 %v3202_v3 }
 0xb45   :  { %v3237_v12 = vpop.f32.mrf.mxu3 }
 0xb46   :  { %v3238_v2 = vadd.f32 %v3475_v27, %v3237_v12 }
 0xb48   :  { %v3243_v13 = vadd.f32 %v3238_v2, %v4953_v38 }
 0xb4a   :  { %v3245_v19 = vsel %vm152_vm0, %v3243_v13, 0.0 }
 0xb4b   :  { %3246 = vadd.xlane.f32.xlu1 %v3245_v19 }
 0xb94   :  { %v3240_v49 = vpop.f32.mrf.mxu3 }
 0xb95   :  { %v3241_v54 = vadd.f32 %v3475_v27, %v3240_v49 }
 0xb97   :  { %v3244_v48 = vadd.f32 %v3241_v54, %v3164_v30 }
 0xb99   :  { %v3248_v45 = vsel %vm152_vm0, %v3244_v48, 0.0 }
 0xb9a   :  { %3249 = vadd.xlane.f32.xlu0 %v3248_v45 }
 0xbbe   :  { %v3247_v21 = vpop.xlane.xlu1 %3246 }
 0xbbf   :  { %v3251_v22 = vmul.f32 %v3247_v21, %v4505_v15 }
 0xbc1   :  { %v3253_v14 = vsub.f32 %v3243_v13, %v3251_v22 }
 0xbc3   :  { %v3255_v11 = vmul.f32 %v3253_v14, %v3253_v14 }
 0xbc5   :  { %v3257_v43 = vsel %vm152_vm0, %v3255_v11, 0.0 }
 0xbc6   :  { %3258 = vadd.xlane.f32.xlu2 %v3257_v43 }
 0xc0d   :  { %v3250_v6 = vpop.xlane.xlu0 %3249 }
 0xc0e   :  { %v3252_v20 = vmul.f32 %v3250_v6, %v4505_v15 }
 0xc10   :  { %v3254_v5 = vsub.f32 %v3244_v48, %v3252_v20 }
 0xc12   :  { %v3256_v24 = vmul.f32 %v3254_v5, %v3254_v5 }
 0xc14   :  { %v3260_v50 = vsel %vm152_vm0, %v3256_v24, 0.0 }
 0xc15   :  { %3261 = vadd.xlane.f32.xlu1 %v3260_v50 }
 0xc39   :  { %v3259_v46 = vpop.xlane.xlu2 %3258 }
 0xc3a   :  { %v3263_v23 = vmul.f32 %v3259_v46, %v4505_v15 }
 0xc3c   :  { %v3265_v61 = vadd.f32 1e-05, %v3263_v23 }
 0xc3e   :  { %3616 = vrsqrt.f32 %v3265_v61  ;;  %vm3273_vm2 = vweird.f32 %v3265_v61 }
 0xc44   :  { %v3617_v41 = vpop.eup %3616 }
 0xc45   :  { %v3268_v34 = vmul.f32 %v3617_v41, %v3265_v61  ;;  %vm3274_vm8 = vweird.f32 %v3617_v41 }
 0xc46   :  { %vm3275_vm9 = vmor %vm3273_vm2, %vm3274_vm8 }
 0xc47   :  { %v3269_v53 = vmul.f32 %v3617_v41, %v3268_v34 }
 0xc49   :  { %v3270_v55 = vmul.f32 0.5, %v3269_v53 }
 0xc4b   :  { %v3271_v38 = vsub.f32 1.5, %v3270_v55 }
 0xc4d   :  { %v3272_v26 = vmul.f32 %v3617_v41, %v3271_v38 }
 0xc4f   :  { %v3276_v44 = vsel %vm3275_vm9, %v3617_v41, %v3272_v26 }
 0xc50   :  { %v3287_v35 = vmul.f32 %v3276_v44, %v3253_v14 }
 0xc52   :  { %v3290_v8 = vmul.f32 %v3476_v39, %v3287_v35 }
 0xc54   :  { %v3293_v29 = vadd.f32 %v3477_v51, %v3290_v8 }
 0xc56   :  { %3295 = vst.msk [vmem:[#allocation13] sm:$0xff] %vm152_vm0, %v3293_v29 }
 0xc88   :  { %v3262_v28 = vpop.xlane.xlu1 %3261 }
 0xc89   :  { %v3264_v25 = vmul.f32 %v3262_v28, %v4505_v15 }
 0xc8b   :  { %v3266_v1 = vadd.f32 1e-05, %v3264_v25 }
 0xc8d   :  { %3618 = vrsqrt.f32 %v3266_v1  ;;  %vm3283_vm11 = vweird.f32 %v3266_v1 }
 0xc93   :  { %v3619_v0 = vpop.eup %3618 }
 0xc94   :  { %v3278_v16 = vmul.f32 %v3619_v0, %v3266_v1  ;;  %vm3284_vm10 = vweird.f32 %v3619_v0 }
 0xc95   :  { %vm3285_vm12 = vmor %vm3283_vm11, %vm3284_vm10 }
 0xc96   :  { %v3279_v47 = vmul.f32 %v3619_v0, %v3278_v16 }
 0xc98   :  { %v3280_v17 = vmul.f32 0.5, %v3279_v47 }
 0xc9a   :  { %v3281_v59 = vsub.f32 1.5, %v3280_v17 }
 0xc9c   :  { %v3282_v31 = vmul.f32 %v3619_v0, %v3281_v59 }
 0xc9e   :  { %v3286_v57 = vsel %vm3285_vm12, %v3619_v0, %v3282_v31 }
 0xc9f   :  { %v3288_v56 = vmul.f32 %v3286_v57, %v3254_v5 }
 0xca1   :  { %v3291_v15 = vmul.f32 %v3476_v39, %v3288_v56 }
 0xca3   :  { %v3294_v4 = vadd.f32 %v3477_v51, %v3291_v15 }
 0xca5   :  { %3296 = vst.msk [vmem:[#allocation13 + $0x8] sm:$0xff] %vm152_vm0, %v3294_v4 }
 0xca6   :  { %3309 = dma.vmem_to_hbm [thread:$0]  %s3302_s9, 256, %s3304_s0, [#allocation4], %s3801_s21, %s3801_s21, %s3802_s22  }
 0xca7   :  { %3798 = dma.done.wait [#allocation4], 256  }
 0xca8   :  { %3799 = vsyncadd [#allocation4], 4294967040 }
 0xca9   :  { %3314 = vsyncpa [#allocation3], 1 }
 0xcaa   :  { %3315 = vsyncpa [#allocation6], 1 }
 0xcab   :  { %3316 = vsyncpa [#allocation9], 1 }
 0xcac   :  { %3317 = vsyncpa [#allocation12], 1 }
 0xcad   :  { %3318 = vsyncpa [#allocation4], 1 }

</bundles_post_ra>
